<compile_context>
chip_gen: v7x
topology: tpu7x:2x2x1
jax: 0.10.0
libtpu: 0.0.40
codegen_flags: <defaults>
</compile_context>

<pallas_src>
import functools

import jax
import jax.numpy as jnp
from jax import lax
from jax.experimental import pallas as pl
from jax.experimental.pallas import tpu as pltpu

# Module constants (from the PyTorch source)
N_EMBD = 192
NUM_HEADS = 6
HEAD_SIZE = N_EMBD // NUM_HEADS  # 32 (concat of heads must equal n_embd for proj)


# ----------------------------------------------------------------------------
# Fused kernel: QKV projection + per-head causal attention + proj accumulation
# ----------------------------------------------------------------------------
def _fused_mha_kernel(x_ref, wqkv_ref, wp_ref, bp_ref, o_ref, *,
                      num_heads, head_size):
    # x_ref   : (Bb, T, C)  block of batch rows
    # wqkv_ref: (C, 3C)     bf16 stacked [Q(all heads, pre-scaled) | K | V]
    # wp_ref  : (C, C)      bf16 projection weight (in x out)
    # bp_ref  : (1, C)      f32 projection bias
    # o_ref   : (Bb, T, C)  f32 lane-dense output block
    Bb, T, C = x_ref.shape
    M = Bb * T

    # bf16 operands -> MXU, f32 accumulation.  Elementwise math stays f32.
    x = x_ref[...].reshape(M, C).astype(jnp.bfloat16)

    # One lane-dense (M, C) @ (C, 3C) matmul for all heads' Q, K, V.
    # The C**-0.5 score scale is already folded into the Q columns of wqkv.
    qkv = jnp.dot(x, wqkv_ref[...], preferred_element_type=jnp.float32)  # (M, 3C) f32

    # Causal mask (shared across heads and batch rows).  Finite "masked" value:
    # exp(neg - m) == 0 exactly, no -inf/NaN risk even if reused with padded rows.
    row = lax.broadcasted_iota(jnp.int32, (T, T), 0)
    col = lax.broadcasted_iota(jnp.int32, (T, T), 1)
    causal = col <= row
    neg = jnp.float32(-1e30)

    y = None
    for h in range(num_heads):              # static unroll, H = 6
        lo = h * head_size
        qh = qkv[:, lo:lo + head_size].reshape(Bb, T, head_size).astype(jnp.bfloat16)
        kh = qkv[:, C + lo:C + lo + head_size].reshape(Bb, T, head_size).astype(jnp.bfloat16)
        vh = qkv[:, 2 * C + lo:2 * C + lo + head_size].reshape(Bb, T, head_size).astype(jnp.bfloat16)

        # scores per batch row (attention never crosses batch rows); scale pre-folded.
        s = jnp.einsum('btd,bsd->bts', qh, kh,
                       preferred_element_type=jnp.float32)              # (Bb, T, T) f32
        s = jnp.where(causal, s, neg)

        # row-wise softmax in f32 (diagonal always unmasked -> denom > 0)
        m = jnp.max(s, axis=-1, keepdims=True)
        p = jnp.exp(s - m)
        denom = jnp.sum(p, axis=-1, keepdims=True)
        wei = p * pl.reciprocal(denom, approx=True)      # EUP slot, effectively free

        oh = jnp.einsum('bts,bsd->btd', wei.astype(jnp.bfloat16), vh,
                        preferred_element_type=jnp.float32)             # (Bb, T, hs)

        # Per-head projection partial: (M, hs) @ (hs, C), accumulated in f32.
        # (No concat of 32-lane head slabs; output stays lane-dense on N = C.)
        part = jnp.dot(oh.reshape(M, head_size).astype(jnp.bfloat16),
                       wp_ref[lo:lo + head_size, :],
                       preferred_element_type=jnp.float32)              # (M, C)
        y = part if y is None else y + part

    y = y + bp_ref[...]                                                 # broadcast (1, C)
    o_ref[...] = y.reshape(Bb, T, C).astype(o_ref.dtype)


def _pick_block_batch(B, T, target_rows=256, min_grid=2):
    """Largest divisor Bb of B with Bb*T <= target_rows, preferring >= min_grid grid
    steps so dual-TensorCore chips (v7x) keep both cores busy."""
    divs = [bb for bb in range(1, B + 1) if B % bb == 0 and bb * T <= target_rows]
    if not divs:
        return 1
    pref = [bb for bb in divs if B // bb >= min_grid]
    return max(pref) if pref else max(divs)


def multi_head_attention_forward(x, params):
    """x: (B, T, C) f32; params = (wqkv (C,3C) bf16, wp (C,C) bf16, bp (1,C) f32)."""
    wqkv, wp, bp = params
    B, T, C = x.shape
    Bb = _pick_block_batch(B, T)
    grid = (B // Bb,)

    kernel = functools.partial(
        _fused_mha_kernel, num_heads=NUM_HEADS, head_size=HEAD_SIZE)

    flops = (2 * B * T * C * (3 * C)                    # QKV projection
             + 4 * B * NUM_HEADS * T * T * HEAD_SIZE    # scores + p @ v
             + 2 * B * T * C * C)                       # output projection
    bytes_accessed = (x.size * x.dtype.itemsize
                      + wqkv.size * wqkv.dtype.itemsize
                      + wp.size * wp.dtype.itemsize
                      + bp.size * bp.dtype.itemsize
                      + B * T * C * 4)                  # f32 output
    cost = pl.CostEstimate(flops=flops,
                           transcendentals=B * NUM_HEADS * T * T,
                           bytes_accessed=bytes_accessed)

    return pl.pallas_call(
        kernel,
        out_shape=jax.ShapeDtypeStruct((B, T, C), jnp.float32),
        grid_spec=pltpu.PrefetchScalarGridSpec(
            num_scalar_prefetch=0,
            grid=grid,
            in_specs=[
                pl.BlockSpec((Bb, T, C), lambda b: (b, 0, 0)),     # batch-row block
                pl.BlockSpec((C, 3 * C), lambda b: (0, 0)),        # resident stacked QKV W
                pl.BlockSpec((C, C), lambda b: (0, 0)),            # resident proj W
                pl.BlockSpec((1, C), lambda b: (0, 0)),            # resident proj bias
            ],
            out_specs=pl.BlockSpec((Bb, T, C), lambda b: (b, 0, 0)),
        ),
        compiler_params=pltpu.CompilerParams(
            dimension_semantics=("parallel",)   # shard batch-blocks across TCs on v7x
        ),
        cost_estimate=cost,
    )(x, wqkv, wp, bp)


# ----------------------------------------------------------------------------
# Weight packing helper + pure-JAX reference
# ----------------------------------------------------------------------------
def stack_qkv_weights(wq, wk, wv, scale):
    """wq/wk/wv: (H, C, hs) per-head weights (in x out) -> (C, 3C) stacked weight.

    Column layout: [Q_h0..Q_hH-1 | K_h0.. | V_h0..].  The attention score scale
    (C**-0.5 in the reference) is folded into the Q columns so the kernel never
    multiplies scores by a scalar.
    """
    H, C, hs = wq.shape

    def flat(w):
        return jnp.transpose(w, (1, 0, 2)).reshape(C, H * hs)

    return jnp.concatenate([flat(wq) * scale, flat(wk), flat(wv)], axis=1)


def _reference_forward(x, wq, wk, wv, wp, bp):
    B, T, C = x.shape
    outs = []
    for h in range(wq.shape[0]):
        q = x @ wq[h]
        k = x @ wk[h]
        v = x @ wv[h]
        wei = (q @ jnp.swapaxes(k, -2, -1)) * (C ** -0.5)
        mask = jnp.tril(jnp.ones((T, T)))
        wei = jnp.where(mask == 0, -jnp.inf, wei)
        wei = jax.nn.softmax(wei, axis=-1)
        outs.append(wei @ v)
    cat = jnp.concatenate(outs, axis=-1)
    return cat @ wp + bp


if __name__ == "__main__":
    B, T, C, H, hs = 8, 32, N_EMBD, NUM_HEADS, HEAD_SIZE

    key = jax.random.PRNGKey(0)
    kx, kq, kk, kv, kp, kb = jax.random.split(key, 6)

    x = jax.random.normal(kx, (B, T, C), dtype=jnp.float32)

    # Deterministic synthetic parameters (stored as in x out for y = x @ W)
    wq = 0.02 * jax.random.normal(kq, (H, C, hs), dtype=jnp.float32)
    wk = 0.02 * jax.random.normal(kk, (H, C, hs), dtype=jnp.float32)
    wv = 0.02 * jax.random.normal(kv, (H, C, hs), dtype=jnp.float32)
    wp = 0.02 * jax.random.normal(kp, (C, C), dtype=jnp.float32)
    bp = 0.02 * jax.random.normal(kb, (1, C), dtype=jnp.float32)

    scale = float(C) ** -0.5
    # Weights fed to the kernel in bf16 (MXU-native), scale pre-folded into Q cols.
    wqkv_bf16 = stack_qkv_weights(wq, wk, wv, scale).astype(jnp.bfloat16)  # (192, 576)
    wp_bf16 = wp.astype(jnp.bfloat16)

    out = multi_head_attention_forward(x, (wqkv_bf16, wp_bf16, bp))
    out = jax.block_until_ready(out)

    ref = jax.block_until_ready(_reference_forward(x, wq, wk, wv, wp, bp))
    assert out.shape == (B, T, C)
    # Tolerance accounts for bf16 matmul operands + the EUP approximate reciprocal.
    assert jnp.allclose(out, ref, atol=2e-2, rtol=2e-2), "mismatch vs JAX reference"

    print("KERNEL_OK")
</pallas_src>

<mosaic_0001>
module attributes {stable_mosaic.version = 11 : i64} {
  func.func @_fused_mha_kernel(%arg0: i32, %arg1: memref<4x32x192xf32, #tpu.memory_space<vmem>>, %arg2: memref<192x576xbf16, #tpu.memory_space<vmem>>, %arg3: memref<192x192xbf16, #tpu.memory_space<vmem>>, %arg4: memref<1x192xf32, #tpu.memory_space<vmem>>, %arg5: memref<4x32x192xf32, #tpu.memory_space<vmem>>) attributes {dimension_semantics = [#tpu.dimension_semantics<parallel>], iteration_bounds = array<i64: 2>, scalar_prefetch = 0 : i64, scratch_operands = 0 : i64, tpu.core_type = #tpu.core_type<tc>, window_params = [{transform_indices = @transform_0, window_bounds = array<i64: 4, 32, 192>}, {pipeline_mode = #tpu.pipeline_mode<synchronous>, transform_indices = @transform_1, window_bounds = array<i64: 192, 576>}, {pipeline_mode = #tpu.pipeline_mode<synchronous>, transform_indices = @transform_2, window_bounds = array<i64: 192, 192>}, {pipeline_mode = #tpu.pipeline_mode<synchronous>, transform_indices = @transform_3, window_bounds = array<i64: 1, 192>}, {transform_indices = @transform_4, window_bounds = array<i64: 4, 32, 192>}]} {
    %c0 = arith.constant 0 : index
    %c0_0 = arith.constant 0 : index
    %c0_1 = arith.constant 0 : index
    %0 = vector.load %arg1[%c0, %c0_0, %c0_1] : memref<4x32x192xf32, #tpu.memory_space<vmem>>, vector<4x32x192xf32>
    %1 = vector.shape_cast %0 : vector<4x32x192xf32> to vector<128x192xf32>
    %2 = arith.truncf %1 : vector<128x192xf32> to vector<128x192xbf16>
    %c0_2 = arith.constant 0 : index
    %c0_3 = arith.constant 0 : index
    %3 = vector.load %arg2[%c0_2, %c0_3] : memref<192x576xbf16, #tpu.memory_space<vmem>>, vector<192x576xbf16>
    %cst = arith.constant dense<0.000000e+00> : vector<128x576xf32>
    %4 = tpu.matmul %2, %3, %cst {dimension_numbers = #tpu.dot_dimension_numbers<[1], [0], [0], [1], [0, 0, 1, 1], [], []>} : vector<128x192xbf16>, vector<192x576xbf16>, vector<128x576xf32> -> vector<128x576xf32>
    %5 = tpu.iota {dimensions = array<i32: 0>} : vector<32x32xi32>
    %6 = tpu.iota {dimensions = array<i32: 1>} : vector<32x32xi32>
    %7 = arith.cmpi sle, %6, %5 : vector<32x32xi32>
    %8 = vector.extract_strided_slice %4 {offsets = [0, 0], sizes = [128, 32], strides = [1, 1]} : vector<128x576xf32> to vector<128x32xf32>
    %9 = vector.shape_cast %8 : vector<128x32xf32> to vector<4x32x32xf32>
    %10 = arith.truncf %9 : vector<4x32x32xf32> to vector<4x32x32xbf16>
    %11 = vector.extract_strided_slice %4 {offsets = [0, 192], sizes = [128, 32], strides = [1, 1]} : vector<128x576xf32> to vector<128x32xf32>
    %12 = vector.shape_cast %11 : vector<128x32xf32> to vector<4x32x32xf32>
    %13 = arith.truncf %12 : vector<4x32x32xf32> to vector<4x32x32xbf16>
    %14 = vector.extract_strided_slice %4 {offsets = [0, 384], sizes = [128, 32], strides = [1, 1]} : vector<128x576xf32> to vector<128x32xf32>
    %15 = vector.shape_cast %14 : vector<128x32xf32> to vector<4x32x32xf32>
    %16 = arith.truncf %15 : vector<4x32x32xf32> to vector<4x32x32xbf16>
    "tpu.trace_start"() <{level = 10 : i32, message = "btd,bsd->bts"}> : () -> ()
    %cst_4 = arith.constant dense<0.000000e+00> : vector<4x32x32xf32>
    %17 = tpu.matmul %10, %13, %cst_4 {dimension_numbers = #tpu.dot_dimension_numbers<[2], [2], [1], [1], [0, 0, 0, 1, 1, 1], [0], [0]>} : vector<4x32x32xbf16>, vector<4x32x32xbf16>, vector<4x32x32xf32> -> vector<4x32x32xf32>
    %cst_5 = arith.constant -1.000000e+30 : f32
    "tpu.trace_stop"() : () -> ()
    %18 = vector.shape_cast %7 : vector<32x32xi1> to vector<1x32x32xi1>
    %19 = vector.broadcast %18 : vector<1x32x32xi1> to vector<4x32x32xi1>
    %20 = vector.broadcast %cst_5 : f32 to vector<4x32x32xf32>
    %21 = arith.select %19, %17, %20 : vector<4x32x32xi1>, vector<4x32x32xf32>
    %cst_6 = arith.constant dense<0xFF800000> : vector<4x32xf32>
    %22 = vector.multi_reduction <maximumf>, %21, %cst_6 [2] : vector<4x32x32xf32> to vector<4x32xf32>
    %23 = vector.shape_cast %22 : vector<4x32xf32> to vector<4x32x1xf32>
    %24 = vector.broadcast %23 : vector<4x32x1xf32> to vector<4x32x32xf32>
    %25 = arith.subf %21, %24 : vector<4x32x32xf32>
    %26 = math.exp %25 : vector<4x32x32xf32>
    %cst_7 = arith.constant dense<0.000000e+00> : vector<4x32xf32>
    %27 = vector.multi_reduction <add>, %26, %cst_7 [2] : vector<4x32x32xf32> to vector<4x32xf32>
    %28 = vector.shape_cast %27 : vector<4x32xf32> to vector<4x32x1xf32>
    %29 = tpu.reciprocal %28 {approx = true} : vector<4x32x1xf32> -> vector<4x32x1xf32>
    %30 = vector.broadcast %29 : vector<4x32x1xf32> to vector<4x32x32xf32>
    %31 = arith.mulf %26, %30 : vector<4x32x32xf32>
    %32 = arith.truncf %31 : vector<4x32x32xf32> to vector<4x32x32xbf16>
    "tpu.trace_start"() <{level = 10 : i32, message = "bts,bsd->btd"}> : () -> ()
    %cst_8 = arith.constant dense<0.000000e+00> : vector<4x32x32xf32>
    %33 = tpu.matmul %32, %16, %cst_8 {dimension_numbers = #tpu.dot_dimension_numbers<[2], [1], [1], [2], [0, 0, 0, 1, 1, 2], [0], [0]>} : vector<4x32x32xbf16>, vector<4x32x32xbf16>, vector<4x32x32xf32> -> vector<4x32x32xf32>
    "tpu.trace_stop"() : () -> ()
    %34 = vector.shape_cast %33 : vector<4x32x32xf32> to vector<128x32xf32>
    %35 = arith.truncf %34 : vector<128x32xf32> to vector<128x32xbf16>
    %c0_9 = arith.constant 0 : index
    %c0_10 = arith.constant 0 : index
    %36 = vector.load %arg3[%c0_9, %c0_10] : memref<192x192xbf16, #tpu.memory_space<vmem>>, vector<32x192xbf16>
    %cst_11 = arith.constant dense<0.000000e+00> : vector<128x192xf32>
    %37 = tpu.matmul %35, %36, %cst_11 {dimension_numbers = #tpu.dot_dimension_numbers<[1], [0], [0], [1], [0, 0, 1, 1], [], []>} : vector<128x32xbf16>, vector<32x192xbf16>, vector<128x192xf32> -> vector<128x192xf32>
    %38 = vector.extract_strided_slice %4 {offsets = [0, 32], sizes = [128, 32], strides = [1, 1]} : vector<128x576xf32> to vector<128x32xf32>
    %39 = vector.shape_cast %38 : vector<128x32xf32> to vector<4x32x32xf32>
    %40 = arith.truncf %39 : vector<4x32x32xf32> to vector<4x32x32xbf16>
    %41 = vector.extract_strided_slice %4 {offsets = [0, 224], sizes = [128, 32], strides = [1, 1]} : vector<128x576xf32> to vector<128x32xf32>
    %42 = vector.shape_cast %41 : vector<128x32xf32> to vector<4x32x32xf32>
    %43 = arith.truncf %42 : vector<4x32x32xf32> to vector<4x32x32xbf16>
    %44 = vector.extract_strided_slice %4 {offsets = [0, 416], sizes = [128, 32], strides = [1, 1]} : vector<128x576xf32> to vector<128x32xf32>
    %45 = vector.shape_cast %44 : vector<128x32xf32> to vector<4x32x32xf32>
    %46 = arith.truncf %45 : vector<4x32x32xf32> to vector<4x32x32xbf16>
    "tpu.trace_start"() <{level = 10 : i32, message = "btd,bsd->bts"}> : () -> ()
    %cst_12 = arith.constant dense<0.000000e+00> : vector<4x32x32xf32>
    %47 = tpu.matmul %40, %43, %cst_12 {dimension_numbers = #tpu.dot_dimension_numbers<[2], [2], [1], [1], [0, 0, 0, 1, 1, 1], [0], [0]>} : vector<4x32x32xbf16>, vector<4x32x32xbf16>, vector<4x32x32xf32> -> vector<4x32x32xf32>
    %cst_13 = arith.constant -1.000000e+30 : f32
    "tpu.trace_stop"() : () -> ()
    %48 = vector.shape_cast %7 : vector<32x32xi1> to vector<1x32x32xi1>
    %49 = vector.broadcast %48 : vector<1x32x32xi1> to vector<4x32x32xi1>
    %50 = vector.broadcast %cst_13 : f32 to vector<4x32x32xf32>
    %51 = arith.select %49, %47, %50 : vector<4x32x32xi1>, vector<4x32x32xf32>
    %cst_14 = arith.constant dense<0xFF800000> : vector<4x32xf32>
    %52 = vector.multi_reduction <maximumf>, %51, %cst_14 [2] : vector<4x32x32xf32> to vector<4x32xf32>
    %53 = vector.shape_cast %52 : vector<4x32xf32> to vector<4x32x1xf32>
    %54 = vector.broadcast %53 : vector<4x32x1xf32> to vector<4x32x32xf32>
    %55 = arith.subf %51, %54 : vector<4x32x32xf32>
    %56 = math.exp %55 : vector<4x32x32xf32>
    %cst_15 = arith.constant dense<0.000000e+00> : vector<4x32xf32>
    %57 = vector.multi_reduction <add>, %56, %cst_15 [2] : vector<4x32x32xf32> to vector<4x32xf32>
    %58 = vector.shape_cast %57 : vector<4x32xf32> to vector<4x32x1xf32>
    %59 = tpu.reciprocal %58 {approx = true} : vector<4x32x1xf32> -> vector<4x32x1xf32>
    %60 = vector.broadcast %59 : vector<4x32x1xf32> to vector<4x32x32xf32>
    %61 = arith.mulf %56, %60 : vector<4x32x32xf32>
    %62 = arith.truncf %61 : vector<4x32x32xf32> to vector<4x32x32xbf16>
    "tpu.trace_start"() <{level = 10 : i32, message = "bts,bsd->btd"}> : () -> ()
    %cst_16 = arith.constant dense<0.000000e+00> : vector<4x32x32xf32>
    %63 = tpu.matmul %62, %46, %cst_16 {dimension_numbers = #tpu.dot_dimension_numbers<[2], [1], [1], [2], [0, 0, 0, 1, 1, 2], [0], [0]>} : vector<4x32x32xbf16>, vector<4x32x32xbf16>, vector<4x32x32xf32> -> vector<4x32x32xf32>
    "tpu.trace_stop"() : () -> ()
    %64 = vector.shape_cast %63 : vector<4x32x32xf32> to vector<128x32xf32>
    %65 = arith.truncf %64 : vector<128x32xf32> to vector<128x32xbf16>
    %c32 = arith.constant 32 : index
    %c0_17 = arith.constant 0 : index
    %66 = vector.load %arg3[%c32, %c0_17] : memref<192x192xbf16, #tpu.memory_space<vmem>>, vector<32x192xbf16>
    %cst_18 = arith.constant dense<0.000000e+00> : vector<128x192xf32>
    %67 = tpu.matmul %65, %66, %cst_18 {dimension_numbers = #tpu.dot_dimension_numbers<[1], [0], [0], [1], [0, 0, 1, 1], [], []>} : vector<128x32xbf16>, vector<32x192xbf16>, vector<128x192xf32> -> vector<128x192xf32>
    %68 = arith.addf %37, %67 : vector<128x192xf32>
    %69 = vector.extract_strided_slice %4 {offsets = [0, 64], sizes = [128, 32], strides = [1, 1]} : vector<128x576xf32> to vector<128x32xf32>
    %70 = vector.shape_cast %69 : vector<128x32xf32> to vector<4x32x32xf32>
    %71 = arith.truncf %70 : vector<4x32x32xf32> to vector<4x32x32xbf16>
    %72 = vector.extract_strided_slice %4 {offsets = [0, 256], sizes = [128, 32], strides = [1, 1]} : vector<128x576xf32> to vector<128x32xf32>
    %73 = vector.shape_cast %72 : vector<128x32xf32> to vector<4x32x32xf32>
    %74 = arith.truncf %73 : vector<4x32x32xf32> to vector<4x32x32xbf16>
    %75 = vector.extract_strided_slice %4 {offsets = [0, 448], sizes = [128, 32], strides = [1, 1]} : vector<128x576xf32> to vector<128x32xf32>
    %76 = vector.shape_cast %75 : vector<128x32xf32> to vector<4x32x32xf32>
    %77 = arith.truncf %76 : vector<4x32x32xf32> to vector<4x32x32xbf16>
    "tpu.trace_start"() <{level = 10 : i32, message = "btd,bsd->bts"}> : () -> ()
    %cst_19 = arith.constant dense<0.000000e+00> : vector<4x32x32xf32>
    %78 = tpu.matmul %71, %74, %cst_19 {dimension_numbers = #tpu.dot_dimension_numbers<[2], [2], [1], [1], [0, 0, 0, 1, 1, 1], [0], [0]>} : vector<4x32x32xbf16>, vector<4x32x32xbf16>, vector<4x32x32xf32> -> vector<4x32x32xf32>
    %cst_20 = arith.constant -1.000000e+30 : f32
    "tpu.trace_stop"() : () -> ()
    %79 = vector.shape_cast %7 : vector<32x32xi1> to vector<1x32x32xi1>
    %80 = vector.broadcast %79 : vector<1x32x32xi1> to vector<4x32x32xi1>
    %81 = vector.broadcast %cst_20 : f32 to vector<4x32x32xf32>
    %82 = arith.select %80, %78, %81 : vector<4x32x32xi1>, vector<4x32x32xf32>
    %cst_21 = arith.constant dense<0xFF800000> : vector<4x32xf32>
    %83 = vector.multi_reduction <maximumf>, %82, %cst_21 [2] : vector<4x32x32xf32> to vector<4x32xf32>
    %84 = vector.shape_cast %83 : vector<4x32xf32> to vector<4x32x1xf32>
    %85 = vector.broadcast %84 : vector<4x32x1xf32> to vector<4x32x32xf32>
    %86 = arith.subf %82, %85 : vector<4x32x32xf32>
    %87 = math.exp %86 : vector<4x32x32xf32>
    %cst_22 = arith.constant dense<0.000000e+00> : vector<4x32xf32>
    %88 = vector.multi_reduction <add>, %87, %cst_22 [2] : vector<4x32x32xf32> to vector<4x32xf32>
    %89 = vector.shape_cast %88 : vector<4x32xf32> to vector<4x32x1xf32>
    %90 = tpu.reciprocal %89 {approx = true} : vector<4x32x1xf32> -> vector<4x32x1xf32>
    %91 = vector.broadcast %90 : vector<4x32x1xf32> to vector<4x32x32xf32>
    %92 = arith.mulf %87, %91 : vector<4x32x32xf32>
    %93 = arith.truncf %92 : vector<4x32x32xf32> to vector<4x32x32xbf16>
    "tpu.trace_start"() <{level = 10 : i32, message = "bts,bsd->btd"}> : () -> ()
    %cst_23 = arith.constant dense<0.000000e+00> : vector<4x32x32xf32>
    %94 = tpu.matmul %93, %77, %cst_23 {dimension_numbers = #tpu.dot_dimension_numbers<[2], [1], [1], [2], [0, 0, 0, 1, 1, 2], [0], [0]>} : vector<4x32x32xbf16>, vector<4x32x32xbf16>, vector<4x32x32xf32> -> vector<4x32x32xf32>
    "tpu.trace_stop"() : () -> ()
    %95 = vector.shape_cast %94 : vector<4x32x32xf32> to vector<128x32xf32>
    %96 = arith.truncf %95 : vector<128x32xf32> to vector<128x32xbf16>
    %c64 = arith.constant 64 : index
    %c0_24 = arith.constant 0 : index
    %97 = vector.load %arg3[%c64, %c0_24] : memref<192x192xbf16, #tpu.memory_space<vmem>>, vector<32x192xbf16>
    %cst_25 = arith.constant dense<0.000000e+00> : vector<128x192xf32>
    %98 = tpu.matmul %96, %97, %cst_25 {dimension_numbers = #tpu.dot_dimension_numbers<[1], [0], [0], [1], [0, 0, 1, 1], [], []>} : vector<128x32xbf16>, vector<32x192xbf16>, vector<128x192xf32> -> vector<128x192xf32>
    %99 = arith.addf %68, %98 : vector<128x192xf32>
    %100 = vector.extract_strided_slice %4 {offsets = [0, 96], sizes = [128, 32], strides = [1, 1]} : vector<128x576xf32> to vector<128x32xf32>
    %101 = vector.shape_cast %100 : vector<128x32xf32> to vector<4x32x32xf32>
    %102 = arith.truncf %101 : vector<4x32x32xf32> to vector<4x32x32xbf16>
    %103 = vector.extract_strided_slice %4 {offsets = [0, 288], sizes = [128, 32], strides = [1, 1]} : vector<128x576xf32> to vector<128x32xf32>
    %104 = vector.shape_cast %103 : vector<128x32xf32> to vector<4x32x32xf32>
    %105 = arith.truncf %104 : vector<4x32x32xf32> to vector<4x32x32xbf16>
    %106 = vector.extract_strided_slice %4 {offsets = [0, 480], sizes = [128, 32], strides = [1, 1]} : vector<128x576xf32> to vector<128x32xf32>
    %107 = vector.shape_cast %106 : vector<128x32xf32> to vector<4x32x32xf32>
    %108 = arith.truncf %107 : vector<4x32x32xf32> to vector<4x32x32xbf16>
    "tpu.trace_start"() <{level = 10 : i32, message = "btd,bsd->bts"}> : () -> ()
    %cst_26 = arith.constant dense<0.000000e+00> : vector<4x32x32xf32>
    %109 = tpu.matmul %102, %105, %cst_26 {dimension_numbers = #tpu.dot_dimension_numbers<[2], [2], [1], [1], [0, 0, 0, 1, 1, 1], [0], [0]>} : vector<4x32x32xbf16>, vector<4x32x32xbf16>, vector<4x32x32xf32> -> vector<4x32x32xf32>
    %cst_27 = arith.constant -1.000000e+30 : f32
    "tpu.trace_stop"() : () -> ()
    %110 = vector.shape_cast %7 : vector<32x32xi1> to vector<1x32x32xi1>
    %111 = vector.broadcast %110 : vector<1x32x32xi1> to vector<4x32x32xi1>
    %112 = vector.broadcast %cst_27 : f32 to vector<4x32x32xf32>
    %113 = arith.select %111, %109, %112 : vector<4x32x32xi1>, vector<4x32x32xf32>
    %cst_28 = arith.constant dense<0xFF800000> : vector<4x32xf32>
    %114 = vector.multi_reduction <maximumf>, %113, %cst_28 [2] : vector<4x32x32xf32> to vector<4x32xf32>
    %115 = vector.shape_cast %114 : vector<4x32xf32> to vector<4x32x1xf32>
    %116 = vector.broadcast %115 : vector<4x32x1xf32> to vector<4x32x32xf32>
    %117 = arith.subf %113, %116 : vector<4x32x32xf32>
    %118 = math.exp %117 : vector<4x32x32xf32>
    %cst_29 = arith.constant dense<0.000000e+00> : vector<4x32xf32>
    %119 = vector.multi_reduction <add>, %118, %cst_29 [2] : vector<4x32x32xf32> to vector<4x32xf32>
    %120 = vector.shape_cast %119 : vector<4x32xf32> to vector<4x32x1xf32>
    %121 = tpu.reciprocal %120 {approx = true} : vector<4x32x1xf32> -> vector<4x32x1xf32>
    %122 = vector.broadcast %121 : vector<4x32x1xf32> to vector<4x32x32xf32>
    %123 = arith.mulf %118, %122 : vector<4x32x32xf32>
    %124 = arith.truncf %123 : vector<4x32x32xf32> to vector<4x32x32xbf16>
    "tpu.trace_start"() <{level = 10 : i32, message = "bts,bsd->btd"}> : () -> ()
    %cst_30 = arith.constant dense<0.000000e+00> : vector<4x32x32xf32>
    %125 = tpu.matmul %124, %108, %cst_30 {dimension_numbers = #tpu.dot_dimension_numbers<[2], [1], [1], [2], [0, 0, 0, 1, 1, 2], [0], [0]>} : vector<4x32x32xbf16>, vector<4x32x32xbf16>, vector<4x32x32xf32> -> vector<4x32x32xf32>
    "tpu.trace_stop"() : () -> ()
    %126 = vector.shape_cast %125 : vector<4x32x32xf32> to vector<128x32xf32>
    %127 = arith.truncf %126 : vector<128x32xf32> to vector<128x32xbf16>
    %c96 = arith.constant 96 : index
    %c0_31 = arith.constant 0 : index
    %128 = vector.load %arg3[%c96, %c0_31] : memref<192x192xbf16, #tpu.memory_space<vmem>>, vector<32x192xbf16>
    %cst_32 = arith.constant dense<0.000000e+00> : vector<128x192xf32>
    %129 = tpu.matmul %127, %128, %cst_32 {dimension_numbers = #tpu.dot_dimension_numbers<[1], [0], [0], [1], [0, 0, 1, 1], [], []>} : vector<128x32xbf16>, vector<32x192xbf16>, vector<128x192xf32> -> vector<128x192xf32>
    %130 = arith.addf %99, %129 : vector<128x192xf32>
    %131 = vector.extract_strided_slice %4 {offsets = [0, 128], sizes = [128, 32], strides = [1, 1]} : vector<128x576xf32> to vector<128x32xf32>
    %132 = vector.shape_cast %131 : vector<128x32xf32> to vector<4x32x32xf32>
    %133 = arith.truncf %132 : vector<4x32x32xf32> to vector<4x32x32xbf16>
    %134 = vector.extract_strided_slice %4 {offsets = [0, 320], sizes = [128, 32], strides = [1, 1]} : vector<128x576xf32> to vector<128x32xf32>
    %135 = vector.shape_cast %134 : vector<128x32xf32> to vector<4x32x32xf32>
    %136 = arith.truncf %135 : vector<4x32x32xf32> to vector<4x32x32xbf16>
    %137 = vector.extract_strided_slice %4 {offsets = [0, 512], sizes = [128, 32], strides = [1, 1]} : vector<128x576xf32> to vector<128x32xf32>
    %138 = vector.shape_cast %137 : vector<128x32xf32> to vector<4x32x32xf32>
    %139 = arith.truncf %138 : vector<4x32x32xf32> to vector<4x32x32xbf16>
    "tpu.trace_start"() <{level = 10 : i32, message = "btd,bsd->bts"}> : () -> ()
    %cst_33 = arith.constant dense<0.000000e+00> : vector<4x32x32xf32>
    %140 = tpu.matmul %133, %136, %cst_33 {dimension_numbers = #tpu.dot_dimension_numbers<[2], [2], [1], [1], [0, 0, 0, 1, 1, 1], [0], [0]>} : vector<4x32x32xbf16>, vector<4x32x32xbf16>, vector<4x32x32xf32> -> vector<4x32x32xf32>
    %cst_34 = arith.constant -1.000000e+30 : f32
    "tpu.trace_stop"() : () -> ()
    %141 = vector.shape_cast %7 : vector<32x32xi1> to vector<1x32x32xi1>
    %142 = vector.broadcast %141 : vector<1x32x32xi1> to vector<4x32x32xi1>
    %143 = vector.broadcast %cst_34 : f32 to vector<4x32x32xf32>
    %144 = arith.select %142, %140, %143 : vector<4x32x32xi1>, vector<4x32x32xf32>
    %cst_35 = arith.constant dense<0xFF800000> : vector<4x32xf32>
    %145 = vector.multi_reduction <maximumf>, %144, %cst_35 [2] : vector<4x32x32xf32> to vector<4x32xf32>
    %146 = vector.shape_cast %145 : vector<4x32xf32> to vector<4x32x1xf32>
    %147 = vector.broadcast %146 : vector<4x32x1xf32> to vector<4x32x32xf32>
    %148 = arith.subf %144, %147 : vector<4x32x32xf32>
    %149 = math.exp %148 : vector<4x32x32xf32>
    %cst_36 = arith.constant dense<0.000000e+00> : vector<4x32xf32>
    %150 = vector.multi_reduction <add>, %149, %cst_36 [2] : vector<4x32x32xf32> to vector<4x32xf32>
    %151 = vector.shape_cast %150 : vector<4x32xf32> to vector<4x32x1xf32>
    %152 = tpu.reciprocal %151 {approx = true} : vector<4x32x1xf32> -> vector<4x32x1xf32>
    %153 = vector.broadcast %152 : vector<4x32x1xf32> to vector<4x32x32xf32>
    %154 = arith.mulf %149, %153 : vector<4x32x32xf32>
    %155 = arith.truncf %154 : vector<4x32x32xf32> to vector<4x32x32xbf16>
    "tpu.trace_start"() <{level = 10 : i32, message = "bts,bsd->btd"}> : () -> ()
    %cst_37 = arith.constant dense<0.000000e+00> : vector<4x32x32xf32>
    %156 = tpu.matmul %155, %139, %cst_37 {dimension_numbers = #tpu.dot_dimension_numbers<[2], [1], [1], [2], [0, 0, 0, 1, 1, 2], [0], [0]>} : vector<4x32x32xbf16>, vector<4x32x32xbf16>, vector<4x32x32xf32> -> vector<4x32x32xf32>
    "tpu.trace_stop"() : () -> ()
    %157 = vector.shape_cast %156 : vector<4x32x32xf32> to vector<128x32xf32>
    %158 = arith.truncf %157 : vector<128x32xf32> to vector<128x32xbf16>
    %c128 = arith.constant 128 : index
    %c0_38 = arith.constant 0 : index
    %159 = vector.load %arg3[%c128, %c0_38] : memref<192x192xbf16, #tpu.memory_space<vmem>>, vector<32x192xbf16>
    %cst_39 = arith.constant dense<0.000000e+00> : vector<128x192xf32>
    %160 = tpu.matmul %158, %159, %cst_39 {dimension_numbers = #tpu.dot_dimension_numbers<[1], [0], [0], [1], [0, 0, 1, 1], [], []>} : vector<128x32xbf16>, vector<32x192xbf16>, vector<128x192xf32> -> vector<128x192xf32>
    %161 = arith.addf %130, %160 : vector<128x192xf32>
    %162 = vector.extract_strided_slice %4 {offsets = [0, 160], sizes = [128, 32], strides = [1, 1]} : vector<128x576xf32> to vector<128x32xf32>
    %163 = vector.shape_cast %162 : vector<128x32xf32> to vector<4x32x32xf32>
    %164 = arith.truncf %163 : vector<4x32x32xf32> to vector<4x32x32xbf16>
    %165 = vector.extract_strided_slice %4 {offsets = [0, 352], sizes = [128, 32], strides = [1, 1]} : vector<128x576xf32> to vector<128x32xf32>
    %166 = vector.shape_cast %165 : vector<128x32xf32> to vector<4x32x32xf32>
    %167 = arith.truncf %166 : vector<4x32x32xf32> to vector<4x32x32xbf16>
    %168 = vector.extract_strided_slice %4 {offsets = [0, 544], sizes = [128, 32], strides = [1, 1]} : vector<128x576xf32> to vector<128x32xf32>
    %169 = vector.shape_cast %168 : vector<128x32xf32> to vector<4x32x32xf32>
    %170 = arith.truncf %169 : vector<4x32x32xf32> to vector<4x32x32xbf16>
    "tpu.trace_start"() <{level = 10 : i32, message = "btd,bsd->bts"}> : () -> ()
    %cst_40 = arith.constant dense<0.000000e+00> : vector<4x32x32xf32>
    %171 = tpu.matmul %164, %167, %cst_40 {dimension_numbers = #tpu.dot_dimension_numbers<[2], [2], [1], [1], [0, 0, 0, 1, 1, 1], [0], [0]>} : vector<4x32x32xbf16>, vector<4x32x32xbf16>, vector<4x32x32xf32> -> vector<4x32x32xf32>
    %cst_41 = arith.constant -1.000000e+30 : f32
    "tpu.trace_stop"() : () -> ()
    %172 = vector.shape_cast %7 : vector<32x32xi1> to vector<1x32x32xi1>
    %173 = vector.broadcast %172 : vector<1x32x32xi1> to vector<4x32x32xi1>
    %174 = vector.broadcast %cst_41 : f32 to vector<4x32x32xf32>
    %175 = arith.select %173, %171, %174 : vector<4x32x32xi1>, vector<4x32x32xf32>
    %cst_42 = arith.constant dense<0xFF800000> : vector<4x32xf32>
    %176 = vector.multi_reduction <maximumf>, %175, %cst_42 [2] : vector<4x32x32xf32> to vector<4x32xf32>
    %177 = vector.shape_cast %176 : vector<4x32xf32> to vector<4x32x1xf32>
    %178 = vector.broadcast %177 : vector<4x32x1xf32> to vector<4x32x32xf32>
    %179 = arith.subf %175, %178 : vector<4x32x32xf32>
    %180 = math.exp %179 : vector<4x32x32xf32>
    %cst_43 = arith.constant dense<0.000000e+00> : vector<4x32xf32>
    %181 = vector.multi_reduction <add>, %180, %cst_43 [2] : vector<4x32x32xf32> to vector<4x32xf32>
    %182 = vector.shape_cast %181 : vector<4x32xf32> to vector<4x32x1xf32>
    %183 = tpu.reciprocal %182 {approx = true} : vector<4x32x1xf32> -> vector<4x32x1xf32>
    %184 = vector.broadcast %183 : vector<4x32x1xf32> to vector<4x32x32xf32>
    %185 = arith.mulf %180, %184 : vector<4x32x32xf32>
    %186 = arith.truncf %185 : vector<4x32x32xf32> to vector<4x32x32xbf16>
    "tpu.trace_start"() <{level = 10 : i32, message = "bts,bsd->btd"}> : () -> ()
    %cst_44 = arith.constant dense<0.000000e+00> : vector<4x32x32xf32>
    %187 = tpu.matmul %186, %170, %cst_44 {dimension_numbers = #tpu.dot_dimension_numbers<[2], [1], [1], [2], [0, 0, 0, 1, 1, 2], [0], [0]>} : vector<4x32x32xbf16>, vector<4x32x32xbf16>, vector<4x32x32xf32> -> vector<4x32x32xf32>
    "tpu.trace_stop"() : () -> ()
    %188 = vector.shape_cast %187 : vector<4x32x32xf32> to vector<128x32xf32>
    %189 = arith.truncf %188 : vector<128x32xf32> to vector<128x32xbf16>
    %c160 = arith.constant 160 : index
    %c0_45 = arith.constant 0 : index
    %190 = vector.load %arg3[%c160, %c0_45] : memref<192x192xbf16, #tpu.memory_space<vmem>>, vector<32x192xbf16>
    %cst_46 = arith.constant dense<0.000000e+00> : vector<128x192xf32>
    %191 = tpu.matmul %189, %190, %cst_46 {dimension_numbers = #tpu.dot_dimension_numbers<[1], [0], [0], [1], [0, 0, 1, 1], [], []>} : vector<128x32xbf16>, vector<32x192xbf16>, vector<128x192xf32> -> vector<128x192xf32>
    %192 = arith.addf %161, %191 : vector<128x192xf32>
    %c0_47 = arith.constant 0 : index
    %c0_48 = arith.constant 0 : index
    %193 = vector.load %arg4[%c0_47, %c0_48] : memref<1x192xf32, #tpu.memory_space<vmem>>, vector<1x192xf32>
    %194 = vector.broadcast %193 : vector<1x192xf32> to vector<128x192xf32>
    %195 = arith.addf %192, %194 : vector<128x192xf32>
    %196 = vector.shape_cast %195 : vector<128x192xf32> to vector<4x32x192xf32>
    %c0_49 = arith.constant 0 : index
    %c0_50 = arith.constant 0 : index
    %c0_51 = arith.constant 0 : index
    %197 = vector.load %arg5[%c0_49, %c0_50, %c0_51] : memref<4x32x192xf32, #tpu.memory_space<vmem>>, vector<4x32x192xf32>
    tpu.vector_store %arg5[%c0_49, %c0_50, %c0_51], %196 {strides = array<i32>} : memref<4x32x192xf32, #tpu.memory_space<vmem>>, vector<4x32x192xf32>,
    return
  }
  func.func @transform_0(%arg0: i32) -> (i32, i32, i32) {
    %c0_i32 = arith.constant 0 : i32
    %c0_i32_0 = arith.constant 0 : i32
    %c0_i32_1 = arith.constant 0 : i32
    return %arg0, %c0_i32, %c0_i32_0 : i32, i32, i32
  }
  func.func @transform_1(%arg0: i32) -> (i32, i32) {
    %c0_i32 = arith.constant 0 : i32
    %c0_i32_0 = arith.constant 0 : i32
    %c0_i32_1 = arith.constant 0 : i32
    return %c0_i32, %c0_i32_0 : i32, i32
  }
  func.func @transform_2(%arg0: i32) -> (i32, i32) {
    %c0_i32 = arith.constant 0 : i32
    %c0_i32_0 = arith.constant 0 : i32
    %c0_i32_1 = arith.constant 0 : i32
    return %c0_i32, %c0_i32_0 : i32, i32
  }
  func.func @transform_3(%arg0: i32) -> (i32, i32) {
    %c0_i32 = arith.constant 0 : i32
    %c0_i32_0 = arith.constant 0 : i32
    %c0_i32_1 = arith.constant 0 : i32
    return %c0_i32, %c0_i32_0 : i32, i32
  }
  func.func @transform_4(%arg0: i32) -> (i32, i32, i32) {
    %c0_i32 = arith.constant 0 : i32
    %c0_i32_0 = arith.constant 0 : i32
    %c0_i32_1 = arith.constant 0 : i32
    return %arg0, %c0_i32, %c0_i32_0 : i32, i32, i32
  }
}

</mosaic_0001>

<bundles_post_ra>
// kernel: tpu_custom_call.1
= control target key start
LH: loop header
LB: loop body
LE: loop exit
PB: predicated region body
PF: predicated region fallthrough
CT: control target
= control target key end

     0   :  { %9 = vsyncpa [#allocation3], 0  ;;  %s11188_s0 = inlined_call_operand.hbm [shape: f32[8,32,192], index: 0, kind: input, shape index: {}]   ;;  %s11189_s1 = inlined_call_operand.hbm [shape: bf16[192,576], index: 1, kind: input, shape index: {}]   ;;  %s11190_s2 = inlined_call_operand.hbm [shape: bf16[192,192], index: 2, kind: input, shape index: {}]   ;;  %s11191_s3 = inlined_call_operand.vmem [shape: f32[1,192], index: 3, kind: input, shape index: {}]   ;;  %s11192_s4 = inlined_call_operand.hbm [shape: f32[8,32,192], index: 4, kind: output, shape index: {}]  }
   0x1   :  { %11 = vsyncpa [#allocation3 + $0x1], 0 }
   0x2   :  { %12 = vsyncpa [#allocation6], 0 }
   0x3   :  { %13 = vsyncpa [#allocation4], 0 }
   0x4   :  { %15 = vsyncpa [#allocation4 + $0x1], 0  ;;  %s8528_s15 = smov 0   ;;  %s8530_s16 = smov 0  }
   0x5   :  { %s8532_s17 = smov 0   ;;  %s8534_s18 = smov 0  }
   0x6 LB: > { %s8549_s19 = sadd.s32 4294967295, %s8485_s18   ;;  %s6678_s20 = sadd.s32 4294967294, %s8485_s18   ;;  %s8485_s18 = sphi %s8534_s18, %s11451_s18   ;;  %s8481_s17 = sphi %s8532_s17, %s11450_s17   ;;  %s8477_s16 = sphi %s8530_s16, %s11449_s16   ;;  %s8473_s15 = sphi %s8528_s15, %s11448_s15  }
   0x7   : > { %p41_p0 = scmp.ne.s32.totalorder %s8477_s16, %s8473_s15  ;;  %p11193_p1 = scmp.eq.s32.totalorder %s8549_s19, 0 }
   0x8   : > { %p134_p3 = scmp.eq.s32.totalorder %s6678_s20, 1  ;;  %p6679_p5 = scmp.ge.s32.totalorder %s8485_s18, 1 }
   0x9   : > { %p8558_p4 = por %p11193_p1, %p41_p0  ;;  %p141_p7 = scmp.lt.s32.totalorder %s8485_s18, 3 }
   0xa   : > { %p8563_p6 = por %p134_p3, %p41_p0  ;;  %s8487_s24 = smov [#allocation5]  }
   0xb   : > { %s11261_s21 = scalar_select %p8558_p4, 1, 0 }
   0xc   : > { %s11262_s22 = scalar_select %p8563_p6, 1, 0 }
   0xd   : > { %p8568_p8 = pnand %p6679_p5, %p141_p7  ;;  %s153_s25 = sshll.u32 %s8487_s24, 4  ;;  %s8572_s25 = int_to_ptr.vmem [resolvable:$true] %s153_s25 }
   0xe   : > { %s8488_s27 = smov [#allocation7]   ;;  %s8329_s5 = scalar_lea.hbm %s11189_s1, 7680 }
   0xf   : > { %p7754_p9 = pneg %p8568_p8  ;;  %s166_s28 = sshll.u32 %s8488_s27, 4  ;;  %s8583_s28 = int_to_ptr.vmem [resolvable:$true] %s166_s28 }
  0x10   : > { %p8330_p12 = scmp.ne.s32.totalorder %s11189_s1, %s8329_s5  ;;  %p8336_p5 = scmp.lt.u32.totalorder %s8329_s5, %s11189_s1 }
  0x11   : > { %p8579_p11 = pnand %p7754_p9, %p11193_p1 }
  0x13   : > { %p8331_p13 = pneg %p8579_p11 }
  0x15   : > { %p8332_p0 = pnand %p8331_p13, %p8330_p12 }
  0x17   : > { %p8333_p3 = pneg %p8332_p0 }
  0x19   : > { %p8338_p7 = pnand %p8336_p5, %p8333_p3 }
  0x1b   : > { %8341 = shalt.err (!%p8338_p7)
}
  0x1c   : > { %s8342_s10 = scalar_lea.vmem %s8572_s25, 7680  ;;  %p8350_p2 = scmp.lt.s32.totalorder %s8572_s25, %s8572_s25 }
  0x1d   : > { %p8343_p9 = scmp.ne.s32.totalorder %s8572_s25, %s8342_s10  ;;  %p8351_p12 = scmp.lt.s32.totalorder %s8342_s10, %s8342_s10 }
  0x1f   : > { %p8345_p10 = pnand %p8343_p9, %p8331_p13  ;;  %p8352_p0 = por %p8351_p12, %p8350_p2 }
  0x21   : > { %p8346_p1 = pneg %p8345_p10 }
  0x23   : > { %p8353_p6 = pnand %p8352_p0, %p8346_p1 }
  0x25   : > { %8356 = shalt.err (!%p8353_p6)
}
  0x26   : > { %s8489_s11 = smov 320   ;;  %s8490_s12 = smov 20  }
  0x27   : > { %7757 = dma.hbm_to_vmem [thread:$0]  (!%p8579_p11), %s11189_s1, 7680, %s8572_s25, [#allocation6], %s8489_s11, %s8489_s11, %s8490_s12  }
  0x28   : > { %s8357_s27 = scalar_lea.hbm %s11190_s2, 3072 }
  0x29   : > { %p8358_p2 = scmp.ne.s32.totalorder %s11190_s2, %s8357_s27  ;;  %p8364_p10 = scmp.lt.u32.totalorder %s8357_s27, %s11190_s2 }
  0x2b   : > { %p8360_p1 = pnand %p8358_p2, %p8331_p13 }
  0x2d   : > { %p8361_p6 = pneg %p8360_p1 }
  0x2f   : > { %p8366_p3 = pnand %p8364_p10, %p8361_p6 }
  0x31   : > { %8369 = shalt.err (!%p8366_p3)
}
  0x32   : > { %s8370_s25 = scalar_lea.vmem %s8583_s28, 3072  ;;  %p8378_p12 = scmp.lt.s32.totalorder %s8583_s28, %s8583_s28 }
  0x33   : > { %p8371_p5 = scmp.ne.s32.totalorder %s8583_s28, %s8370_s25  ;;  %p8379_p0 = scmp.lt.s32.totalorder %s8370_s25, %s8370_s25 }
  0x35   : > { %p8373_p7 = pnand %p8371_p5, %p8331_p13  ;;  %p8380_p2 = por %p8379_p0, %p8378_p12 }
  0x37   : > { %p8374_p9 = pneg %p8373_p7 }
  0x39   : > { %p8381_p1 = pnand %p8380_p2, %p8374_p9 }
  0x3b   : > { %8384 = shalt.err (!%p8381_p1)
}
  0x3c   : > { %s8491_s7 = smov 128   ;;  %s8492_s8 = smov 8  }
  0x3d   : > { %7760 = dma.hbm_to_vmem [thread:$0]  (!%p8579_p11), %s11190_s2, 3072, %s8583_s28, [#allocation6], %s8491_s7, %s8491_s7, %s8492_s8  }
  0x3e   : > { %s8638_s11 = sadd.s32 1, %s8485_s18   ;;  %s28_s13 = sadd.s32 1, %s8481_s17 }
  0x3f   : > { %s25_s12 = ssub.s32 %s8485_s18, %s8638_s11  ;;  %p35_p6 = scmp.ne.s32.totalorder %s8481_s17, %s8477_s16 }
  0x40   : > { %p26_p13 = scmp.eq.s32.totalorder %s25_s12, 0  ;;  %p36_p10 = scmp.eq.s32.totalorder %s8485_s18, 0 }
  0x41   : > { %p11265_p5 = scmp.eq.s32.totalorder %s8549_s19, 1  ;;  %p7771_p9 = scmp.lt.s32.totalorder %s8485_s18, 2 }
  0x42   : > { %s8647_s14 = scalar_select %p26_p13, %s8481_s17, %s28_s13  }
  0x43   : > { %p37_p3 = por %p36_p10, %p35_p6  ;;  %p8651_p7 = por %p11265_p5, %p35_p6 }
  0x44   : > { %s183_s26 = sand.u32 1, %s8481_s17   ;;  %s6951_s28 = sshll.u32 %s8485_s18, 12 }
  0x45   : > { %s11266_s20 = scalar_select %p8651_p7, 1, 0 }
  0x46   : > { %s6683_s24 = sshll.u32 %s183_s26, 8  ;;  %s8661_s30 = scalar_lea.hbm %s11188_s0, %s6951_s28 }
  0x47   : > { %s187_s5 = scalar_lea.vmem [#allocation2], %s6683_s24  ;;  %p8665_p11 = pnand %p7771_p9, %p37_p3 }
  0x48   : > { %s195_s6 = sshll.u32 %s187_s5, 4  ;;  %s8669_s7 = scalar_lea.sflag [#allocation3], %s183_s26  ;;  %s8663_s6 = int_to_ptr.vmem [resolvable:$true] %s195_s6 }
  0x49   : > { %s8385_s8 = scalar_lea.hbm %s8661_s30, 4096  ;;  %p8387_p0 = pneg %p8665_p11 }
  0x4a   : > { %p8386_p12 = scmp.ne.s32.totalorder %s8661_s30, %s8385_s8  ;;  %s8390_s12 = scalar_lea.hbm %s11188_s0, 8192 }
  0x4b   : > { %p8391_p13 = scmp.lt.u32.totalorder %s8661_s30, %s11188_s0  ;;  %p8392_p6 = scmp.lt.u32.totalorder %s8390_s12, %s8385_s8 }
  0x4c   : > { %p8388_p2 = pnand %p8387_p0, %p8386_p12  ;;  %p8394_p3 = scmp.lt.u32.totalorder %s8385_s8, %s8661_s30 }
  0x4d   : > { %p8393_p10 = por %p8392_p6, %p8391_p13 }
  0x4e   : > { %p8389_p1 = pneg %p8388_p2 }
  0x4f   : > { %p8395_p5 = por %p8394_p3, %p8393_p10 }
  0x51   : > { %p8396_p9 = pnand %p8395_p5, %p8389_p1 }
  0x53   : > { %8399 = shalt.err (!%p8396_p9)
}
  0x54   : > { %s8400_s26 = scalar_lea.vmem %s8663_s6, 4096  ;;  %s8493_s28 = smov [#allocation2]  }
  0x55   : > { %p8401_p12 = scmp.ne.s32.totalorder %s8663_s6, %s8400_s26  ;;  %s8405_s27 = sshll.u32 %s8493_s28, 4  ;;  %s8406_s27 = int_to_ptr.vmem [resolvable:$false] %s8405_s27 }
  0x56   : > { %s8407_s29 = scalar_lea.vmem %s8406_s27, 8192  ;;  %p8408_p4 = scmp.lt.s32.totalorder %s8663_s6, %s8406_s27 }
  0x57   : > { %p8403_p2 = pnand %p8401_p12, %p8387_p0  ;;  %p8409_p13 = scmp.lt.s32.totalorder %s8407_s29, %s8400_s26 }
  0x59   : > { %p8404_p7 = pneg %p8403_p2  ;;  %p8410_p6 = por %p8409_p13, %p8408_p4 }
  0x5b   : > { %p8411_p10 = pnand %p8410_p6, %p8404_p7 }
  0x5d   : > { %8414 = shalt.err (!%p8411_p10)
}
  0x5e   : > { %s8494_s5 = smov 256   ;;  %s8495_s8 = smov 16  }
  0x5f   : > { %7764 = dma.hbm_to_vmem [thread:$0]  (!%p8665_p11), %s8661_s30, 4096, %s8663_s6, %s8669_s7, %s8494_s5, %s8494_s5, %s8495_s8  }
  0x60   : > { %207 = sbr.rel (%p8568_p8) target bundleno = 4924 (0x133c), region = 36 }
  0x67   : > { %s8700_s9 = sand.u32 1, %s8477_s16   ;;  %p11268_p4 = scmp.ne.s32.totalorder %s11261_s21, 0 }
  0x68   : > { %s6688_s10 = sshll.u32 %s8700_s9, 8  ;;  %s210_s12 = scalar_lea.sflag [#allocation3], %s8700_s9 }
  0x69   : > { %s8706_s13 = scalar_lea.vmem [#allocation2], %s6688_s10 }
  0x6a   : > { %8460 = dma.done.wait (%p11268_p4), %s210_s12, 4096  }
  0x6b   : > { %8462 = vsyncadd (%p11268_p4), %s210_s12, 4294963200  ;;  %p11269_p7 = scmp.eq.s32.totalorder %s8549_s19, 0 }
  0x6d   : > { %8464 = dma.done.wait (%p11269_p7), [#allocation6], 10752   ;;  %p11270_p8 = pmov %p11269_p7 }
  0x6e   : > { %v7821_v0 = vld [vmem:[#allocation5 + $0x4] ss:$20 sps:$4 sm:$0xff]   ;;  %v7823_v1 = vld [vmem:[#allocation5] ss:$20 sps:$4 sm:$0xff]   ;;  %v7826_v3 = vld [vmem:[#allocation5 + $0x28] ss:$20 sps:$4 sm:$0xff]  }
  0x6f   : > { %8466 = vsyncadd (%p11270_p8), [#allocation6], 4294956544  ;;  %706 = vmatprep.subr.bf16.mxu0 %v7821_v0  ;;  %v7824_v2 = vld [vmem:[#allocation5 + $0x2c] ss:$20 sps:$4 sm:$0xff]   ;;  %v7827_v4 = vld [vmem:[#allocation5 + $0x54] ss:$20 sps:$4 sm:$0xff]  }
  0x70   : > { %707 = vmatpush1.bf16.msra.mxu0 %v7823_v1  ;;  %v7829_v5 = vld [vmem:[#allocation5 + $0x50] ss:$20 sps:$4 sm:$0xff]   ;;  %v7832_v7 = vld [vmem:[#allocation5 + $0x78] ss:$20 sps:$4 sm:$0xff]   ;;  %v7835_v9 = vld [vmem:[#allocation5 + $0xa0] ss:$20 sps:$4 sm:$0xff]  }
  0x71   : > { %708 = vmatprep.subr.bf16.mxu0 %v7824_v2  ;;  %v7830_v6 = vld [vmem:[#allocation5 + $0x7c] ss:$20 sps:$4 sm:$0xff]   ;;  %v7833_v8 = vld [vmem:[#allocation5 + $0xa4] ss:$20 sps:$4 sm:$0xff]   ;;  %v7836_v10 = vld [vmem:[#allocation5 + $0xcc] ss:$20 sps:$4 sm:$0xff]  }
  0x72   : > { %v250_v11 = vld [vmem:[%s8706_s13 + $0x8] sm:$0xff]  ;;  %v252_v12 = vld [vmem:[%s8706_s13 + $0x18] sm:$0xff]  ;;  %vm681_vm0 = vcmask 523264   ;;  %v7841_v16 = vld [vmem:[#allocation5 + $0xf0] ss:$20 sps:$4 sm:$0xff]   ;;  %vm1070_vm1 = vcmask 261120  }
  0x73   : > { %v8718_v13 = vpack.c.bf16 %v252_v12, %v250_v11  ;;  %v7838_v14 = vld [vmem:[#allocation5 + $0xc8] ss:$20 sps:$4 sm:$0xff]   ;;  %v7844_v18 = vld [vmem:[#allocation5 + $0x118] ss:$20 sps:$4 sm:$0xff]   ;;  %v7862_v23 = vld [vmem:[#allocation5 + $0x30] ss:$20 sps:$4 sm:$0xff]  }
  0x74   : > { %709 = vmatpush1.bf16.msra.mxu0 %v7826_v3  ;;  %v7839_v15 = vld [vmem:[#allocation5 + $0xf4] ss:$20 sps:$4 sm:$0xff]   ;;  %v7842_v17 = vld [vmem:[#allocation5 + $0x11c] ss:$20 sps:$4 sm:$0xff]   ;;  %v7845_v19 = vld [vmem:[#allocation5 + $0x144] ss:$20 sps:$4 sm:$0xff]  }
  0x75   : > { %710 = vmatprep.subr.bf16.mxu0 %v7827_v4  ;;  %6752 = vmatprep.mubr.msk.bf16.mxu0 %vm681_vm0, %v8718_v13  ;;  %v7857_v20 = vld [vmem:[#allocation5 + $0xc] ss:$20 sps:$4 sm:$0xff]   ;;  %v7859_v21 = vld [vmem:[#allocation5 + $0x8] ss:$20 sps:$4 sm:$0xff]   ;;  %v7866_v29 = vld [vmem:[#allocation5 + $0x84] ss:$20 sps:$4 sm:$0xff]  }
  0x76   : > { %6760 = vmatprep.mubr.msk.bf16.mxu1 %vm681_vm0, %v8718_v13  ;;  %v7860_v22 = vld [vmem:[#allocation5 + $0x34] ss:$20 sps:$4 sm:$0xff]   ;;  %819 = vmatprep.subr.bf16.mxu1 %v7857_v20  ;;  %v7863_v25 = vld [vmem:[#allocation5 + $0x5c] ss:$20 sps:$4 sm:$0xff]   ;;  %v7848_v26 = vld [vmem:[#allocation5 + $0x16c] ss:$20 sps:$4 sm:$0xff]  }
  0x77   : > { %820 = vmatpush1.bf16.msra.mxu1 %v7859_v21  ;;  %v7847_v24 = vld [vmem:[#allocation5 + $0x140] ss:$20 sps:$4 sm:$0xff]   ;;  %v7865_v27 = vld [vmem:[#allocation5 + $0x58] ss:$20 sps:$4 sm:$0xff]   ;;  %v7850_v28 = vld [vmem:[#allocation5 + $0x168] ss:$20 sps:$4 sm:$0xff]  }
  0x78   : > { %711 = vmatpush1.bf16.msra.mxu0 %v7829_v5  ;;  %821 = vmatprep.subr.bf16.mxu1 %v7860_v22  ;;  %v7851_v30 = vld [vmem:[#allocation5 + $0x194] ss:$20 sps:$4 sm:$0xff]   ;;  %v7853_v32 = vld [vmem:[#allocation5 + $0x190] ss:$20 sps:$4 sm:$0xff]   ;;  %v7869_v33 = vld [vmem:[#allocation5 + $0xac] ss:$20 sps:$4 sm:$0xff]  }
  0x79   : > { %712 = vmatprep.subr.bf16.mxu0 %v7830_v6  ;;  %v7868_v31 = vld [vmem:[#allocation5 + $0x80] ss:$20 sps:$4 sm:$0xff]   ;;  %v7854_v34 = vld [vmem:[#allocation5 + $0x1bc] ss:$20 sps:$4 sm:$0xff]   ;;  %v7856_v35 = vld [vmem:[#allocation5 + $0x1b8] ss:$20 sps:$4 sm:$0xff]  }
  0x7a   : > { %v249_v36 = vld [vmem:[%s8706_s13] sm:$0xff]  ;;  %v251_v37 = vld [vmem:[%s8706_s13 + $0x10] sm:$0xff]  ;;  %v254_v38 = vld [vmem:[%s8706_s13 + $0x28] sm:$0xff]  ;;  %s8496_s21 = smov 64   ;;  %s8498_s23 = smov 32  }
  0x7b   : > { %822 = vmatpush1.bf16.msra.mxu1 %v7862_v23  ;;  %v256_v39 = vld [vmem:[%s8706_s13 + $0x38] sm:$0xff]  ;;  %v7872_v41 = vld [vmem:[#allocation5 + $0xd4] ss:$20 sps:$4 sm:$0xff]   ;;  %v7874_v42 = vld [vmem:[#allocation5 + $0xd0] ss:$20 sps:$4 sm:$0xff]   ;;  %v8728_v44 = vpack.c.bf16 %v251_v37, %v249_v36  ;;  %s8499_s30 = smov 96  }
  0x7c   : > { %713 = vmatpush1.bf16.msra.mxu0 %v7832_v7  ;;  %823 = vmatprep.subr.bf16.mxu1 %v7863_v25  ;;  %v7871_v40 = vld [vmem:[#allocation5 + $0xa8] ss:$20 sps:$4 sm:$0xff]   ;;  %v8730_v45 = vpack.c.bf16 %v256_v39, %v254_v38  ;;  %v7877_v46 = vld [vmem:[#allocation5 + $0xf8] ss:$20 sps:$4 sm:$0xff]   ;;  %v253_v47 = vld [vmem:[%s8706_s13 + $0x20] sm:$0xff]  ;;  %s11045_s7 = scalar_lea.vmem [#allocation8], %s6688_s10 }
  0x7d   : > { %714 = vmatprep.subr.bf16.mxu0 %v7833_v8  ;;  %v7875_v43 = vld [vmem:[#allocation5 + $0xfc] ss:$20 sps:$4 sm:$0xff]   ;;  %v7878_v49 = vld [vmem:[#allocation5 + $0x124] ss:$20 sps:$4 sm:$0xff]   ;;  %v258_v50 = vld [vmem:[%s8706_s13 + $0x48] sm:$0xff]  ;;  %s6953_s24 = sshll.u32 %s8549_s19, 12 }
  0x7e   : > { %v255_v48 = vld [vmem:[%s8706_s13 + $0x30] sm:$0xff]  ;;  %v260_v51 = vld [vmem:[%s8706_s13 + $0x58] sm:$0xff]  ;;  %v7881_v53 = vld [vmem:[#allocation5 + $0x14c] ss:$20 sps:$4 sm:$0xff]   ;;  %s6586_s26 = sshll.u32 %s11045_s7, 4  ;;  %s11136_s29 = scalar_lea.hbm %s11192_s4, %s6953_s24  ;;  %s11138_s26 = int_to_ptr.vmem [resolvable:$true] %s6586_s26 }
  0x7f   : > { %824 = vmatpush1.bf16.msra.mxu1 %v7865_v27  ;;  %v7880_v52 = vld [vmem:[#allocation5 + $0x120] ss:$20 sps:$4 sm:$0xff]   ;;  %v8739_v54 = vpack.c.bf16 %v255_v48, %v253_v47  ;;  %v8741_v55 = vpack.c.bf16 %v260_v51, %v258_v50  ;;  %v7883_v56 = vld [vmem:[#allocation5 + $0x148] ss:$20 sps:$4 sm:$0xff]   ;;  %v7886_v63 = vld [vmem:[#allocation5 + $0x170] ss:$20 sps:$4 sm:$0xff]  }
  0x80   : > { %715 = vmatpush1.bf16.msra.mxu0 %v7835_v9  ;;  %825 = vmatprep.subr.bf16.mxu1 %v7866_v29  ;;  %v257_v57 = vld [vmem:[%s8706_s13 + $0x40] sm:$0xff]  ;;  %v259_v58 = vld [vmem:[%s8706_s13 + $0x50] sm:$0xff]  ;;  %v262_v60 = vld [vmem:[%s8706_s13 + $0x68] sm:$0xff]  ;;  %s6572_s19 = scalar_lea.sflag [#allocation4], %s8700_s9  ;;  %s8415_s5 = scalar_lea.vmem %s11138_s26, 4096 }
  0x81   : > { %716 = vmatprep.subr.bf16.mxu0 %v7836_v10  ;;  %v7884_v59 = vld [vmem:[#allocation5 + $0x174] ss:$20 sps:$4 sm:$0xff]   ;;  %v264_v61 = vld [vmem:[%s8706_s13 + $0x78] sm:$0xff]  ;;  %v8750_v62 = vpack.c.bf16 %v259_v58, %v257_v57  ;;  %v261_v3 = vld [vmem:[%s8706_s13 + $0x60] sm:$0xff]  ;;  %p8416_p11 = scmp.ne.s32.totalorder %s11138_s26, %s8415_s5  ;;  %p11445_p0 = scmp.ne.s32.totalorder %s11266_s20, 0 }
  0x82   : > { %v8752_v0 = vpack.c.bf16 %v264_v61, %v262_v60  ;;  %v7887_v1 = vld [vmem:[#allocation5 + $0x19c] ss:$20 sps:$4 sm:$0xff]   ;;  %v7889_v2 = vld [vmem:[#allocation5 + $0x198] ss:$20 sps:$4 sm:$0xff]   ;;  %v7892_v9 = vld [vmem:[#allocation5 + $0x1c0] ss:$20 sps:$4 sm:$0xff]  }
  0x83   : > { %826 = vmatpush1.bf16.msra.mxu1 %v7868_v31  ;;  %v263_v4 = vld [vmem:[%s8706_s13 + $0x70] sm:$0xff]  ;;  %v7890_v5 = vld [vmem:[#allocation5 + $0x1c4] ss:$20 sps:$4 sm:$0xff]   ;;  %v266_v6 = vld [vmem:[%s8706_s13 + $0x88] sm:$0xff]  ;;  %p8417_p1 = pnand %p8416_p11, %p11445_p0  ;;  %s8500_s8 = smov [#allocation8]  }
  0x84   : > { %717 = vmatpush1.bf16.msra.mxu0 %v7838_v14  ;;  %827 = vmatprep.subr.bf16.mxu1 %v7869_v33  ;;  %v268_v7 = vld [vmem:[%s8706_s13 + $0x98] sm:$0xff]  ;;  %v8761_v8 = vpack.c.bf16 %v263_v4, %v261_v3  ;;  %v265_v11 = vld [vmem:[%s8706_s13 + $0x80] sm:$0xff]  ;;  %v267_v12 = vld [vmem:[%s8706_s13 + $0x90] sm:$0xff]  ;;  %s8419_s10 = sshll.u32 %s8500_s8, 4  ;;  %s8420_s10 = int_to_ptr.vmem [resolvable:$false] %s8419_s10 }
  0x85   : > { %718 = vmatprep.subr.bf16.mxu0 %v7839_v15  ;;  %v8763_v10 = vpack.c.bf16 %v268_v7, %v266_v6  ;;  %v270_v14 = vld [vmem:[%s8706_s13 + $0xa8] sm:$0xff]  ;;  %v272_v15 = vld [vmem:[%s8706_s13 + $0xb8] sm:$0xff]  ;;  %v275_v25 = vld [vmem:[%s8706_s13 + $0xd0] sm:$0xff]  ;;  %p8418_p3 = pneg %p8417_p1  ;;  %s8421_s12 = scalar_lea.vmem %s8420_s10, 8192 }
  0x86   : > { %v274_v20 = vld [vmem:[%s8706_s13 + $0xc8] sm:$0xff]  ;;  %v276_v21 = vld [vmem:[%s8706_s13 + $0xd8] sm:$0xff]  ;;  %v279_v31 = vld [vmem:[%s8706_s13 + $0xf0] sm:$0xff]  ;;  %p8422_p5 = scmp.lt.s32.totalorder %s11138_s26, %s8420_s10  ;;  %p8423_p9 = scmp.lt.s32.totalorder %s8421_s12, %s8415_s5 }
  0x87   : > { %828 = vmatpush1.bf16.msra.mxu1 %v7871_v40  ;;  %v8791_v23 = vpack.c.bf16 %v276_v21, %v274_v20  ;;  %v280_v27 = vld [vmem:[%s8706_s13 + $0xf8] sm:$0xff] }
  0x88   : > { %719 = vmatpush1.bf16.msra.mxu0 %v7841_v16  ;;  %829 = vmatprep.subr.bf16.mxu1 %v7872_v41  ;;  %v8773_v16 = vpack.c.bf16 %v267_v12, %v265_v11  ;;  %p8424_p12 = por %p8423_p9, %p8422_p5 }
  0x89   : > { %720 = vmatprep.subr.bf16.mxu0 %v7842_v17  ;;  %v8777_v17 = vpack.c.bf16 %v272_v15, %v270_v14 }
  0x8a   : > { %p8425_p2 = pnand %p8424_p12, %p8418_p3 }
  0x8b   : > { %830 = vmatpush1.bf16.msra.mxu1 %v7874_v42 }
  0x8c   : > { %721 = vmatpush1.bf16.msra.mxu0 %v7844_v18  ;;  %831 = vmatprep.subr.bf16.mxu1 %v7875_v43  ;;  %v269_v18 = vld [vmem:[%s8706_s13 + $0xa0] sm:$0xff] }
  0x8d   : > { %722 = vmatprep.subr.bf16.mxu0 %v7845_v19  ;;  %v271_v19 = vld [vmem:[%s8706_s13 + $0xb0] sm:$0xff] }
  0x8e   : > { %v8787_v22 = vpack.c.bf16 %v271_v19, %v269_v18 }
  0x8f   : > { %832 = vmatpush1.bf16.msra.mxu1 %v7877_v46 }
  0x90   : > { %723 = vmatpush1.bf16.msra.mxu0 %v7847_v24  ;;  %833 = vmatprep.subr.bf16.mxu1 %v7878_v49  ;;  %v273_v24 = vld [vmem:[%s8706_s13 + $0xc0] sm:$0xff] }
  0x91   : > { %724 = vmatprep.subr.bf16.mxu0 %v7848_v26  ;;  %v278_v26 = vld [vmem:[%s8706_s13 + $0xe8] sm:$0xff] }
  0x92   : > { %v8805_v29 = vpack.c.bf16 %v280_v27, %v278_v26  ;;  %v11196_v27 = vmov 0  }
  0x93   : > { %834 = vmatpush1.bf16.msra.mxu1 %v7880_v52 }
  0x94   : > { %725 = vmatpush1.bf16.msra.mxu0 %v7850_v28  ;;  %835 = vmatprep.subr.bf16.mxu1 %v7881_v53  ;;  %v8801_v28 = vpack.c.bf16 %v275_v25, %v273_v24  ;;  %v7893_v25 = vld [vmem:[#allocation5 + $0x10] ss:$20 sps:$4 sm:$0xff]  }
  0x95   : > { %726 = vmatprep.subr.bf16.mxu0 %v7851_v30  ;;  %v277_v30 = vld [vmem:[%s8706_s13 + $0xe0] sm:$0xff] }
  0x97   : > { %836 = vmatpush1.bf16.msra.mxu1 %v7883_v56 }
  0x98   : > { %727 = vmatpush1.bf16.msra.mxu0 %v7853_v32  ;;  %837 = vmatprep.subr.bf16.mxu1 %v7884_v59  ;;  %v8813_v32 = vpack.c.bf16 %v279_v31, %v277_v30 }
  0x99   : > { %728 = vmatprep.subr.bf16.mxu0 %v7854_v34 }
  0x9b   : > { %838 = vmatpush1.bf16.msra.mxu1 %v7886_v63 }
  0x9c   : > { %729 = vmatpush1.bf16.msra.mxu0 %v7856_v35  ;;  %839 = vmatprep.subr.bf16.mxu1 %v7887_v1 }
  0x9d   : > { %932 = vmatprep.subr.bf16.mxu0 %v11196_v27 }
  0x9f   : > { %739 = vmatmul.mubr.bf16.vlgmr.msra.gmra.mrb[0].mxu0 %v8728_v44  ;;  %840 = vmatpush1.bf16.msra.mxu1 %v7889_v2 }
  0xa0   : > { %6753 = vmatprep.mubr.msk.bf16.mxu0 %vm681_vm0, %v8730_v45  ;;  %841 = vmatprep.subr.bf16.mxu1 %v7890_v5 }
  0xa1   : > { %933 = vmatpush1.bf16.msra.mxu0 %v7893_v25  ;;  %v7898_v25 = vld [vmem:[#allocation5 + $0xd8] ss:$20 sps:$4 sm:$0xff]  }
  0xa2   : > { %934 = vmatprep.subr.bf16.mxu0 %v11196_v27 }
  0xa3   : > { %842 = vmatpush1.bf16.msra.mxu1 %v7892_v9 }
  0xa6   : > { %852 = vmatmul.mubr.bf16.vlgmr.msra.gmra.mrb[0].mxu1 %v8728_v44 }
  0xa7   : > { %749 = vmatmul.mubr.bf16.gmra.mrb[4].mxu0 %v8739_v54  ;;  %6761 = vmatprep.mubr.msk.bf16.mxu1 %vm681_vm0, %v8730_v45 }
  0xa8   : > { %6754 = vmatprep.mubr.msk.bf16.mxu0 %vm681_vm0, %v8741_v55 }
  0xae   : > { %862 = vmatmul.mubr.bf16.gmra.mrb[4].mxu1 %v8739_v54 }
  0xaf   : > { %759 = vmatmul.mubr.bf16.gmra.mrb[8].mxu0 %v8750_v62  ;;  %6762 = vmatprep.mubr.msk.bf16.mxu1 %vm681_vm0, %v8741_v55 }
  0xb0   : > { %6755 = vmatprep.mubr.msk.bf16.mxu0 %vm681_vm0, %v8752_v0 }
  0xb6   : > { %872 = vmatmul.mubr.bf16.gmra.mrb[8].mxu1 %v8750_v62 }
  0xb7   : > { %769 = vmatmul.mubr.bf16.gmra.mrb[12].mxu0 %v8761_v8  ;;  %6763 = vmatprep.mubr.msk.bf16.mxu1 %vm681_vm0, %v8752_v0 }
  0xb8   : > { %6756 = vmatprep.mubr.msk.bf16.mxu0 %vm681_vm0, %v8763_v10 }
  0xbe   : > { %882 = vmatmul.mubr.bf16.gmra.mrb[12].mxu1 %v8761_v8 }
  0xbf   : > { %779 = vmatmul.mubr.bf16.gmra.mrb[16].mxu0 %v8773_v16  ;;  %6764 = vmatprep.mubr.msk.bf16.mxu1 %vm681_vm0, %v8763_v10 }
  0xc0   : > { %6757 = vmatprep.mubr.msk.bf16.mxu0 %vm681_vm0, %v8777_v17 }
  0xc6   : > { %892 = vmatmul.mubr.bf16.gmra.mrb[16].mxu1 %v8773_v16 }
  0xc7   : > { %789 = vmatmul.mubr.bf16.gmra.mrb[20].mxu0 %v8787_v22  ;;  %6765 = vmatprep.mubr.msk.bf16.mxu1 %vm681_vm0, %v8777_v17 }
  0xc8   : > { %6758 = vmatprep.mubr.msk.bf16.mxu0 %vm681_vm0, %v8791_v23 }
  0xce   : > { %902 = vmatmul.mubr.bf16.gmra.mrb[20].mxu1 %v8787_v22 }
  0xcf   : > { %799 = vmatmul.mubr.bf16.gmra.mrb[24].mxu0 %v8801_v28  ;;  %6766 = vmatprep.mubr.msk.bf16.mxu1 %vm681_vm0, %v8791_v23 }
  0xd0   : > { %6759 = vmatprep.mubr.msk.bf16.mxu0 %vm681_vm0, %v8805_v29 }
  0xd6   : > { %912 = vmatmul.mubr.bf16.gmra.mrb[24].mxu1 %v8801_v28 }
  0xd7   : > { %809 = vmatmul.mubr.bf16.gmra.mrb[28].mxu0 %v8813_v32  ;;  %6767 = vmatprep.mubr.msk.bf16.mxu1 %vm681_vm0, %v8805_v29 }
  0xd8   : > { %6768 = vmatprep.mubr.msk.bf16.mxu0 %vm681_vm0, %v8718_v13 }
  0xde   : > { %922 = vmatmul.mubr.bf16.gmra.mrb[28].mxu1 %v8813_v32 }
 0x172   : > { %v740_v33 = vpop.f32.mrb[0].mxu0 }
 0x173   : > { %v742_v34 = vpop.f32.mrb[1].mxu0 }
 0x174   : > { %v744_v13 = vpop.f32.mrb[2].mxu0 }
 0x175   : > { %v8830_v35 = vpack.c.bf16 %v744_v13, %v740_v33  ;;  %v746_v36 = vpop.f32.mrb[3].mxu0 }
 0x176   : > { %v8832_v37 = vpack.c.bf16 %v746_v36, %v742_v34  ;;  %v7894_v34 = vld [vmem:[#allocation5 + $0x38] ss:$20 sps:$4 sm:$0xff]  }
 0x177   : > { %7150 = vmatprep.mubr.msk.bf16.mxu1 %vm1070_vm1, %v8830_v35  ;;  %935 = vmatpush1.bf16.msra.mxu0 %v7894_v34 }
 0x178   : > { %11271 = vst [vmem:[#allocation12_spill] sm:$0xff] %v8832_v37  ;;  %1066 = vrot.lane.b32.xlu0 %v8832_v37, %s8496_s21  ;;  %936 = vmatprep.subr.bf16.mxu0 %v11196_v27 }
 0x179   : > { %v853_v30 = vpop.f32.mrb[0].mxu1 }
 0x17a   : > { %v750_v38 = vpop.f32.mrb[4].mxu0  ;;  %v855_v13 = vpop.f32.mrb[1].mxu1 }
 0x17b   : > { %v752_v39 = vpop.f32.mrb[5].mxu0 }
 0x17c   : > { %v754_v40 = vpop.f32.mrb[6].mxu0 }
 0x17d   : > { %v8838_v41 = vpack.c.bf16 %v754_v40, %v750_v38  ;;  %v756_v42 = vpop.f32.mrb[7].mxu0  ;;  %v857_v38 = vpop.f32.mrb[2].mxu1 }
 0x17e   : > { %v8840_v43 = vpack.c.bf16 %v756_v42, %v752_v39  ;;  %v8880_v39 = vpack.c.bf16 %v857_v38, %v853_v30  ;;  %v859_v40 = vpop.f32.mrb[3].mxu1 }
 0x17f   : > { %v8884_v42 = vpack.c.bf16 %v859_v40, %v855_v13  ;;  %v7899_v40 = vld [vmem:[#allocation5 + $0x100] ss:$20 sps:$4 sm:$0xff]  }
 0x180   : > { %1068 = vrot.lane.b32.xlu0 %v8840_v43, %s8496_s21 }
 0x182   : > { %v760_v46 = vpop.f32.mrb[8].mxu0 }
 0x183   : > { %v762_v47 = vpop.f32.mrb[9].mxu0 }
 0x184   : > { %v764_v48 = vpop.f32.mrb[10].mxu0 }
 0x185   : > { %v8844_v49 = vpack.c.bf16 %v764_v48, %v760_v46  ;;  %v766_v50 = vpop.f32.mrb[11].mxu0  ;;  %v863_v46 = vpop.f32.mrb[4].mxu1 }
 0x186   : > { %v8846_v51 = vpack.c.bf16 %v766_v50, %v762_v47  ;;  %v7895_v47 = vld [vmem:[#allocation5 + $0x60] ss:$20 sps:$4 sm:$0xff]   ;;  %v865_v48 = vpop.f32.mrb[5].mxu1 }
 0x187   : > { %v867_v50 = vpop.f32.mrb[6].mxu1  ;;  %937 = vmatpush1.bf16.msra.mxu0 %v7895_v47 }
 0x188   : > { %11272 = vst [vmem:[#allocation13_spill] sm:$0xff] %v8846_v51  ;;  %1134 = vrot.lane.b32.xlu1 %v8846_v51, %s8496_s21  ;;  %938 = vmatprep.subr.bf16.mxu0 %v11196_v27 }
 0x18a   : > { %v770_v52 = vpop.f32.mrb[12].mxu0 }
 0x18b   : > { %v772_v53 = vpop.f32.mrb[13].mxu0 }
 0x18c   : > { %v774_v56 = vpop.f32.mrb[14].mxu0 }
 0x18d   : > { %v8850_v57 = vpack.c.bf16 %v774_v56, %v770_v52  ;;  %v776_v58 = vpop.f32.mrb[15].mxu0  ;;  %v8887_v52 = vpack.c.bf16 %v867_v50, %v863_v46 }
 0x18e   : > { %v8852_v59 = vpack.c.bf16 %v776_v58, %v772_v53  ;;  %v869_v53 = vpop.f32.mrb[7].mxu1 }
 0x18f   : > { %v8889_v56 = vpack.c.bf16 %v869_v53, %v865_v48  ;;  %v873_v58 = vpop.f32.mrb[8].mxu1 }
 0x190   : > { %11273 = vst [vmem:[#allocation14_spill] sm:$0xff] %v8852_v59  ;;  %1136 = vrot.lane.b32.xlu1 %v8852_v59, %s8496_s21 }
 0x192   : > { %v780_v60 = vpop.f32.mrb[16].mxu0 }
 0x193   : > { %v782_v61 = vpop.f32.mrb[17].mxu0 }
 0x194   : > { %v784_v63 = vpop.f32.mrb[18].mxu0 }
 0x195   : > { %v8856_v1 = vpack.c.bf16 %v784_v63, %v780_v60  ;;  %v786_v2 = vpop.f32.mrb[19].mxu0  ;;  %v7896_v60 = vld [vmem:[#allocation5 + $0x88] ss:$20 sps:$4 sm:$0xff]  }
 0x196   : > { %v8858_v3 = vpack.c.bf16 %v786_v2, %v782_v61  ;;  %v875_v61 = vpop.f32.mrb[9].mxu1  ;;  %939 = vmatpush1.bf16.msra.mxu0 %v7896_v60  ;;  %v7900_v60 = vld [vmem:[#allocation5 + $0x128] ss:$20 sps:$4 sm:$0xff]  }
 0x197   : > { %v877_v63 = vpop.f32.mrb[10].mxu1  ;;  %940 = vmatprep.subr.bf16.mxu0 %v11196_v27 }
 0x198   : > { %11274 = vst [vmem:[#allocation15_spill] sm:$0xff] %v8858_v3  ;;  %1201 = vrot.lane.b32.xlu0 %v8858_v3, %s8496_s21  ;;  %v8892_v2 = vpack.c.bf16 %v877_v63, %v873_v58 }
 0x19a   : > { %v790_v4 = vpop.f32.mrb[20].mxu0 }
 0x19b   : > { %v792_v5 = vpop.f32.mrb[21].mxu0 }
 0x19c   : > { %v794_v6 = vpop.f32.mrb[22].mxu0 }
 0x19d   : > { %v8862_v7 = vpack.c.bf16 %v794_v6, %v790_v4  ;;  %v796_v9 = vpop.f32.mrb[23].mxu0  ;;  %v879_v4 = vpop.f32.mrb[11].mxu1 }
 0x19e   : > { %v8864_v11 = vpack.c.bf16 %v796_v9, %v792_v5  ;;  %v8894_v5 = vpack.c.bf16 %v879_v4, %v875_v61  ;;  %v883_v6 = vpop.f32.mrb[12].mxu1  ;;  %v7897_v9 = vld [vmem:[#allocation5 + $0xb0] ss:$20 sps:$4 sm:$0xff]  }
 0x19f   : > { %941 = vmatpush1.bf16.msra.mxu0 %v7897_v9 }
 0x1a0   : > { %11275 = vst [vmem:[#allocation16_spill] sm:$0xff] %v8864_v11  ;;  %1203 = vrot.lane.b32.xlu1 %v8864_v11, %s8496_s21  ;;  %942 = vmatprep.subr.bf16.mxu0 %v11196_v27 }
 0x1a2   : > { %v800_v12 = vpop.f32.mrb[24].mxu0 }
 0x1a3   : > { %v802_v14 = vpop.f32.mrb[25].mxu0  ;;  %943 = vmatpush1.bf16.msra.mxu0 %v7898_v25 }
 0x1a4   : > { %v804_v15 = vpop.f32.mrb[26].mxu0  ;;  %944 = vmatprep.subr.bf16.mxu0 %v11196_v27 }
 0x1a5   : > { %v8868_v18 = vpack.c.bf16 %v804_v15, %v800_v12  ;;  %v806_v19 = vpop.f32.mrb[27].mxu0  ;;  %v885_v12 = vpop.f32.mrb[13].mxu1 }
 0x1a6   : > { %v8870_v20 = vpack.c.bf16 %v806_v19, %v802_v14  ;;  %v887_v14 = vpop.f32.mrb[14].mxu1 }
 0x1a7   : > { %v8897_v15 = vpack.c.bf16 %v887_v14, %v883_v6  ;;  %v889_v19 = vpop.f32.mrb[15].mxu1  ;;  %945 = vmatpush1.bf16.msra.mxu0 %v7899_v40  ;;  %v7901_v14 = vld [vmem:[#allocation5 + $0x150] ss:$20 sps:$4 sm:$0xff]   ;;  %v7904_v40 = vld [vmem:[#allocation5 + $0x1c8] ss:$20 sps:$4 sm:$0xff]  }
 0x1a8   : > { %11276 = vst [vmem:[#allocation17_spill] sm:$0xff] %v8870_v20  ;;  %1268 = vrot.lane.b32.xlu0 %v8870_v20, %s8496_s21  ;;  %946 = vmatprep.subr.bf16.mxu0 %v11196_v27 }
 0x1aa   : > { %v810_v21 = vpop.f32.mrb[28].mxu0 }
 0x1ab   : > { %v812_v24 = vpop.f32.mrb[29].mxu0  ;;  %947 = vmatpush1.bf16.msra.mxu0 %v7900_v60 }
 0x1ac   : > { %v814_v26 = vpop.f32.mrb[30].mxu0  ;;  %948 = vmatprep.subr.bf16.mxu0 %v11196_v27 }
 0x1ad   : > { %v8875_v31 = vpack.c.bf16 %v814_v26, %v810_v21  ;;  %v816_v33 = vpop.f32.mrb[31].mxu0  ;;  %v8899_v21 = vpack.c.bf16 %v889_v19, %v885_v12 }
 0x1ae   : > { %v8877_v36 = vpack.c.bf16 %v816_v33, %v812_v24  ;;  %v893_v24 = vpop.f32.mrb[16].mxu1 }
 0x1af   : > { %v895_v26 = vpop.f32.mrb[17].mxu1  ;;  %949 = vmatpush1.bf16.msra.mxu0 %v7901_v14 }
 0x1b0   : > { %11277 = vst [vmem:[#allocation18_spill] sm:$0xff] %v8877_v36  ;;  %1270 = vrot.lane.b32.xlu1 %v8877_v36, %s8496_s21  ;;  %v897_v30 = vpop.f32.mrb[18].mxu1  ;;  %950 = vmatprep.subr.bf16.mxu0 %v11196_v27 }
 0x1b1   : > { %v8902_v33 = vpack.c.bf16 %v897_v30, %v893_v24  ;;  %v899_v34 = vpop.f32.mrb[19].mxu1 }
 0x1b2   : > { %v8904_v13 = vpack.c.bf16 %v899_v34, %v895_v26  ;;  %v903_v38 = vpop.f32.mrb[20].mxu1  ;;  %v7902_v34 = vld [vmem:[#allocation5 + $0x178] ss:$20 sps:$4 sm:$0xff]  }
 0x1b3   : > { %v905_v46 = vpop.f32.mrb[21].mxu1  ;;  %951 = vmatpush1.bf16.msra.mxu0 %v7902_v34 }
 0x1b4   : > { %v907_v47 = vpop.f32.mrb[22].mxu1  ;;  %952 = vmatprep.subr.bf16.mxu0 %v11196_v27 }
 0x1b5   : > { %v8907_v48 = vpack.c.bf16 %v907_v47, %v903_v38  ;;  %v909_v50 = vpop.f32.mrb[23].mxu1  ;;  %v7903_v38 = vld [vmem:[#allocation5 + $0x1a0] ss:$20 sps:$4 sm:$0xff]  }
 0x1b6   : > { %v8909_v53 = vpack.c.bf16 %v909_v50, %v905_v46  ;;  %v913_v58 = vpop.f32.mrb[24].mxu1 }
 0x1b7   : > { %v915_v61 = vpop.f32.mrb[25].mxu1  ;;  %953 = vmatpush1.bf16.msra.mxu0 %v7903_v38 }
 0x1b8   : > { %v917_v63 = vpop.f32.mrb[26].mxu1  ;;  %954 = vmatprep.subr.bf16.mxu0 %v11196_v27 }
 0x1b9   : > { %v8912_v4 = vpack.c.bf16 %v917_v63, %v913_v58  ;;  %v919_v6 = vpop.f32.mrb[27].mxu1 }
 0x1ba   : > { %v8914_v9 = vpack.c.bf16 %v919_v6, %v915_v61  ;;  %v923_v12 = vpop.f32.mrb[28].mxu1 }
 0x1bb   : > { %v925_v19 = vpop.f32.mrb[29].mxu1  ;;  %955 = vmatpush1.bf16.msra.mxu0 %v7904_v40 }
 0x1bc   : > { %v927_v24 = vpop.f32.mrb[30].mxu1  ;;  %7186 = vmatprep.subr.bf16.mxu0 %v8894_v5 }
 0x1bd   : > { %v8917_v25 = vpack.c.bf16 %v927_v24, %v923_v12  ;;  %v929_v26 = vpop.f32.mrb[31].mxu1 }
 0x1be   : > { %v8919_v30 = vpack.c.bf16 %v929_v26, %v925_v19  ;;  %965 = vmatmul.mubr.bf16.vlgmr.msra.gmra.mrb[32].mxu0 %v8728_v44 }
 0x1bf   : > { %11278 = vst [vmem:[#allocation19_spill] sm:$0xff] %v8917_v25  ;;  %7187 = vmatpush3.bf16.msra.mxu0 %v8894_v5  ;;  %6769 = vmatprep.mubr.msk.bf16.mxu0 %vm681_vm0, %v8730_v45 }
 0x1c0   : > { %7188 = vmatprep.subr.bf16.mxu0 %v8899_v21 }
 0x1c3   : > { %7189 = vmatpush3.bf16.msra.mxu0 %v8899_v21 }
 0x1c4   : > { %7202 = vmatprep.subr.bf16.mxu0 %v8914_v9 }
 0x1c6   : > { %973 = vmatmul.mubr.bf16.gmra.mrb[36].mxu0 %v8739_v54 }
 0x1c7   : > { %6770 = vmatprep.mubr.msk.bf16.mxu0 %vm681_vm0, %v8741_v55 }
 0x1ce   : > { %981 = vmatmul.mubr.bf16.gmra.mrb[40].mxu0 %v8750_v62 }
 0x1cf   : > { %6771 = vmatprep.mubr.msk.bf16.mxu0 %vm681_vm0, %v8752_v0 }
 0x1d6   : > { %989 = vmatmul.mubr.bf16.gmra.mrb[44].mxu0 %v8761_v8 }
 0x1d7   : > { %6772 = vmatprep.mubr.msk.bf16.mxu0 %vm681_vm0, %v8763_v10 }
 0x1de   : > { %997 = vmatmul.mubr.bf16.gmra.mrb[48].mxu0 %v8773_v16 }
 0x1df   : > { %6773 = vmatprep.mubr.msk.bf16.mxu0 %vm681_vm0, %v8777_v17 }
 0x1e6   : > { %1005 = vmatmul.mubr.bf16.gmra.mrb[52].mxu0 %v8787_v22 }
 0x1e7   : > { %6774 = vmatprep.mubr.msk.bf16.mxu0 %vm681_vm0, %v8791_v23 }
 0x1ea   : > { %v1067_v46 = vpop.permute.xlu0 %1066 }
 0x1eb   : > { %7694 = vmatprep.subr.msk.bf16.mxu1 %vm1070_vm1, %v1067_v46  ;;  %v1078_v44 = vsel %vm1070_vm1, %v1067_v46, 0 }
 0x1ec   : > { %7147 = vmatpush3.bf16.xpose.msra.mxu1 %v1078_v44 }
 0x1ee   : > { %1013 = vmatmul.mubr.bf16.gmra.mrb[56].mxu0 %v8801_v28 }
 0x1ef   : > { %6775 = vmatprep.mubr.msk.bf16.mxu0 %vm681_vm0, %v8805_v29 }
 0x1f2   : > { %v1069_v45 = vpop.permute.xlu0 %1068 }
 0x1f3   : > { %7695 = vmatprep.subr.msk.bf16.mxu1 %vm1070_vm1, %v1069_v45  ;;  %v1081_v47 = vsel %vm1070_vm1, %v1069_v45, 0 }
 0x1f4   : > { %7149 = vmatpush3.bf16.xpose.msra.mxu1 %v1081_v47 }
 0x1f6   : > { %1021 = vmatmul.mubr.bf16.gmra.mrb[60].mxu0 %v8813_v32  ;;  %v1029_v32 = vlaneseq }
 0x1f8   : > { %v8986_v50 = vshrl.u32 %v1029_v32, 7  ;;  %v1035_v60 = vand.u32 127, %v1029_v32 }
 0x1fa   : > { %v1135_v54 = vpop.permute.xlu1 %1134  ;;  %11279 = vst [vmem:[#allocation20_spill] sm:$0xff] %v8986_v50  ;;  %v1032_v58 = vadd.s32 16, %v8986_v50  ;;  %v1031_v61 = vadd.s32 8, %v8986_v50  ;;  %vm8995_vm3 = vcmp.le.s32.totalorder %v1035_v60, %v8986_v50  ;;  %v1033_v14 = vadd.s32 24, %v8986_v50 }
 0x1fb   : > { %7151 = vmatmul.mubr.msk.bf16.vlgmr.msra.gmra.mrb[32].mxu1 %vm1070_vm1, %v8838_v41  ;;  %7696 = vmatprep.subr.msk.bf16.mxu1 %vm1070_vm1, %v1135_v54  ;;  %v1145_v55 = vsel %vm1070_vm1, %v1135_v54, 0 }
 0x1fc   : > { %7155 = vmatpush3.bf16.xpose.msra.mxu1 %v1145_v55  ;;  %7158 = vmatprep.mubr.msk.bf16.mxu1 %vm1070_vm1, %v8844_v49  ;;  %vm8990_vm2 = vcmp.le.s32.totalorder %v1035_v60, %v1032_v58  ;;  %vm9004_vm4 = vcmp.le.s32.totalorder %v1035_v60, %v1031_v61  ;;  %vm9014_vm5 = vcmp.le.s32.totalorder %v1035_v60, %v1033_v14 }
 0x202   : > { %v1137_v62 = vpop.permute.xlu1 %1136 }
 0x203   : > { %7697 = vmatprep.subr.msk.bf16.mxu1 %vm1070_vm1, %v1137_v62  ;;  %v1148_v0 = vsel %vm1070_vm1, %v1137_v62, 0 }
 0x204   : > { %7157 = vmatpush3.bf16.xpose.msra.mxu1 %v1148_v0 }
 0x20a   : > { %v1202_v8 = vpop.permute.xlu0 %1201 }
 0x20b   : > { %7159 = vmatmul.mubr.msk.bf16.vlgmr.msra.gmra.mrb[36].mxu1 %vm1070_vm1, %v8850_v57  ;;  %7698 = vmatprep.subr.msk.bf16.mxu1 %vm1070_vm1, %v1202_v8  ;;  %v1212_v10 = vsel %vm1070_vm1, %v1202_v8, 0 }
 0x20c   : > { %7163 = vmatpush3.bf16.xpose.msra.mxu1 %v1212_v10  ;;  %7166 = vmatprep.mubr.msk.bf16.mxu1 %vm1070_vm1, %v8856_v1 }
 0x212   : > { %v1204_v16 = vpop.permute.xlu1 %1203 }
 0x213   : > { %7699 = vmatprep.subr.msk.bf16.mxu1 %vm1070_vm1, %v1204_v16  ;;  %v1215_v17 = vsel %vm1070_vm1, %v1204_v16, 0 }
 0x214   : > { %7165 = vmatpush3.bf16.xpose.msra.mxu1 %v1215_v17 }
 0x21a   : > { %v1269_v22 = vpop.permute.xlu0 %1268 }
 0x21b   : > { %7167 = vmatmul.mubr.msk.bf16.vlgmr.msra.gmra.mrb[40].mxu1 %vm1070_vm1, %v8862_v7  ;;  %7700 = vmatprep.subr.msk.bf16.mxu1 %vm1070_vm1, %v1269_v22  ;;  %v1279_v23 = vsel %vm1070_vm1, %v1269_v22, 0 }
 0x21c   : > { %7171 = vmatpush3.bf16.xpose.msra.mxu1 %v1279_v23  ;;  %7174 = vmatprep.mubr.msk.bf16.mxu1 %vm1070_vm1, %v8868_v18 }
 0x222   : > { %v1271_v28 = vpop.permute.xlu1 %1270 }
 0x223   : > { %7701 = vmatprep.subr.msk.bf16.mxu1 %vm1070_vm1, %v1271_v28  ;;  %v1282_v29 = vsel %vm1070_vm1, %v1271_v28, 0 }
 0x224   : > { %7173 = vmatpush3.bf16.xpose.msra.mxu1 %v1282_v29 }
 0x225   : > { %7178 = vmatprep.subr.bf16.mxu1 %v8884_v42 }
 0x22b   : > { %7175 = vmatmul.mubr.msk.bf16.vlgmr.msra.gmra.mrb[44].mxu1 %vm1070_vm1, %v8875_v31 }
 0x22c   : > { %7179 = vmatpush3.bf16.msra.mxu1 %v8884_v42 }
 0x22d   : > { %7180 = vmatprep.subr.bf16.mxu1 %v8889_v56 }
 0x230   : > { %7181 = vmatpush3.bf16.msra.mxu1 %v8889_v56 }
 0x231   : > { %7194 = vmatprep.subr.bf16.mxu1 %v8904_v13 }
 0x2ce   : > { %v7152_v6 = vpop.f32.mrb[32].mxu1 }
 0x2cf   : > { %v9002_v19 = vsel %vm8990_vm2, %v7152_v6, -1e+30  ;;  %v1117_v24 = vpop.f32.mrb[33].mxu1 }
 0x2d0   : > { %v7153_v34 = vpop.f32.mrb[34].mxu1  ;;  %v1363_v38 = vsel %vm1070_vm1, %v9002_v19, -inf  ;;  %v9012_v40 = vsel %vm8995_vm3, %v1117_v24, -1e+30 }
 0x2d1   : > { %v1120_v46 = vpop.f32.mrb[35].mxu1  ;;  %1364 = vmax.xlane.f32.xlu0 %v1363_v38  ;;  %v1357_v54 = vsel %vm1070_vm1, %v9012_v40, -inf  ;;  %v9028_v55 = vsel %vm9014_vm5, %v7153_v34, -1e+30 }
 0x2d2   : > { %v9020_v45 = vsel %vm9004_vm4, %v1120_v46, -1e+30  ;;  %v1366_v62 = vsel %vm1070_vm1, %v9028_v55, -inf }
 0x2d3   : > { %v1360_v47 = vsel %vm1070_vm1, %v9020_v45, -inf }
 0x2d4   : > { %1361 = vmax.xlane.f32.xlu1 %v1360_v47 }
 0x2d5   : > { %1358 = vmax.xlane.f32.xlu0 %v1357_v54 }
 0x2d9   : > { %1367 = vmax.xlane.f32.xlu0 %v1366_v62 }
 0x2de   : > { %v7160_v0 = vpop.f32.mrb[36].mxu1 }
 0x2df   : > { %v9034_v8 = vsel %vm8990_vm2, %v7160_v0, -1e+30  ;;  %v1184_v10 = vpop.f32.mrb[37].mxu1 }
 0x2e0   : > { %v7161_v16 = vpop.f32.mrb[38].mxu1  ;;  %v1375_v17 = vsel %vm1070_vm1, %v9034_v8, -inf  ;;  %v9040_v22 = vsel %vm8995_vm3, %v1184_v10, -1e+30 }
 0x2e1   : > { %v1187_v23 = vpop.f32.mrb[39].mxu1  ;;  %1376 = vmax.xlane.f32.xlu1 %v1375_v17  ;;  %v1369_v32 = vsel %vm1070_vm1, %v9040_v22, -inf  ;;  %v9076_v0 = vsel %vm9014_vm5, %v7161_v16, -1e+30 }
 0x2e2   : > { %v9044_v28 = vsel %vm9004_vm4, %v1187_v23, -1e+30  ;;  %v1378_v10 = vsel %vm1070_vm1, %v9076_v0, -inf }
 0x2e3   : > { %v1372_v29 = vsel %vm1070_vm1, %v9044_v28, -inf }
 0x2e4   : > { %1373 = vmax.xlane.f32.xlu0 %v1372_v29 }
 0x2e5   : > { %1370 = vmax.xlane.f32.xlu1 %v1369_v32 }
 0x2ee   : > { %v7168_v58 = vpop.f32.mrb[40].mxu1 }
 0x2ef   : > { %v9052_v60 = vsel %vm8990_vm2, %v7168_v58, -1e+30  ;;  %v1251_v61 = vpop.f32.mrb[41].mxu1 }
 0x2f0   : > { %v7169_v6 = vpop.f32.mrb[42].mxu1  ;;  %v1387_v14 = vsel %vm1070_vm1, %v9052_v60, -inf  ;;  %v9058_v24 = vsel %vm8995_vm3, %v1251_v61, -1e+30 }
 0x2f1   : > { %v9062_v34 = vsel %vm9014_vm5, %v7169_v6, -1e+30  ;;  %v1254_v38 = vpop.f32.mrb[43].mxu1  ;;  %1388 = vmax.xlane.f32.xlu1 %v1387_v14  ;;  %v1381_v54 = vsel %vm1070_vm1, %v9058_v24, -inf }
 0x2f2   : > { %v1390_v46 = vsel %vm1070_vm1, %v9062_v34, -inf  ;;  %v9068_v47 = vsel %vm9004_vm4, %v1254_v38, -1e+30 }
 0x2f3   : > { %1391 = vmax.xlane.f32.xlu0 %v1390_v46  ;;  %v1384_v62 = vsel %vm1070_vm1, %v9068_v47, -inf }
 0x2f5   : > { %1382 = vmax.xlane.f32.xlu1 %v1381_v54 }
 0x2f7   : > { %1385 = vmax.xlane.f32.xlu0 %v1384_v62 }
 0x2fb   : > { %1379 = vmax.xlane.f32.xlu0 %v1378_v10 }
 0x2fe   : > { %v7176_v17 = vpop.f32.mrb[44].mxu1 }
 0x2ff   : > { %v9082_v23 = vsel %vm8990_vm2, %v7176_v17, -1e+30  ;;  %v1318_v29 = vpop.f32.mrb[45].mxu1 }
 0x300   : > { %v7177_v32 = vpop.f32.mrb[46].mxu1  ;;  %v1399_v58 = vsel %vm1070_vm1, %v9082_v23, -inf  ;;  %v9088_v61 = vsel %vm8995_vm3, %v1318_v29, -1e+30 }
 0x301   : > { %1400 = vmax.xlane.f32.xlu1 %v1399_v58  ;;  %v1321_v16 = vpop.f32.mrb[47].mxu1  ;;  %v9098_v38 = vsel %vm9014_vm5, %v7177_v32, -1e+30  ;;  %v1393_v46 = vsel %vm1070_vm1, %v9088_v61, -inf }
 0x302   : > { %v9092_v6 = vsel %vm9004_vm4, %v1321_v16, -1e+30  ;;  %v1402_v54 = vsel %vm1070_vm1, %v9098_v38, -inf }
 0x303   : > { %v1396_v14 = vsel %vm1070_vm1, %v9092_v6, -inf }
 0x304   : > { %1397 = vmax.xlane.f32.xlu0 %v1396_v14 }
 0x305   : > { %1394 = vmax.xlane.f32.xlu1 %v1393_v46 }
 0x308   : > { %1403 = vmax.xlane.f32.xlu0 %v1402_v54 }
 0x316   : > { %1779 = vrot.lane.b32.xlu1 %v8832_v37, %s8498_s23 }
 0x35e   : > { %v1365_v62 = vpop.xlane.xlu0 %1364 }
 0x35f   : > { %v1407_v10 = vsub.f32 %v9002_v19, %v1365_v62 }
 0x361   : > { %v1425_v17 = vmul.f32 1.442695, %v1407_v10  ;;  %v1362_v29 = vpop.xlane.xlu1 %1361 }
 0x362   : > { %v1359_v32 = vpop.xlane.xlu0 %1358  ;;  %v1406_v16 = vsub.f32 %v9020_v45, %v1362_v29 }
 0x363   : > { %7941 = vpow2.f32 %v1425_v17  ;;  %v1405_v58 = vsub.f32 %v9012_v40, %v1359_v32 }
 0x364   : > { %v1423_v27 = vmul.f32 1.442695, %v1406_v16 }
 0x365   : > { %v1421_v14 = vmul.f32 1.442695, %v1405_v58 }
 0x366   : > { %v1368_v46 = vpop.xlane.xlu0 %1367 }
 0x367   : > { %7943 = vpow2.f32 %v1421_v14  ;;  %v1408_v54 = vsub.f32 %v9028_v55, %v1368_v46 }
 0x369   : > { %v1427_v50 = vmul.f32 1.442695, %v1408_v54 }
 0x36b   : > { %7945 = vpow2.f32 %v1427_v50 }
 0x36c   : > { %7947 = vpow2.f32 %v1423_v27 }
 0x36d   : > { %v9110_v37 = vpop.eup %7941 }
 0x36e   : > { %v1377_v19 = vpop.xlane.xlu1 %1376  ;;  %v1459_v62 = vsel %vm1070_vm1, %v9110_v37, 0.0 }
 0x36f   : > { %v1411_v10 = vsub.f32 %v9034_v8, %v1377_v19  ;;  %1460 = vadd.xlane.f32.xlu1 %v1459_v62 }
 0x371   : > { %v9115_v40 = vpop.eup %7943  ;;  %v1433_v45 = vmul.f32 1.442695, %v1411_v10  ;;  %v1374_v16 = vpop.xlane.xlu0 %1373 }
 0x372   : > { %v1371_v17 = vpop.xlane.xlu1 %1370  ;;  %v1453_v55 = vsel %vm1070_vm1, %v9115_v40, 0.0 }
 0x373   : > { %7949 = vpow2.f32 %v1433_v45  ;;  %v1409_v50 = vsub.f32 %v9040_v22, %v1371_v17  ;;  %1454 = vadd.xlane.f32.xlu1 %v1453_v55 }
 0x375   : > { %v9120_v29 = vpop.eup %7945  ;;  %v1429_v27 = vmul.f32 1.442695, %v1409_v50 }
 0x376   : > { %v1462_v32 = vsel %vm1070_vm1, %v9120_v29, 0.0  ;;  %v9124_v58 = vpop.eup %7947 }
 0x377   : > { %7951 = vpow2.f32 %v1429_v27  ;;  %1463 = vadd.xlane.f32.xlu0 %v1462_v32  ;;  %v1456_v8 = vsel %vm1070_vm1, %v9124_v58, 0.0  ;;  %v1410_v32 = vsub.f32 %v9044_v28, %v1374_v16 }
 0x37b   : > { %1457 = vadd.xlane.f32.xlu0 %v1456_v8 }
 0x37d   : > { %v9128_v14 = vpop.eup %7949 }
 0x37e   : > { %v1389_v46 = vpop.xlane.xlu1 %1388  ;;  %v1471_v22 = vsel %vm1070_vm1, %v9128_v14, 0.0 }
 0x37f   : > { %v1415_v54 = vsub.f32 %v9052_v60, %v1389_v46  ;;  %1472 = vadd.xlane.f32.xlu1 %v1471_v22  ;;  %v1431_v46 = vmul.f32 1.442695, %v1410_v32 }
 0x380   : > { %v1392_v19 = vpop.xlane.xlu0 %1391 }
 0x381   : > { %v9133_v62 = vpop.eup %7951  ;;  %v1441_v10 = vmul.f32 1.442695, %v1415_v54  ;;  %v1416_v22 = vsub.f32 %v9062_v34, %v1392_v19 }
 0x382   : > { %v1383_v45 = vpop.xlane.xlu1 %1382  ;;  %v1465_v17 = vsel %vm1070_vm1, %v9133_v62, 0.0 }
 0x383   : > { %7953 = vpow2.f32 %v1441_v10  ;;  %v1413_v55 = vsub.f32 %v9058_v24, %v1383_v45  ;;  %1466 = vadd.xlane.f32.xlu1 %v1465_v17  ;;  %v1443_v24 = vmul.f32 1.442695, %v1416_v22 }
 0x384   : > { %v1386_v50 = vpop.xlane.xlu0 %1385 }
 0x385   : > { %v1437_v27 = vmul.f32 1.442695, %v1413_v55  ;;  %v1414_v45 = vsub.f32 %v9068_v47, %v1386_v50 }
 0x387   : > { %7955 = vpow2.f32 %v1437_v27  ;;  %v1439_v16 = vmul.f32 1.442695, %v1414_v45 }
 0x388   : > { %v1380_v8 = vpop.xlane.xlu0 %1379 }
 0x389   : > { %v1412_v60 = vsub.f32 %v9076_v0, %v1380_v8 }
 0x38b   : > { %v1435_v54 = vmul.f32 1.442695, %v1412_v60 }
 0x38d   : > { %v9141_v25 = vpop.eup %7953  ;;  %7957 = vpow2.f32 %v1435_v54 }
 0x38e   : > { %v1483_v10 = vsel %vm1070_vm1, %v9141_v25, 0.0  ;;  %7959 = vpow2.f32 %v1431_v46  ;;  %v1401_v8 = vpop.xlane.xlu1 %1400 }
 0x38f   : > { %1484 = vadd.xlane.f32.xlu1 %v1483_v10  ;;  %7961 = vpow2.f32 %v1443_v24  ;;  %v1419_v60 = vsub.f32 %v9082_v23, %v1401_v8 }
 0x390   : > { %7963 = vpow2.f32 %v1439_v16 }
 0x391   : > { %v9146_v28 = vpop.eup %7955  ;;  %v1449_v22 = vmul.f32 1.442695, %v1419_v60  ;;  %v1398_v24 = vpop.xlane.xlu0 %1397 }
 0x392   : > { %v1477_v0 = vsel %vm1070_vm1, %v9146_v28, 0.0  ;;  %v1395_v46 = vpop.xlane.xlu1 %1394 }
 0x393   : > { %1478 = vadd.xlane.f32.xlu1 %v1477_v0  ;;  %v1417_v54 = vsub.f32 %v9088_v61, %v1395_v46  ;;  %7965 = vpow2.f32 %v1449_v22 }
 0x395   : > { %v1445_v10 = vmul.f32 1.442695, %v1417_v54  ;;  %v1404_v45 = vpop.xlane.xlu0 %1403 }
 0x396   : > { %v1420_v16 = vsub.f32 %v9098_v38, %v1404_v45  ;;  %v9204_v46 = vpop.permute.xlu1 %1779 }
 0x397   : > { %v9150_v34 = vpop.eup %7957  ;;  %7967 = vpow2.f32 %v1445_v10 }
 0x398   : > { %v1474_v19 = vsel %vm1070_vm1, %v9150_v34, 0.0  ;;  %v9154_v17 = vpop.eup %7959  ;;  %v1451_v61 = vmul.f32 1.442695, %v1420_v16 }
 0x399   : > { %1475 = vadd.xlane.f32.xlu0 %v1474_v19  ;;  %v1468_v47 = vsel %vm1070_vm1, %v9154_v17, 0.0  ;;  %v9158_v55 = vpop.eup %7961 }
 0x39a   : > { %v1486_v50 = vsel %vm1070_vm1, %v9158_v55, 0.0  ;;  %v9162_v27 = vpop.eup %7963  ;;  %7969 = vpow2.f32 %v1451_v61 }
 0x39b   : > { %v1480_v32 = vsel %vm1070_vm1, %v9162_v27, 0.0 }
 0x39d   : > { %1469 = vadd.xlane.f32.xlu0 %v1468_v47  ;;  %v9172_v0 = vpop.eup %7965  ;;  %v1418_v47 = vsub.f32 %v9092_v6, %v1398_v24 }
 0x39e   : > { %v1495_v19 = vsel %vm1070_vm1, %v9172_v0, 0.0 }
 0x3a1   : > { %1487 = vadd.xlane.f32.xlu0 %v1486_v50  ;;  %v9177_v23 = vpop.eup %7967 }
 0x3a2   : > { %v1489_v50 = vsel %vm1070_vm1, %v9177_v23, 0.0 }
 0x3a4   : > { %1775 = vrot.lane.b32.xlu1 %v8830_v35, %s8499_s30  ;;  %v9182_v8 = vpop.eup %7969 }
 0x3a5   : > { %1481 = vadd.xlane.f32.xlu0 %v1480_v32  ;;  %v1447_v32 = vmul.f32 1.442695, %v1418_v47  ;;  %v1498_v38 = vsel %vm1070_vm1, %v9182_v8, 0.0 }
 0x3a7   : > { %7971 = vpow2.f32 %v1447_v32 }
 0x3b1   : > { %v9186_v60 = vpop.eup %7971 }
 0x3b2   : > { %v1492_v6 = vsel %vm1070_vm1, %v9186_v60, 0.0 }
 0x3bb   : > { %1781 = vrot.lane.b32.xlu0 %v8840_v43, %s8498_s23 }
 0x3c8   : > { %1496 = vadd.xlane.f32.xlu1 %v1495_v19 }
 0x3cc   : > { %1490 = vadd.xlane.f32.xlu1 %v1489_v50 }
 0x3da   : > { %1499 = vadd.xlane.f32.xlu0 %v1498_v38 }
 0x3dd   : > { %1777 = vrot.lane.b32.xlu1 %v8838_v41, %s8499_s30 }
 0x3de   : > { %1493 = vadd.xlane.f32.xlu0 %v1492_v6 }
 0x3e1   : > { %1852 = vrot.lane.b32.xlu1 %v8852_v59, %s8498_s23 }
 0x3e5   : > { %1848 = vrot.lane.b32.xlu1 %v8850_v57, %s8499_s30 }
 0x3e9   : > { %1994 = vrot.lane.b32.xlu1 %v8877_v36, %s8498_s23 }
 0x3ed   : > { %1990 = vrot.lane.b32.xlu1 %v8875_v31, %s8499_s30 }
 0x3f4   : > { %1850 = vrot.lane.b32.xlu0 %v8846_v51, %s8498_s23 }
 0x3f8   : > { %1846 = vrot.lane.b32.xlu0 %v8844_v49, %s8499_s30 }
 0x3fc   : > { %1992 = vrot.lane.b32.xlu0 %v8870_v20, %s8498_s23  ;;  %v1461_v22 = vpop.xlane.xlu1 %1460 }
 0x400   : > { %1988 = vrot.lane.b32.xlu0 %v8868_v18, %s8499_s30  ;;  %v1455_v54 = vpop.xlane.xlu1 %1454 }
 0x404   : > { %v1464_v10 = vpop.xlane.xlu0 %1463 }
 0x405   : > { %7973 = vrcp.f32 %v1464_v10 }
 0x406   : > { %7975 = vrcp.f32 %v1455_v54 }
 0x407   : > { %7977 = vrcp.f32 %v1461_v22 }
 0x408   : > { %v1458_v24 = vpop.xlane.xlu0 %1457 }
 0x409   : > { %7979 = vrcp.f32 %v1458_v24 }
 0x40c   : > { %v1473_v22 = vpop.xlane.xlu1 %1472 }
 0x40f   : > { %v7974_v45 = vpop.eup %7973 }
 0x410   : > { %v7976_v16 = vpop.eup %7975  ;;  %v1520_v61 = vmul.f32 %v7974_v45, %v9120_v29 }
 0x411   : > { %v7978_v19 = vpop.eup %7977  ;;  %v1517_v50 = vmul.f32 %v7976_v16, %v9115_v40  ;;  %v1467_v40 = vpop.xlane.xlu1 %1466 }
 0x412   : > { %v1519_v38 = vmul.f32 %v7978_v19, %v9110_v37 }
 0x413   : > { %v7980_v47 = vpop.eup %7979 }
 0x414   : > { %v1518_v32 = vmul.f32 %v7980_v47, %v9124_v58  ;;  %v1534_v36 = vpack.c.bf16 %v1520_v61, %v1519_v38 }
 0x416   : > { %v1533_v6 = vpack.c.bf16 %v1518_v32, %v1517_v50 }
 0x418   : > { %7182 = vmatprep.mubr.msk.bf16.mxu1 %vm1070_vm1, %v1533_v6 }
 0x419   : > { %7183 = vmatmul.mubr.msk.bf16.vlgmr.msra.gmra.mrb[48].mxu1 %vm1070_vm1, %v1534_v36 }
 0x41a   : > { %7195 = vmatpush3.bf16.msra.mxu1 %v8904_v13 }
 0x41b   : > { %7196 = vmatprep.subr.bf16.mxu1 %v8909_v53 }
 0x41c   : > { %v1485_v58 = vpop.xlane.xlu1 %1484 }
 0x41e   : > { %7197 = vmatpush3.bf16.msra.mxu1 %v8909_v53 }
 0x41f   : > { %7702 = vmatprep.subr.msk.bf16.mxu1 %vm1070_vm1, %v9204_v46 }
 0x420   : > { %v1479_v54 = vpop.xlane.xlu1 %1478 }
 0x426   : > { %v1476_v29 = vpop.xlane.xlu0 %1475 }
 0x427   : > { %7981 = vrcp.f32 %v1476_v29 }
 0x428   : > { %7983 = vrcp.f32 %v1467_v40 }
 0x429   : > { %7985 = vrcp.f32 %v1473_v22 }
 0x42a   : > { %v1470_v37 = vpop.xlane.xlu0 %1469 }
 0x42b   : > { %7987 = vrcp.f32 %v1470_v37 }
 0x42e   : > { %v1488_v36 = vpop.xlane.xlu0 %1487 }
 0x42f   : > { %7989 = vrcp.f32 %v1488_v36  ;;  %v1776_v36 = vpop.permute.xlu1 %1775 }
 0x430   : > { %7991 = vrcp.f32 %v1479_v54 }
 0x431   : > { %v7982_v10 = vpop.eup %7981  ;;  %7993 = vrcp.f32 %v1485_v58 }
 0x432   : > { %v1482_v24 = vpop.xlane.xlu0 %1481  ;;  %v7984_v45 = vpop.eup %7983  ;;  %v1524_v47 = vmul.f32 %v7982_v10, %v9150_v34 }
 0x433   : > { %7995 = vrcp.f32 %v1482_v24  ;;  %v7986_v16 = vpop.eup %7985  ;;  %v1521_v61 = vmul.f32 %v7984_v45, %v9133_v62 }
 0x434   : > { %v1523_v32 = vmul.f32 %v7986_v16, %v9128_v14 }
 0x435   : > { %v7988_v19 = vpop.eup %7987 }
 0x436   : > { %v1522_v50 = vmul.f32 %v7988_v19, %v9154_v17  ;;  %v1536_v6 = vpack.c.bf16 %v1524_v47, %v1523_v32  ;;  %v1782_v10 = vpop.permute.xlu0 %1781 }
 0x438   : > { %v1535_v38 = vpack.c.bf16 %v1522_v50, %v1521_v61 }
 0x439   : > { %v7990_v22 = vpop.eup %7989 }
 0x43a   : > { %7190 = vmatprep.mubr.msk.bf16.mxu0 %vm1070_vm1, %v1535_v38  ;;  %v7992_v40 = vpop.eup %7991  ;;  %v1528_v34 = vmul.f32 %v7990_v22, %v9158_v55  ;;  %v1790_v55 = vsel %vm1070_vm1, %v9204_v46, 0  ;;  %v966_v46 = vpop.f32.mrb[32].mxu0 }
 0x43b   : > { %7191 = vmatmul.mubr.msk.bf16.vlgmr.msra.gmra.mrb[64].mxu0 %vm1070_vm1, %v1536_v6  ;;  %v7994_v29 = vpop.eup %7993  ;;  %v1525_v62 = vmul.f32 %v7992_v40, %v9146_v28  ;;  %v968_v19 = vpop.f32.mrb[33].mxu0 }
 0x43c   : > { %7203 = vmatpush3.bf16.msra.mxu0 %v8914_v9  ;;  %v1527_v17 = vmul.f32 %v7994_v29, %v9141_v25  ;;  %v1793_v25 = vsel %vm1070_vm1, %v1782_v10, 0  ;;  %v969_v61 = vpop.f32.mrb[34].mxu0 }
 0x43d   : > { %v7996_v58 = vpop.eup %7995  ;;  %7204 = vmatprep.subr.bf16.mxu0 %v8919_v30  ;;  %v9243_v50 = vpack.c.bf16 %v969_v61, %v966_v46  ;;  %v971_v32 = vpop.f32.mrb[35].mxu0 }
 0x43e   : > { %v1526_v14 = vmul.f32 %v7996_v58, %v9162_v27  ;;  %v1538_v54 = vpack.c.bf16 %v1528_v34, %v1527_v17  ;;  %v974_v38 = vpop.f32.mrb[36].mxu0 }
 0x43f   : > { %11288 = vst [vmem:[#allocation21_spill] sm:$0xff] %v9243_v50  ;;  %v976_v22 = vpop.f32.mrb[37].mxu0 }
 0x440   : > { %7205 = vmatpush3.bf16.msra.mxu0 %v8919_v30  ;;  %v1537_v37 = vpack.c.bf16 %v1526_v14, %v1525_v62  ;;  %v977_v29 = vpop.f32.mrb[38].mxu0 }
 0x441   : > { %v9245_v34 = vpack.c.bf16 %v977_v29, %v974_v38  ;;  %v979_v62 = vpop.f32.mrb[39].mxu0 }
 0x442   : > { %7198 = vmatprep.mubr.msk.bf16.mxu1 %vm1070_vm1, %v1537_v37  ;;  %v982_v37 = vpop.f32.mrb[40].mxu0 }
 0x443   : > { %7199 = vmatmul.mubr.msk.bf16.vlgmr.msra.gmra.mrb[52].mxu1 %vm1070_vm1, %v1538_v54  ;;  %11289 = vst [vmem:[#allocation22_spill] sm:$0xff] %v9245_v34 }
 0x444   : > { %7211 = vmatpush3.bf16.xpose.msra.mxu1 %v1790_v55  ;;  %7214 = vmatprep.mubr.msk.bf16.mxu1 %vm1070_vm1, %v1776_v36  ;;  %v984_v55 = vpop.f32.mrb[41].mxu0 }
 0x445   : > { %7703 = vmatprep.subr.msk.bf16.mxu1 %vm1070_vm1, %v1782_v10 }
 0x44c   : > { %7213 = vmatpush3.bf16.xpose.msra.mxu1 %v1793_v25  ;;  %v985_v25 = vpop.f32.mrb[42].mxu0 }
 0x455   : > { %v1497_v28 = vpop.xlane.xlu1 %1496 }
 0x459   : > { %v1491_v27 = vpop.xlane.xlu1 %1490 }
 0x45d   : > { %v1778_v24 = vpop.permute.xlu1 %1777 }
 0x45e   : > { %7215 = vmatmul.mubr.msk.bf16.vlgmr.msra.gmra.mrb[56].mxu1 %vm1070_vm1, %v1778_v24  ;;  %v987_v24 = vpop.f32.mrb[43].mxu0 }
 0x467   : > { %v1500_v45 = vpop.xlane.xlu0 %1499 }
 0x468   : > { %7997 = vrcp.f32 %v1500_v45 }
 0x469   : > { %7999 = vrcp.f32 %v1491_v27  ;;  %v9251_v27 = vpack.c.bf16 %v985_v25, %v982_v37 }
 0x46a   : > { %8001 = vrcp.f32 %v1497_v28 }
 0x46b   : > { %v1494_v16 = vpop.xlane.xlu0 %1493  ;;  %11290 = vst [vmem:[#allocation23_spill] sm:$0xff] %v9251_v27 }
 0x46c   : > { %8003 = vrcp.f32 %v1494_v16  ;;  %v990_v16 = vpop.f32.mrb[44].mxu0 }
 0x46d   : > { %v992_v46 = vpop.f32.mrb[45].mxu0 }
 0x46f   : > { %v1851_v47 = vpop.permute.xlu0 %1850 }
 0x470   : > { %7704 = vmatprep.subr.msk.bf16.mxu0 %vm1070_vm1, %v1851_v47 }
 0x472   : > { %v7998_v6 = vpop.eup %7997 }
 0x473   : > { %v8000_v40 = vpop.eup %7999  ;;  %v1532_v17 = vmul.f32 %v7998_v6, %v9182_v8  ;;  %v1847_v19 = vpop.permute.xlu0 %1846 }
 0x474   : > { %v8002_v58 = vpop.eup %8001  ;;  %v1529_v54 = vmul.f32 %v8000_v40, %v9177_v23  ;;  %v1861_v23 = vsel %vm1070_vm1, %v1851_v47, 0  ;;  %v993_v8 = vpop.f32.mrb[46].mxu0 }
 0x475   : > { %v1531_v10 = vmul.f32 %v8002_v58, %v9172_v0  ;;  %v9257_v0 = vpack.c.bf16 %v993_v8, %v990_v16  ;;  %v995_v61 = vpop.f32.mrb[47].mxu0 }
 0x476   : > { %v8004_v14 = vpop.eup %8003  ;;  %v998_v32 = vpop.f32.mrb[48].mxu0 }
 0x477   : > { %v1530_v36 = vmul.f32 %v8004_v14, %v9186_v60  ;;  %v1540_v45 = vpack.c.bf16 %v1532_v17, %v1531_v10  ;;  %v1853_v60 = vpop.permute.xlu1 %1852  ;;  %11291 = vst [vmem:[#allocation24_spill] sm:$0xff] %v9257_v0  ;;  %v1000_v38 = vpop.f32.mrb[49].mxu0  ;;  %v7910_v0 = vld [vmem:[#allocation7 + $0x34] ss:$8 sps:$4 sm:$0xff]  }
 0x478   : > { %v1001_v6 = vpop.f32.mrb[50].mxu0  ;;  %v1864_v47 = vsel %vm1070_vm1, %v1853_v60, 0  ;;  %v1993_v14 = vpop.permute.xlu0 %1992 }
 0x479   : > { %v1539_v28 = vpack.c.bf16 %v1530_v36, %v1529_v54  ;;  %v9260_v22 = vpack.c.bf16 %v1001_v6, %v998_v32  ;;  %v1003_v40 = vpop.f32.mrb[51].mxu0  ;;  %v2003_v46 = vsel %vm1070_vm1, %v1993_v14, 0 }
 0x47a   : > { %v1006_v29 = vpop.f32.mrb[52].mxu0 }
 0x47b   : > { %7206 = vmatprep.mubr.msk.bf16.mxu0 %vm1070_vm1, %v1539_v28  ;;  %11292 = vst [vmem:[#allocation25_spill] sm:$0xff] %v9260_v22  ;;  %v1008_v58 = vpop.f32.mrb[53].mxu0  ;;  %v1849_v36 = vpop.permute.xlu1 %1848 }
 0x47c   : > { %7207 = vmatmul.mubr.msk.bf16.vlgmr.msra.gmra.mrb[68].mxu0 %vm1070_vm1, %v1540_v45  ;;  %v1009_v62 = vpop.f32.mrb[54].mxu0  ;;  %v1989_v16 = vpop.permute.xlu0 %1988 }
 0x47d   : > { %7219 = vmatpush3.bf16.xpose.msra.mxu0 %v1861_v23  ;;  %7222 = vmatprep.mubr.msk.bf16.mxu0 %vm1070_vm1, %v1847_v19  ;;  %v9263_v17 = vpack.c.bf16 %v1009_v62, %v1006_v29  ;;  %v1011_v37 = vpop.f32.mrb[55].mxu0 }
 0x47e   : > { %7705 = vmatprep.subr.msk.bf16.mxu0 %vm1070_vm1, %v1853_v60  ;;  %v1014_v54 = vpop.f32.mrb[56].mxu0 }
 0x47f   : > { %11293 = vst [vmem:[#allocation26_spill] sm:$0xff] %v9263_v17  ;;  %v1016_v55 = vpop.f32.mrb[57].mxu0  ;;  %v1995_v23 = vpop.permute.xlu1 %1994 }
 0x480   : > { %v1017_v10 = vpop.f32.mrb[58].mxu0  ;;  %v2006_v61 = vsel %vm1070_vm1, %v1995_v23, 0 }
 0x481   : > { %v9266_v25 = vpack.c.bf16 %v1017_v10, %v1014_v54  ;;  %v1019_v28 = vpop.f32.mrb[59].mxu0 }
 0x482   : > { %v1022_v24 = vpop.f32.mrb[60].mxu0 }
 0x483   : > { %11294 = vst [vmem:[#allocation27_spill] sm:$0xff] %v9266_v25  ;;  %v1024_v45 = vpop.f32.mrb[61].mxu0  ;;  %v1991_v32 = vpop.permute.xlu1 %1990 }
 0x484   : > { %v1025_v19 = vpop.f32.mrb[62].mxu0 }
 0x485   : > { %7221 = vmatpush3.bf16.xpose.msra.mxu0 %v1864_v47  ;;  %v9271_v8 = vpack.c.bf16 %v1025_v19, %v1022_v24  ;;  %v1027_v60 = vpop.f32.mrb[63].mxu0 }
 0x486   : > { %7708 = vmatprep.subr.msk.bf16.mxu0 %vm1070_vm1, %v1993_v14 }
 0x487   : > { %11295 = vst [vmem:[#allocation28_spill] sm:$0xff] %v9271_v8 }
 0x48c   : > { %7223 = vmatmul.mubr.msk.bf16.vlgmr.msra.gmra.mrb[72].mxu0 %vm1070_vm1, %v1849_v36 }
 0x48d   : > { %7235 = vmatpush3.bf16.xpose.msra.mxu0 %v2003_v46  ;;  %7238 = vmatprep.mubr.msk.bf16.mxu0 %vm1070_vm1, %v1989_v16 }
 0x48e   : > { %7709 = vmatprep.subr.msk.bf16.mxu0 %vm1070_vm1, %v1995_v23 }
 0x495   : > { %7237 = vmatpush3.bf16.xpose.msra.mxu0 %v2006_v61 }
 0x49c   : > { %7239 = vmatmul.mubr.msk.bf16.vlgmr.msra.gmra.mrb[76].mxu0 %vm1070_vm1, %v1991_v32 }
 0x4ec   : > { %v9276_v38 = vpop.f32.mrb[48].mxu1 }
 0x4ed   : > { %11296 = vst [vmem:[#allocation29_spill] sm:$0xff] %v9276_v38  ;;  %v9278_v6 = vpop.f32.mrb[49].mxu1 }
 0x4ee   : > { %11297 = vst [vmem:[#allocation30_spill] sm:$0xff] %v9278_v6  ;;  %v9280_v40 = vpop.f32.mrb[50].mxu1 }
 0x4ef   : > { %11298 = vst [vmem:[#allocation31_spill] sm:$0xff] %v9280_v40  ;;  %v9284_v58 = vpop.f32.mrb[51].mxu1 }
 0x4f0   : > { %11299 = vst [vmem:[#allocation32_spill] sm:$0xff] %v9284_v58 }
 0x50e   : > { %v9288_v62 = vpop.f32.mrb[64].mxu0 }
 0x50f   : > { %11300 = vst [vmem:[#allocation33_spill] sm:$0xff] %v9288_v62  ;;  %v9290_v14 = vpop.f32.mrb[65].mxu0 }
 0x510   : > { %11301 = vst [vmem:[#allocation34_spill] sm:$0xff] %v9290_v14  ;;  %v9292_v37 = vpop.f32.mrb[66].mxu0 }
 0x511   : > { %11302 = vst [vmem:[#allocation35_spill] sm:$0xff] %v9292_v37  ;;  %v9296_v36 = vpop.f32.mrb[67].mxu0 }
 0x512   : > { %11303 = vst [vmem:[#allocation36_spill] sm:$0xff] %v9296_v36 }
 0x516   : > { %v9300_v10 = vpop.f32.mrb[52].mxu1 }
 0x517   : > { %11304 = vst [vmem:[#allocation37_spill] sm:$0xff] %v9300_v10  ;;  %v9302_v28 = vpop.f32.mrb[53].mxu1 }
 0x518   : > { %11305 = vst [vmem:[#allocation38_spill] sm:$0xff] %v9302_v28  ;;  %v9304_v24 = vpop.f32.mrb[54].mxu1 }
 0x519   : > { %11306 = vst [vmem:[#allocation39_spill] sm:$0xff] %v9304_v24  ;;  %v9308_v16 = vpop.f32.mrb[55].mxu1 }
 0x51a   : > { %11307 = vst [vmem:[#allocation40_spill] sm:$0xff] %v9308_v16 }
 0x531   : > { %v7216_v19 = vpop.f32.mrb[56].mxu1 }
 0x532   : > { %v1829_v23 = vpop.f32.mrb[57].mxu1  ;;  %v2059_v55 = vsel %vm8990_vm2, %v7216_v19, -1e+30 }
 0x533   : > { %v2057_v60 = vsel %vm8995_vm3, %v1829_v23, -1e+30  ;;  %v7217_v61 = vpop.f32.mrb[58].mxu1  ;;  %v2079_v46 = vsel %vm1070_vm1, %v2059_v55, -inf }
 0x534   : > { %v1832_v32 = vpop.f32.mrb[59].mxu1  ;;  %v2073_v54 = vsel %vm1070_vm1, %v2057_v60, -inf  ;;  %v2060_v47 = vsel %vm9014_vm5, %v7217_v61, -1e+30 }
 0x535   : > { %v2058_v45 = vsel %vm9004_vm4, %v1832_v32, -1e+30  ;;  %2074 = vmax.xlane.f32.xlu0 %v2073_v54  ;;  %v2082_v23 = vsel %vm1070_vm1, %v2060_v47, -inf }
 0x536   : > { %v2076_v29 = vsel %vm1070_vm1, %v2058_v45, -inf }
 0x537   : > { %2077 = vmax.xlane.f32.xlu1 %v2076_v29 }
 0x539   : > { %2080 = vmax.xlane.f32.xlu0 %v2079_v46 }
 0x53d   : > { %2083 = vmax.xlane.f32.xlu0 %v2082_v23 }
 0x54f   : > { %v9324_v17 = vpop.f32.mrb[68].mxu0 }
 0x550   : > { %11308 = vst [vmem:[#allocation41_spill] sm:$0xff] %v9324_v17  ;;  %v9326_v22 = vpop.f32.mrb[69].mxu0 }
 0x551   : > { %11309 = vst [vmem:[#allocation42_spill] sm:$0xff] %v9326_v22  ;;  %v9328_v19 = vpop.f32.mrb[70].mxu0 }
 0x552   : > { %11310 = vst [vmem:[#allocation43_spill] sm:$0xff] %v9328_v19  ;;  %v9332_v32 = vpop.f32.mrb[71].mxu0 }
 0x553   : > { %11311 = vst [vmem:[#allocation44_spill] sm:$0xff] %v9332_v32 }
 0x55f   : > { %v7224_v34 = vpop.f32.mrb[72].mxu0 }
 0x560   : > { %v1900_v61 = vpop.f32.mrb[73].mxu0  ;;  %v2063_v10 = vsel %vm8990_vm2, %v7224_v34, -1e+30 }
 0x561   : > { %v2061_v46 = vsel %vm8995_vm3, %v1900_v61, -1e+30  ;;  %v7225_v23 = vpop.f32.mrb[74].mxu0  ;;  %v2091_v19 = vsel %vm1070_vm1, %v2063_v10, -inf }
 0x562   : > { %v1903_v8 = vpop.f32.mrb[75].mxu0  ;;  %v2085_v50 = vsel %vm1070_vm1, %v2061_v46, -inf  ;;  %v2064_v29 = vsel %vm9014_vm5, %v7225_v23, -1e+30 }
 0x563   : > { %v2062_v54 = vsel %vm9004_vm4, %v1903_v8, -1e+30  ;;  %2086 = vmax.xlane.f32.xlu1 %v2085_v50  ;;  %v2094_v61 = vsel %vm1070_vm1, %v2064_v29, -inf }
 0x564   : > { %v2088_v17 = vsel %vm1070_vm1, %v2062_v54, -inf }
 0x565   : > { %2089 = vmax.xlane.f32.xlu0 %v2088_v17 }
 0x567   : > { %2092 = vmax.xlane.f32.xlu1 %v2091_v19 }
 0x569   : > { %2095 = vmax.xlane.f32.xlu0 %v2094_v61 }
 0x56f   : > { %v9348_v22 = vpop.f32.mrb[76].mxu0 }
 0x570   : > { %v9350_v32 = vpop.f32.mrb[77].mxu0 }
 0x571   : > { %v9352_v34 = vpop.f32.mrb[78].mxu0 }
 0x572   : > { %v9354_v8 = vpop.f32.mrb[79].mxu0 }
 0x578   : > { %1921 = vrot.lane.b32.xlu1 %v8858_v3, %s8498_s23 }
 0x57c   : > { %1917 = vrot.lane.b32.xlu1 %v8856_v1, %s8499_s30 }
 0x57f   : > { %1923 = vrot.lane.b32.xlu0 %v8864_v11, %s8498_s23 }
 0x580   : > { %2259 = vrot.lane.b32.xlu1 %v8884_v42, %s8499_s30 }
 0x583   : > { %1919 = vrot.lane.b32.xlu0 %v8862_v7, %s8499_s30 }
 0x584   : > { %2261 = vrot.lane.b32.xlu1 %v8889_v56, %s8499_s30 }
 0x5c2   : > { %v2075_v50 = vpop.xlane.xlu0 %2074 }
 0x5c3   : > { %v2121_v17 = vsub.f32 %v2057_v60, %v2075_v50 }
 0x5c4   : > { %v2078_v19 = vpop.xlane.xlu1 %2077 }
 0x5c5   : > { %v2137_v24 = vmul.f32 1.442695, %v2121_v17  ;;  %v2122_v28 = vsub.f32 %v2058_v45, %v2078_v19 }
 0x5c6   : > { %v2081_v23 = vpop.xlane.xlu0 %2080 }
 0x5c7   : > { %v2123_v61 = vsub.f32 %v2059_v55, %v2081_v23  ;;  %v2139_v14 = vmul.f32 1.442695, %v2122_v28 }
 0x5c9   : > { %v2141_v16 = vmul.f32 1.442695, %v2123_v61 }
 0x5ca   : > { %v2084_v62 = vpop.xlane.xlu0 %2083 }
 0x5cb   : > { %8005 = vpow2.f32 %v2141_v16  ;;  %v2124_v37 = vsub.f32 %v2060_v47, %v2084_v62 }
 0x5cc   : > { %8007 = vpow2.f32 %v2137_v24 }
 0x5cd   : > { %v2143_v36 = vmul.f32 1.442695, %v2124_v37 }
 0x5cf   : > { %8009 = vpow2.f32 %v2143_v36 }
 0x5d0   : > { %8011 = vpow2.f32 %v2139_v14 }
 0x5d5   : > { %v9368_v38 = vpop.eup %8005 }
 0x5d6   : > { %v2175_v40 = vsel %vm1070_vm1, %v9368_v38, 0.0  ;;  %v9372_v60 = vpop.eup %8007 }
 0x5d7   : > { %2176 = vadd.xlane.f32.xlu1 %v2175_v40  ;;  %v2169_v45 = vsel %vm1070_vm1, %v9372_v60, 0.0 }
 0x5d9   : > { %v9374_v55 = vpop.eup %8009 }
 0x5da   : > { %v2178_v47 = vsel %vm1070_vm1, %v9374_v55, 0.0  ;;  %v9380_v62 = vpop.eup %8011 }
 0x5db   : > { %2170 = vadd.xlane.f32.xlu1 %v2169_v45  ;;  %2179 = vadd.xlane.f32.xlu0 %v2178_v47  ;;  %v2172_v14 = vsel %vm1070_vm1, %v9380_v62, 0.0 }
 0x5df   : > { %2173 = vadd.xlane.f32.xlu0 %v2172_v14 }
 0x5f0   : > { %v2087_v37 = vpop.xlane.xlu1 %2086 }
 0x5f1   : > { %v2125_v36 = vsub.f32 %v2061_v46, %v2087_v37 }
 0x5f2   : > { %v2090_v28 = vpop.xlane.xlu0 %2089 }
 0x5f3   : > { %v2126_v24 = vsub.f32 %v2062_v54, %v2090_v28  ;;  %v2145_v50 = vmul.f32 1.442695, %v2125_v36 }
 0x5f4   : > { %v2093_v40 = vpop.xlane.xlu1 %2092 }
 0x5f5   : > { %v2127_v16 = vsub.f32 %v2063_v10, %v2093_v40  ;;  %v2147_v6 = vmul.f32 1.442695, %v2126_v24 }
 0x5f6   : > { %v2096_v17 = vpop.xlane.xlu0 %2095 }
 0x5f7   : > { %v2149_v19 = vmul.f32 1.442695, %v2127_v16  ;;  %v2128_v23 = vsub.f32 %v2064_v29, %v2096_v17  ;;  %v9418_v17 = vsel %vm8995_vm3, %v9350_v32, -1e+30 }
 0x5f8   : > { %v1922_v61 = vpop.permute.xlu1 %1921 }
 0x5f9   : > { %8013 = vpow2.f32 %v2149_v19  ;;  %v2151_v58 = vmul.f32 1.442695, %v2128_v23  ;;  %7706 = vmatprep.subr.msk.bf16.mxu1 %vm1070_vm1, %v1922_v61  ;;  %v1932_v45 = vsel %vm1070_vm1, %v1922_v61, 0  ;;  %v2109_v23 = vsel %vm1070_vm1, %v9418_v17, -inf }
 0x5fa   : > { %8015 = vpow2.f32 %v2145_v50  ;;  %7227 = vmatpush3.bf16.xpose.msra.mxu1 %v1932_v45  ;;  %v1924_v47 = vpop.permute.xlu0 %1923  ;;  %v9413_v50 = vsel %vm9004_vm4, %v9354_v8, -1e+30  ;;  %v2071_v61 = vsel %vm8990_vm2, %v9348_v22, -1e+30  ;;  %v9431_v45 = vsel %vm9014_vm5, %v9352_v34, -1e+30 }
 0x5fb   : > { %8017 = vpow2.f32 %v2151_v58  ;;  %7707 = vmatprep.subr.msk.bf16.mxu1 %vm1070_vm1, %v1924_v47  ;;  %v1935_v10 = vsel %vm1070_vm1, %v1924_v47, 0  ;;  %v2112_v19 = vsel %vm1070_vm1, %v9413_v50, -inf  ;;  %v2115_v8 = vsel %vm1070_vm1, %v2071_v61, -inf }
 0x5fc   : > { %v1918_v54 = vpop.permute.xlu1 %1917  ;;  %8019 = vpow2.f32 %v2147_v6  ;;  %v2118_v32 = vsel %vm1070_vm1, %v9431_v45, -inf }
 0x5fd   : > { %7230 = vmatprep.mubr.msk.bf16.mxu1 %vm1070_vm1, %v1918_v54 }
 0x5fe   : > { %v1920_v28 = vpop.permute.xlu0 %1919 }
 0x600   : > { %v2260_v29 = vpop.permute.xlu1 %2259 }
 0x602   : > { %7229 = vmatpush3.bf16.xpose.msra.mxu1 %v1935_v10 }
 0x603   : > { %v9389_v46 = vpop.eup %8013  ;;  %7242 = vmatprep.subr.bf16.mxu1 %v2260_v29 }
 0x604   : > { %v9391_v14 = vpop.eup %8015  ;;  %v2187_v37 = vsel %vm1070_vm1, %v9389_v46, 0.0  ;;  %v2262_v24 = vpop.permute.xlu1 %2261 }
 0x605   : > { %v9395_v36 = vpop.eup %8017  ;;  %2188 = vadd.xlane.f32.xlu1 %v2187_v37  ;;  %v2181_v40 = vsel %vm1070_vm1, %v9391_v14, 0.0 }
 0x606   : > { %v2190_v6 = vsel %vm1070_vm1, %v9395_v36, 0.0  ;;  %v9399_v58 = vpop.eup %8019 }
 0x607   : > { %2191 = vadd.xlane.f32.xlu0 %v2190_v6  ;;  %v2184_v16 = vsel %vm1070_vm1, %v9399_v58, 0.0 }
 0x609   : > { %2182 = vadd.xlane.f32.xlu1 %v2181_v40  ;;  %7231 = vmatmul.mubr.msk.bf16.vlgmr.msra.gmra.mrb[60].mxu1 %vm1070_vm1, %v1920_v28 }
 0x60a   : > { %7243 = vmatpush3.bf16.msra.mxu1 %v2260_v29 }
 0x60b   : > { %2185 = vadd.xlane.f32.xlu0 %v2184_v16  ;;  %7244 = vmatprep.subr.bf16.mxu1 %v2262_v24 }
 0x60e   : > { %7245 = vmatpush3.bf16.msra.mxu1 %v2262_v24 }
 0x61a   : > { %2324 = vrot.lane.b32.xlu1 %v8899_v21, %s8499_s30 }
 0x621   : > { %2322 = vrot.lane.b32.xlu0 %v8894_v5, %s8499_s30 }
 0x63e   : > { %2113 = vmax.xlane.f32.xlu1 %v2112_v19 }
 0x640   : > { %2110 = vmax.xlane.f32.xlu0 %v2109_v23 }
 0x644   : > { %2116 = vmax.xlane.f32.xlu0 %v2115_v8 }
 0x648   : > { %2119 = vmax.xlane.f32.xlu0 %v2118_v32 }
 0x664   : > { %v2177_v47 = vpop.xlane.xlu1 %2176 }
 0x668   : > { %v2171_v54 = vpop.xlane.xlu1 %2170  ;;  %v2180_v10 = vpop.xlane.xlu0 %2179 }
 0x669   : > { %8021 = vrcp.f32 %v2180_v10 }
 0x66a   : > { %8023 = vrcp.f32 %v2171_v54 }
 0x66b   : > { %8025 = vrcp.f32 %v2177_v47 }
 0x66c   : > { %v2174_v22 = vpop.xlane.xlu0 %2173 }
 0x66d   : > { %8027 = vrcp.f32 %v2174_v22 }
 0x673   : > { %v8022_v29 = vpop.eup %8021 }
 0x674   : > { %v8024_v37 = vpop.eup %8023  ;;  %v2236_v34 = vmul.f32 %v8022_v29, %v9374_v55 }
 0x675   : > { %v8026_v6 = vpop.eup %8025  ;;  %v2233_v40 = vmul.f32 %v8024_v37, %v9372_v60 }
 0x676   : > { %v2235_v16 = vmul.f32 %v8026_v6, %v9368_v38 }
 0x677   : > { %v8028_v28 = vpop.eup %8027 }
 0x678   : > { %v2234_v24 = vmul.f32 %v8028_v28, %v9380_v62  ;;  %v2250_v23 = vpack.c.bf16 %v2236_v34, %v2235_v16 }
 0x67a   : > { %v2249_v19 = vpack.c.bf16 %v2234_v24, %v2233_v40 }
 0x67c   : > { %7246 = vmatprep.mubr.msk.bf16.mxu1 %vm1070_vm1, %v2249_v19 }
 0x67d   : > { %7247 = vmatmul.mubr.msk.bf16.vlgmr.msra.gmra.mrb[64].mxu1 %vm1070_vm1, %v2250_v23 }
 0x692   : > { %v2189_v8 = vpop.xlane.xlu1 %2188 }
 0x694   : > { %v2192_v32 = vpop.xlane.xlu0 %2191 }
 0x695   : > { %8029 = vrcp.f32 %v2192_v32 }
 0x696   : > { %v2183_v47 = vpop.xlane.xlu1 %2182 }
 0x697   : > { %8031 = vrcp.f32 %v2183_v47 }
 0x698   : > { %8033 = vrcp.f32 %v2189_v8  ;;  %v2186_v54 = vpop.xlane.xlu0 %2185 }
 0x699   : > { %8035 = vrcp.f32 %v2186_v54 }
 0x69a   : > { %v2325_v60 = vpop.permute.xlu1 %2324 }
 0x69c   : > { %v2323_v55 = vpop.permute.xlu0 %2322 }
 0x69d   : > { %7250 = vmatprep.subr.bf16.mxu0 %v2323_v55 }
 0x69e   : > { %7251 = vmatpush3.bf16.msra.mxu0 %v2323_v55 }
 0x69f   : > { %7252 = vmatprep.subr.bf16.mxu0 %v2325_v60  ;;  %v8030_v38 = vpop.eup %8029 }
 0x6a0   : > { %v2240_v29 = vmul.f32 %v8030_v38, %v9395_v36 }
 0x6a1   : > { %v8032_v62 = vpop.eup %8031 }
 0x6a2   : > { %v8034_v10 = vpop.eup %8033  ;;  %7253 = vmatpush3.bf16.msra.mxu0 %v2325_v60  ;;  %v2237_v37 = vmul.f32 %v8032_v62, %v9391_v14 }
 0x6a3   : > { %v8036_v22 = vpop.eup %8035  ;;  %v2239_v28 = vmul.f32 %v8034_v10, %v9389_v46 }
 0x6a4   : > { %v2238_v6 = vmul.f32 %v8036_v22, %v9399_v58 }
 0x6a5   : > { %v2252_v40 = vpack.c.bf16 %v2240_v29, %v2239_v28 }
 0x6a6   : > { %v2251_v34 = vpack.c.bf16 %v2238_v6, %v2237_v37 }
 0x6a8   : > { %7254 = vmatprep.mubr.msk.bf16.mxu0 %vm1070_vm1, %v2251_v34 }
 0x6a9   : > { %7255 = vmatmul.mubr.msk.bf16.vlgmr.msra.gmra.mrb[80].mxu0 %vm1070_vm1, %v2252_v40 }
 0x6cb   : > { %v2114_v19 = vpop.xlane.xlu1 %2113 }
 0x6cc   : > { %v2134_v36 = vsub.f32 %v9413_v50, %v2114_v19 }
 0x6cd   : > { %v2111_v24 = vpop.xlane.xlu0 %2110 }
 0x6ce   : > { %v2133_v16 = vsub.f32 %v9418_v17, %v2111_v24  ;;  %v2163_v58 = vmul.f32 1.442695, %v2134_v36 }
 0x6d0   : > { %v2161_v32 = vmul.f32 1.442695, %v2133_v16 }
 0x6d1   : > { %v2117_v23 = vpop.xlane.xlu0 %2116 }
 0x6d2   : > { %v2135_v8 = vsub.f32 %v2071_v61, %v2117_v23 }
 0x6d4   : > { %v2165_v14 = vmul.f32 1.442695, %v2135_v8 }
 0x6d5   : > { %v2120_v47 = vpop.xlane.xlu0 %2119 }
 0x6d6   : > { %8037 = vpow2.f32 %v2165_v14  ;;  %v2136_v46 = vsub.f32 %v9431_v45, %v2120_v47  ;;  %v7907_v14 = vld [vmem:[#allocation7 + $0x24] ss:$8 sps:$4 sm:$0xff]  }
 0x6d7   : > { %8039 = vpow2.f32 %v2161_v32 }
 0x6d8   : > { %v2167_v54 = vmul.f32 1.442695, %v2136_v46 }
 0x6da   : > { %8041 = vpow2.f32 %v2167_v54 }
 0x6db   : > { %8043 = vpow2.f32 %v2163_v58 }
 0x6dc   : > { %v9450_v55 = vpop.f32.mrb[60].mxu1 }
 0x6dd   : > { %v9452_v60 = vpop.f32.mrb[61].mxu1 }
 0x6de   : > { %v9454_v17 = vpop.f32.mrb[62].mxu1 }
 0x6df   : > { %v9456_v61 = vpop.f32.mrb[63].mxu1 }
 0x6e0   : > { %v8038_v50 = vpop.eup %8037 }
 0x6e1   : > { %v2211_v38 = vsel %vm1070_vm1, %v8038_v50, 0.0  ;;  %v8040_v62 = vpop.eup %8039 }
 0x6e2   : > { %2212 = vadd.xlane.f32.xlu1 %v2211_v38  ;;  %v2205_v22 = vsel %vm1070_vm1, %v8040_v62, 0.0 }
 0x6e4   : > { %v8042_v10 = vpop.eup %8041 }
 0x6e5   : > { %v2214_v45 = vsel %vm1070_vm1, %v8042_v10, 0.0  ;;  %v8044_v29 = vpop.eup %8043 }
 0x6e6   : > { %2215 = vadd.xlane.f32.xlu0 %v2214_v45  ;;  %2206 = vadd.xlane.f32.xlu1 %v2205_v22  ;;  %v2208_v37 = vsel %vm1070_vm1, %v8044_v29, 0.0 }
 0x6ea   : > { %2209 = vadd.xlane.f32.xlu0 %v2208_v37 }
 0x6f7   : > { %2448 = vrot.lane.b32.xlu1 %v8914_v9, %s8499_s30 }
 0x6fb   : > { %2843 = vrot.lane.b32.xlu1 %v8830_v35, %s8496_s21 }
 0x6ff   : > { %2845 = vrot.lane.b32.xlu1 %v8838_v41, %s8496_s21 }
 0x700   : > { %2450 = vrot.lane.b32.xlu0 %v8919_v30, %s8499_s30 }
 0x703   : > { %2910 = vrot.lane.b32.xlu1 %v8850_v57, %s8496_s21 }
 0x704   : > { %2908 = vrot.lane.b32.xlu0 %v8844_v49, %s8496_s21 }
 0x707   : > { %2975 = vrot.lane.b32.xlu1 %v8862_v7, %s8496_s21 }
 0x708   : > { %2973 = vrot.lane.b32.xlu0 %v8856_v1, %s8496_s21 }
 0x70b   : > { %3040 = vrot.lane.b32.xlu1 %v8875_v31, %s8496_s21 }
 0x70c   : > { %3038 = vrot.lane.b32.xlu0 %v8868_v18, %s8496_s21 }
 0x750   : > { %v7248_v6 = vpop.f32.mrb[64].mxu1 }
 0x751   : > { %v2305_v28 = vpop.f32.mrb[65].mxu1 }
 0x752   : > { %v7249_v34 = vpop.f32.mrb[66].mxu1 }
 0x753   : > { %v2510_v40 = vpack.c.bf16 %v7249_v34, %v7248_v6  ;;  %v2308_v24 = vpop.f32.mrb[67].mxu1 }
 0x754   : > { %v2509_v16 = vpack.c.bf16 %v2308_v24, %v2305_v28 }
 0x76f   : > { %v2213_v19 = vpop.xlane.xlu1 %2212 }
 0x773   : > { %v2216_v23 = vpop.xlane.xlu0 %2215  ;;  %v2207_v8 = vpop.xlane.xlu1 %2206 }
 0x774   : > { %8045 = vrcp.f32 %v2216_v23 }
 0x775   : > { %8047 = vrcp.f32 %v2207_v8 }
 0x776   : > { %8049 = vrcp.f32 %v2213_v19 }
 0x777   : > { %v2210_v36 = vpop.xlane.xlu0 %2209  ;;  %v2449_v32 = vpop.permute.xlu1 %2448 }
 0x778   : > { %8051 = vrcp.f32 %v2210_v36  ;;  %7266 = vmatprep.subr.bf16.mxu0 %v2449_v32 }
 0x779   : > { %7267 = vmatpush3.bf16.msra.mxu0 %v2449_v32  ;;  %v7905_v32 = vld [vmem:[#allocation7 + $0x20] ss:$8 sps:$4 sm:$0xff]  }
 0x77b   : > { %v2451_v47 = vpop.permute.xlu0 %2450 }
 0x77c   : > { %v7256_v46 = vpop.f32.mrb[80].mxu0  ;;  %7268 = vmatprep.subr.bf16.mxu0 %v2451_v47 }
 0x77d   : > { %v2368_v58 = vpop.f32.mrb[81].mxu0  ;;  %7269 = vmatpush3.bf16.msra.mxu0 %v2451_v47  ;;  %v11312_v47 = vmov 0  }
 0x77e   : > { %v7257_v54 = vpop.f32.mrb[82].mxu0  ;;  %2565 = vmatprep.subr.bf16.mxu0 %v7907_v14  ;;  %v8046_v38 = vpop.eup %8045  ;;  %v7908_v14 = vld [vmem:[#allocation7 + $0x30] ss:$8 sps:$4 sm:$0xff]  }
 0x77f   : > { %v2512_v45 = vpack.c.bf16 %v7257_v54, %v7256_v46  ;;  %v2371_v22 = vpop.f32.mrb[83].mxu0  ;;  %v8048_v37 = vpop.eup %8047  ;;  %v2248_v24 = vmul.f32 %v8046_v38, %v8042_v10  ;;  %v2987_v54 = vsel %vm1070_vm1, %v8907_v48, 0 }
 0x780   : > { %v2511_v6 = vpack.c.bf16 %v2371_v22, %v2368_v58  ;;  %v8050_v28 = vpop.eup %8049  ;;  %v2245_v19 = vmul.f32 %v8048_v37, %v8040_v62  ;;  %v2909_v10 = vpop.permute.xlu0 %2908  ;;  %v2984_v58 = vsel %vm1070_vm1, %v8902_v33, 0  ;;  %v3049_v22 = vsel %vm1070_vm1, %v8912_v4, 0  ;;  %v11313_v37 = vld [vmem:[#allocation19_spill] sm:$0xff] }
 0x781   : > { %v2247_v8 = vmul.f32 %v8050_v28, %v8038_v50  ;;  %v2854_v50 = vsel %vm1070_vm1, %v8880_v39, 0 }
 0x782   : > { %v8052_v34 = vpop.eup %8051 }
 0x783   : > { %v2246_v23 = vmul.f32 %v8052_v34, %v8044_v29  ;;  %v2256_v25 = vpack.c.bf16 %v2248_v24, %v2247_v8  ;;  %v2919_v29 = vsel %vm1070_vm1, %v8892_v2, 0 }
 0x784   : > { %v2974_v46 = vpop.permute.xlu0 %2973 }
 0x785   : > { %v2255_v36 = vpack.c.bf16 %v2246_v23, %v2245_v19 }
 0x787   : > { %7270 = vmatprep.mubr.msk.bf16.mxu0 %vm1070_vm1, %v2255_v36 }
 0x788   : > { %7271 = vmatmul.mubr.msk.bf16.vlgmr.msra.gmra.mrb[84].mxu0 %vm1070_vm1, %v2256_v25  ;;  %v2844_v25 = vpop.permute.xlu1 %2843 }
 0x789   : > { %2566 = vmatpush1.bf16.msra.mxu0 %v7905_v32  ;;  %2597 = vmatprep.mubr.bf16.mxu0 %v11312_v47 }
 0x78a   : > { %2567 = vmatprep.subr.bf16.mxu0 %v7910_v0  ;;  %v2857_v0 = vsel %vm1070_vm1, %v8887_v52, 0 }
 0x78c   : > { %v2846_v62 = vpop.permute.xlu1 %2845 }
 0x78d   : > { %2568 = vmatpush1.bf16.msra.mxu0 %v7908_v14 }
 0x78e   : > { %7710 = vmatprep.subr.msk.bf16.mxu0 %vm1070_vm1, %v8880_v39 }
 0x790   : > { %6812 = vmatmul.mubr.msk.bf16.vlgmr.msra.gmra.mrb[88].mxu0 %vm1070_vm1, %v2509_v16  ;;  %v2911_v16 = vpop.permute.xlu1 %2910 }
 0x791   : > { %2607 = vmatprep.mubr.bf16.mxu0 %v11312_v47 }
 0x794   : > { %v2976_v38 = vpop.permute.xlu1 %2975 }
 0x796   : > { %7275 = vmatpush3.bf16.xpose.msra.mxu0 %v2854_v50 }
 0x797   : > { %7711 = vmatprep.subr.msk.bf16.mxu0 %vm1070_vm1, %v8887_v52 }
 0x798   : > { %6813 = vmatmul.mubr.msk.bf16.gmra.mrb[92].mxu0 %vm1070_vm1, %v2510_v40  ;;  %v2922_v40 = vsel %vm1070_vm1, %v8897_v15, 0  ;;  %v3041_v28 = vpop.permute.xlu1 %3040 }
 0x799   : > { %2617 = vmatprep.mubr.bf16.mxu0 %v11312_v47 }
 0x79e   : > { %7277 = vmatpush3.bf16.xpose.msra.mxu0 %v2857_v0 }
 0x79f   : > { %7712 = vmatprep.subr.msk.bf16.mxu0 %vm1070_vm1, %v8892_v2 }
 0x7a0   : > { %6814 = vmatmul.mubr.msk.bf16.gmra.mrb[96].mxu0 %vm1070_vm1, %v2511_v6  ;;  %v3052_v6 = vsel %vm1070_vm1, %v11313_v37, 0 }
 0x7a1   : > { %2627 = vmatprep.mubr.bf16.mxu0 %v11312_v47 }
 0x7a8   : > { %6815 = vmatmul.mubr.msk.bf16.gmra.mrb[100].mxu0 %vm1070_vm1, %v2512_v45  ;;  %v3039_v45 = vpop.permute.xlu0 %3038 }
 0x7a9   : > { %7278 = vmatprep.mubr.msk.bf16.mxu0 %vm1070_vm1, %v2844_v25 }
 0x7b0   : > { %7279 = vmatmul.mubr.msk.bf16.vlgmr.msra.gmra.mrb[104].mxu0 %vm1070_vm1, %v2846_v62 }
 0x7b1   : > { %7283 = vmatpush3.bf16.xpose.msra.mxu0 %v2919_v29  ;;  %7286 = vmatprep.mubr.msk.bf16.mxu0 %vm1070_vm1, %v2909_v10 }
 0x7b2   : > { %7713 = vmatprep.subr.msk.bf16.mxu0 %vm1070_vm1, %v8897_v15 }
 0x7b9   : > { %7285 = vmatpush3.bf16.xpose.msra.mxu0 %v2922_v40 }
 0x7ba   : > { %7714 = vmatprep.subr.msk.bf16.mxu0 %vm1070_vm1, %v8902_v33 }
 0x7c0   : > { %7287 = vmatmul.mubr.msk.bf16.vlgmr.msra.gmra.mrb[108].mxu0 %vm1070_vm1, %v2911_v16 }
 0x7c1   : > { %7291 = vmatpush3.bf16.xpose.msra.mxu0 %v2984_v58  ;;  %7294 = vmatprep.mubr.msk.bf16.mxu0 %vm1070_vm1, %v2974_v46 }
 0x7c2   : > { %7715 = vmatprep.subr.msk.bf16.mxu0 %vm1070_vm1, %v8907_v48 }
 0x7c9   : > { %7293 = vmatpush3.bf16.xpose.msra.mxu0 %v2987_v54 }
 0x7ca   : > { %7716 = vmatprep.subr.msk.bf16.mxu0 %vm1070_vm1, %v8912_v4 }
 0x7d0   : > { %7295 = vmatmul.mubr.msk.bf16.vlgmr.msra.gmra.mrb[112].mxu0 %vm1070_vm1, %v2976_v38 }
 0x7d1   : > { %7299 = vmatpush3.bf16.xpose.msra.mxu0 %v3049_v22  ;;  %7302 = vmatprep.mubr.msk.bf16.mxu0 %vm1070_vm1, %v3039_v45 }
 0x7d2   : > { %7717 = vmatprep.subr.msk.bf16.mxu0 %vm1070_vm1, %v11313_v37 }
 0x7d9   : > { %7301 = vmatpush3.bf16.xpose.msra.mxu0 %v3052_v6 }
 0x7e0   : > { %7303 = vmatmul.mubr.msk.bf16.vlgmr.msra.gmra.mrb[116].mxu0 %vm1070_vm1, %v3041_v28 }
 0x85b   : > { %v9532_v34 = vpop.f32.mrb[84].mxu0 }
 0x85c   : > { %11314 = vst [vmem:[#allocation19_spill] sm:$0xff] %v9532_v34  ;;  %v9534_v24 = vpop.f32.mrb[85].mxu0 }
 0x85d   : > { %11315 = vst [vmem:[#allocation45_spill] sm:$0xff] %v9534_v24  ;;  %v9536_v19 = vpop.f32.mrb[86].mxu0 }
 0x85e   : > { %11316 = vst [vmem:[#allocation46_spill] sm:$0xff] %v9536_v19  ;;  %v9540_v8 = vpop.f32.mrb[87].mxu0 }
 0x85f   : > { %11317 = vst [vmem:[#allocation47_spill] sm:$0xff] %v9540_v8 }
 0x863   : > { %v9544_v32 = vpop.f32.mrb[88].mxu0 }
 0x864   : > { %11318 = vst [vmem:[#allocation48_spill] sm:$0xff] %v9544_v32  ;;  %v9546_v14 = vpop.f32.mrb[89].mxu0 }
 0x865   : > { %11319 = vst [vmem:[#allocation49_spill] sm:$0xff] %v9546_v14  ;;  %v9548_v50 = vpop.f32.mrb[90].mxu0 }
 0x866   : > { %11320 = vst [vmem:[#allocation50_spill] sm:$0xff] %v9548_v50  ;;  %v9550_v0 = vpop.f32.mrb[91].mxu0 }
 0x867   : > { %11321 = vst [vmem:[#allocation51_spill] sm:$0xff] %v9550_v0 }
 0x86b   : > { %v9552_v25 = vpop.f32.mrb[92].mxu0 }
 0x86c   : > { %11322 = vst [vmem:[#allocation52_spill] sm:$0xff] %v9552_v25  ;;  %v9554_v62 = vpop.f32.mrb[93].mxu0 }
 0x86d   : > { %11323 = vst [vmem:[#allocation53_spill] sm:$0xff] %v9554_v62  ;;  %v9556_v10 = vpop.f32.mrb[94].mxu0 }
 0x86e   : > { %11324 = vst [vmem:[#allocation54_spill] sm:$0xff] %v9556_v10  ;;  %v9558_v29 = vpop.f32.mrb[95].mxu0 }
 0x86f   : > { %11325 = vst [vmem:[#allocation55_spill] sm:$0xff] %v9558_v29 }
 0x873   : > { %v9560_v40 = vpop.f32.mrb[96].mxu0 }
 0x874   : > { %11326 = vst [vmem:[#allocation56_spill] sm:$0xff] %v9560_v40  ;;  %v9562_v16 = vpop.f32.mrb[97].mxu0 }
 0x875   : > { %11327 = vst [vmem:[#allocation57_spill] sm:$0xff] %v9562_v16  ;;  %v9564_v46 = vpop.f32.mrb[98].mxu0 }
 0x876   : > { %11328 = vst [vmem:[#allocation58_spill] sm:$0xff] %v9564_v46  ;;  %v9566_v58 = vpop.f32.mrb[99].mxu0 }
 0x877   : > { %11329 = vst [vmem:[#allocation59_spill] sm:$0xff] %v9566_v58 }
 0x87b   : > { %v9568_v54 = vpop.f32.mrb[100].mxu0 }
 0x87c   : > { %11330 = vst [vmem:[#allocation60_spill] sm:$0xff] %v9568_v54  ;;  %v9570_v38 = vpop.f32.mrb[101].mxu0 }
 0x87d   : > { %11331 = vst [vmem:[#allocation61_spill] sm:$0xff] %v9570_v38  ;;  %v9572_v45 = vpop.f32.mrb[102].mxu0 }
 0x87e   : > { %11332 = vst [vmem:[#allocation62_spill] sm:$0xff] %v9572_v45  ;;  %v9574_v22 = vpop.f32.mrb[103].mxu0 }
 0x87f   : > { %11333 = vst [vmem:[#allocation63_spill] sm:$0xff] %v9574_v22 }
 0x883   : > { %v7280_v6 = vpop.f32.mrb[104].mxu0 }
 0x884   : > { %v9578_v28 = vsel %vm8990_vm2, %v7280_v6, -1e+30  ;;  %v2893_v23 = vpop.f32.mrb[105].mxu0 }
 0x885   : > { %v7281_v36 = vpop.f32.mrb[106].mxu0  ;;  %v3125_v46 = vsel %vm1070_vm1, %v9578_v28, -inf  ;;  %v9584_v58 = vsel %vm8995_vm3, %v2893_v23, -1e+30 }
 0x886   : > { %3126 = vmax.xlane.f32.xlu0 %v3125_v46  ;;  %v2896_v38 = vpop.f32.mrb[107].mxu0  ;;  %v3119_v6 = vsel %vm1070_vm1, %v9584_v58, -inf  ;;  %v9596_v54 = vsel %vm9014_vm5, %v7281_v36, -1e+30 }
 0x887   : > { %v9588_v45 = vsel %vm9004_vm4, %v2896_v38, -1e+30  ;;  %v3128_v23 = vsel %vm1070_vm1, %v9596_v54, -inf }
 0x888   : > { %v3122_v22 = vsel %vm1070_vm1, %v9588_v45, -inf }
 0x889   : > { %3123 = vmax.xlane.f32.xlu1 %v3122_v22 }
 0x88a   : > { %3120 = vmax.xlane.f32.xlu0 %v3119_v6 }
 0x88e   : > { %3129 = vmax.xlane.f32.xlu0 %v3128_v23 }
 0x893   : > { %v7288_v46 = vpop.f32.mrb[108].mxu0 }
 0x894   : > { %v9602_v38 = vsel %vm8990_vm2, %v7288_v46, -1e+30  ;;  %v2958_v16 = vpop.f32.mrb[109].mxu0 }
 0x895   : > { %v7289_v40 = vpop.f32.mrb[110].mxu0  ;;  %v3137_v22 = vsel %vm1070_vm1, %v9602_v38, -inf  ;;  %v9608_v29 = vsel %vm8995_vm3, %v2958_v16, -1e+30 }
 0x896   : > { %3138 = vmax.xlane.f32.xlu1 %v3137_v22  ;;  %v2961_v36 = vpop.f32.mrb[111].mxu0  ;;  %v3131_v46 = vsel %vm1070_vm1, %v9608_v29, -inf  ;;  %v9620_v10 = vsel %vm9014_vm5, %v7289_v40, -1e+30 }
 0x897   : > { %v9612_v6 = vsel %vm9004_vm4, %v2961_v36, -1e+30  ;;  %v3140_v16 = vsel %vm1070_vm1, %v9620_v10, -inf }
 0x898   : > { %v3134_v23 = vsel %vm1070_vm1, %v9612_v6, -inf }
 0x899   : > { %3135 = vmax.xlane.f32.xlu0 %v3134_v23 }
 0x89a   : > { %3132 = vmax.xlane.f32.xlu1 %v3131_v46 }
 0x89d   : > { %3141 = vmax.xlane.f32.xlu0 %v3140_v16 }
 0x8a3   : > { %v7296_v22 = vpop.f32.mrb[112].mxu0 }
 0x8a4   : > { %v9626_v36 = vsel %vm8990_vm2, %v7296_v22, -1e+30  ;;  %v3023_v62 = vpop.f32.mrb[113].mxu0 }
 0x8a5   : > { %v3149_v25 = vsel %vm1070_vm1, %v9626_v36, -inf  ;;  %v7297_v0 = vpop.f32.mrb[114].mxu0  ;;  %v9632_v40 = vsel %vm8995_vm3, %v3023_v62, -1e+30 }
 0x8a6   : > { %3150 = vmax.xlane.f32.xlu1 %v3149_v25  ;;  %v3026_v23 = vpop.f32.mrb[115].mxu0  ;;  %v3143_v22 = vsel %vm1070_vm1, %v9632_v40, -inf  ;;  %v9644_v50 = vsel %vm9014_vm5, %v7297_v0, -1e+30 }
 0x8a7   : > { %v9636_v46 = vsel %vm9004_vm4, %v3026_v23, -1e+30  ;;  %v3152_v25 = vsel %vm1070_vm1, %v9644_v50, -inf }
 0x8a8   : > { %v3146_v16 = vsel %vm1070_vm1, %v9636_v46, -inf }
 0x8a9   : > { %3147 = vmax.xlane.f32.xlu0 %v3146_v16 }
 0x8aa   : > { %3144 = vmax.xlane.f32.xlu1 %v3143_v22 }
 0x8ad   : > { %3153 = vmax.xlane.f32.xlu0 %v3152_v25 }
 0x8b3   : > { %v7304_v62 = vpop.f32.mrb[116].mxu0 }
 0x8b4   : > { %v3088_v14 = vpop.f32.mrb[117].mxu0  ;;  %v9668_v22 = vsel %vm8990_vm2, %v7304_v62, -1e+30 }
 0x8b5   : > { %v7305_v23 = vpop.f32.mrb[118].mxu0 }
 0x8b6   : > { %v9650_v32 = vsel %vm9014_vm5, %v7305_v23, -1e+30  ;;  %v3091_v34 = vpop.f32.mrb[119].mxu0 }
 0x8b7   : > { %v3164_v19 = vsel %vm1070_vm1, %v9650_v32, -inf  ;;  %v9656_v0 = vsel %vm9004_vm4, %v3091_v34, -1e+30  ;;  %v3161_v34 = vsel %vm1070_vm1, %v9668_v22, -inf }
 0x8b8   : > { %3165 = vmax.xlane.f32.xlu0 %v3164_v19  ;;  %v3158_v16 = vsel %vm1070_vm1, %v9656_v0, -inf  ;;  %v9674_v19 = vsel %vm8995_vm3, %v3088_v14, -1e+30 }
 0x8b9   : > { %v3155_v25 = vsel %vm1070_vm1, %v9674_v19, -inf }
 0x8bb   : > { %3303 = vrot.lane.b32.xlu1 %v8884_v42, %s8496_s21 }
 0x8bc   : > { %3159 = vmax.xlane.f32.xlu0 %v3158_v16 }
 0x8d2   : > { %3305 = vrot.lane.b32.xlu0 %v8889_v56, %s8496_s21 }
 0x8d6   : > { %3366 = vrot.lane.b32.xlu0 %v8899_v21, %s8496_s21 }
 0x8df   : > { %3162 = vmax.xlane.f32.xlu1 %v3161_v34 }
 0x8e3   : > { %3156 = vmax.xlane.f32.xlu1 %v3155_v25 }
 0x8f4   : > { %3364 = vrot.lane.b32.xlu1 %v8894_v5, %s8496_s21 }
 0x8f8   : > { %3425 = vrot.lane.b32.xlu1 %v8904_v13, %s8496_s21 }
 0x8fc   : > { %3427 = vrot.lane.b32.xlu1 %v8909_v53, %s8496_s21 }
 0x900   : > { %3486 = vrot.lane.b32.xlu1 %v8914_v9, %s8496_s21 }
 0x913   : > { %v3127_v62 = vpop.xlane.xlu0 %3126 }
 0x914   : > { %v3169_v14 = vsub.f32 %v9578_v28, %v3127_v62 }
 0x916   : > { %v3187_v23 = vmul.f32 1.442695, %v3169_v14  ;;  %v3124_v16 = vpop.xlane.xlu1 %3123 }
 0x917   : > { %v3121_v34 = vpop.xlane.xlu0 %3120  ;;  %v3168_v24 = vsub.f32 %v9588_v45, %v3124_v16 }
 0x918   : > { %8053 = vpow2.f32 %v3187_v23  ;;  %v3167_v25 = vsub.f32 %v9584_v58, %v3121_v34 }
 0x919   : > { %v3185_v20 = vmul.f32 1.442695, %v3168_v24 }
 0x91a   : > { %v3183_v8 = vmul.f32 1.442695, %v3167_v25 }
 0x91b   : > { %v3130_v47 = vpop.xlane.xlu0 %3129 }
 0x91c   : > { %8055 = vpow2.f32 %v3183_v8  ;;  %v3170_v27 = vsub.f32 %v9596_v54, %v3130_v47 }
 0x91e   : > { %v3189_v11 = vmul.f32 1.442695, %v3170_v27 }
 0x920   : > { %8057 = vpow2.f32 %v3189_v11 }
 0x921   : > { %8059 = vpow2.f32 %v3185_v20 }
 0x922   : > { %v9690_v3 = vpop.eup %8053 }
 0x923   : > { %v3139_v28 = vpop.xlane.xlu1 %3138  ;;  %v3221_v62 = vsel %vm1070_vm1, %v9690_v3, 0.0 }
 0x924   : > { %v3173_v14 = vsub.f32 %v9602_v38, %v3139_v28  ;;  %3222 = vadd.xlane.f32.xlu1 %v3221_v62 }
 0x926   : > { %v9695_v58 = vpop.eup %8055  ;;  %v3195_v45 = vmul.f32 1.442695, %v3173_v14  ;;  %v3136_v23 = vpop.xlane.xlu0 %3135 }
 0x927   : > { %v3133_v8 = vpop.xlane.xlu1 %3132  ;;  %v3215_v47 = vsel %vm1070_vm1, %v9695_v58, 0.0  ;;  %v3172_v20 = vsub.f32 %v9612_v6, %v3136_v23 }
 0x928   : > { %8061 = vpow2.f32 %v3195_v45  ;;  %v3171_v11 = vsub.f32 %v9608_v29, %v3133_v8  ;;  %3216 = vadd.xlane.f32.xlu1 %v3215_v47 }
 0x929   : > { %v3193_v25 = vmul.f32 1.442695, %v3172_v20 }
 0x92a   : > { %v9701_v27 = vpop.eup %8057  ;;  %v3191_v24 = vmul.f32 1.442695, %v3171_v11  ;;  %v3142_v54 = vpop.xlane.xlu0 %3141 }
 0x92b   : > { %v3174_v38 = vsub.f32 %v9620_v10, %v3142_v54  ;;  %v3224_v16 = vsel %vm1070_vm1, %v9701_v27, 0.0  ;;  %v9706_v34 = vpop.eup %8059 }
 0x92c   : > { %8063 = vpow2.f32 %v3191_v24  ;;  %3225 = vadd.xlane.f32.xlu0 %v3224_v16  ;;  %v3218_v29 = vsel %vm1070_vm1, %v9706_v34, 0.0 }
 0x92d   : > { %v3197_v28 = vmul.f32 1.442695, %v3174_v38 }
 0x92f   : > { %8065 = vpow2.f32 %v3197_v28 }
 0x930   : > { %3219 = vadd.xlane.f32.xlu0 %v3218_v29  ;;  %8067 = vpow2.f32 %v3193_v25 }
 0x932   : > { %v9710_v6 = vpop.eup %8061 }
 0x933   : > { %v3151_v62 = vpop.xlane.xlu1 %3150  ;;  %v3233_v10 = vsel %vm1070_vm1, %v9710_v6, 0.0 }
 0x934   : > { %v3177_v14 = vsub.f32 %v9626_v36, %v3151_v62  ;;  %3234 = vadd.xlane.f32.xlu1 %v3233_v10 }
 0x936   : > { %v9715_v45 = vpop.eup %8063  ;;  %v3203_v23 = vmul.f32 1.442695, %v3177_v14  ;;  %v3148_v8 = vpop.xlane.xlu0 %3147 }
 0x937   : > { %v3145_v47 = vpop.xlane.xlu1 %3144  ;;  %v3227_v11 = vsel %vm1070_vm1, %v9715_v45, 0.0  ;;  %v3176_v54 = vsub.f32 %v9636_v46, %v3148_v8 }
 0x938   : > { %8069 = vpow2.f32 %v3203_v23  ;;  %v3175_v20 = vsub.f32 %v9632_v40, %v3145_v47  ;;  %3228 = vadd.xlane.f32.xlu1 %v3227_v11 }
 0x939   : > { %v9720_v24 = vpop.eup %8065  ;;  %v3201_v62 = vmul.f32 1.442695, %v3176_v54 }
 0x93a   : > { %v3199_v38 = vmul.f32 1.442695, %v3175_v20  ;;  %v3154_v16 = vpop.xlane.xlu0 %3153  ;;  %v3236_v36 = vsel %vm1070_vm1, %v9720_v24, 0.0  ;;  %v9725_v25 = vpop.eup %8067 }
 0x93b   : > { %v3178_v28 = vsub.f32 %v9644_v50, %v3154_v16  ;;  %3237 = vadd.xlane.f32.xlu0 %v3236_v36  ;;  %v3304_v29 = vpop.permute.xlu1 %3303  ;;  %v3230_v10 = vsel %vm1070_vm1, %v9725_v25, 0.0 }
 0x93c   : > { %8071 = vpow2.f32 %v3199_v38  ;;  %7306 = vmatprep.subr.bf16.mxu0 %v3304_v29 }
 0x93d   : > { %v3205_v40 = vmul.f32 1.442695, %v3178_v28  ;;  %7307 = vmatpush3.bf16.msra.mxu0 %v3304_v29 }
 0x93f   : > { %8073 = vpow2.f32 %v3205_v40  ;;  %3231 = vadd.xlane.f32.xlu0 %v3230_v10 }
 0x940   : > { %8075 = vpow2.f32 %v3201_v62 }
 0x942   : > { %v9730_v46 = vpop.eup %8069 }
 0x943   : > { %v3245_v14 = vsel %vm1070_vm1, %v9730_v46, 0.0 }
 0x944   : > { %3246 = vadd.xlane.f32.xlu1 %v3245_v14 }
 0x945   : > { %v3166_v50 = vpop.xlane.xlu0 %3165 }
 0x946   : > { %v9734_v23 = vpop.eup %8071  ;;  %v3182_v36 = vsub.f32 %v9650_v32, %v3166_v50 }
 0x947   : > { %v3239_v8 = vsel %vm1070_vm1, %v9734_v23, 0.0 }
 0x948   : > { %3240 = vadd.xlane.f32.xlu1 %v3239_v8  ;;  %v3213_v62 = vmul.f32 1.442695, %v3182_v36 }
 0x949   : > { %v9738_v47 = vpop.eup %8073  ;;  %v3160_v11 = vpop.xlane.xlu0 %3159 }
 0x94a   : > { %v3248_v20 = vsel %vm1070_vm1, %v9738_v47, 0.0  ;;  %v9742_v54 = vpop.eup %8075  ;;  %v3180_v40 = vsub.f32 %v9656_v0, %v3160_v11 }
 0x94b   : > { %3249 = vadd.xlane.f32.xlu0 %v3248_v20  ;;  %v3242_v16 = vsel %vm1070_vm1, %v9742_v54, 0.0 }
 0x94c   : > { %v3209_v20 = vmul.f32 1.442695, %v3180_v40 }
 0x94d   : > { %v3306_v38 = vpop.permute.xlu0 %3305 }
 0x94e   : > { %7308 = vmatprep.subr.bf16.mxu0 %v3306_v38 }
 0x94f   : > { %3243 = vadd.xlane.f32.xlu0 %v3242_v16  ;;  %7309 = vmatpush3.bf16.msra.mxu0 %v3306_v38 }
 0x96c   : > { %v3163_v28 = vpop.xlane.xlu1 %3162 }
 0x96d   : > { %v3181_v29 = vsub.f32 %v9668_v22, %v3163_v28 }
 0x96f   : > { %v3211_v10 = vmul.f32 1.442695, %v3181_v29 }
 0x970   : > { %v3157_v14 = vpop.xlane.xlu1 %3156 }
 0x971   : > { %8077 = vpow2.f32 %v3211_v10  ;;  %v3179_v8 = vsub.f32 %v9674_v19, %v3157_v14 }
 0x972   : > { %8079 = vpow2.f32 %v3213_v62 }
 0x973   : > { %v3207_v59 = vmul.f32 1.442695, %v3179_v8 }
 0x974   : > { %v9750_v51 = vpop.permute.xlu1 %3364 }
 0x975   : > { %8081 = vpow2.f32 %v3207_v59  ;;  %7314 = vmatprep.subr.bf16.mxu0 %v9750_v51 }
 0x976   : > { %8083 = vpow2.f32 %v3209_v20 }
 0x978   : > { %v9783_v16 = vpop.permute.xlu1 %3425 }
 0x97b   : > { %v9753_v32 = vpop.eup %8077 }
 0x97c   : > { %v3257_v22 = vsel %vm1070_vm1, %v9753_v32, 0.0  ;;  %v9757_v0 = vpop.eup %8079  ;;  %v9791_v36 = vpop.permute.xlu1 %3427 }
 0x97d   : > { %3258 = vadd.xlane.f32.xlu0 %v3257_v22  ;;  %v3260_v19 = vsel %vm1070_vm1, %v9757_v0, 0.0 }
 0x97f   : > { %v9759_v50 = vpop.eup %8081 }
 0x980   : > { %v3251_v11 = vsel %vm1070_vm1, %v9759_v50, 0.0  ;;  %v9765_v59 = vpop.eup %8083 }
 0x981   : > { %3261 = vadd.xlane.f32.xlu0 %v3260_v19  ;;  %3252 = vadd.xlane.f32.xlu1 %v3251_v11  ;;  %v3254_v38 = vsel %vm1070_vm1, %v9765_v59, 0.0 }
 0x985   : > { %3255 = vadd.xlane.f32.xlu0 %v3254_v38 }
 0x992   : > { %3488 = vrot.lane.b32.xlu1 %v8919_v30, %s8496_s21 }
 0x996   : > { %3756 = vrot.lane.b32.xlu1 %v8887_v52, %s8499_s30 }
 0x99a   : > { %3825 = vrot.lane.b32.xlu1 %v8892_v2, %s8499_s30 }
 0x99b   : > { %3754 = vrot.lane.b32.xlu0 %v8880_v39, %s8499_s30 }
 0x99e   : > { %3827 = vrot.lane.b32.xlu1 %v8897_v15, %s8499_s30 }
 0x99f   : > { %3748 = vrot.lane.b32.xlu0 %v8830_v35, %s8498_s23  ;;  %v9799_v35 = vpop.permute.xlu1 %3486 }
 0x9a2   : > { %3896 = vrot.lane.b32.xlu1 %v8902_v33, %s8499_s30 }
 0x9a3   : > { %3750 = vrot.lane.b32.xlu0 %v8838_v41, %s8498_s23 }
 0x9a6   : > { %3898 = vrot.lane.b32.xlu1 %v8907_v48, %s8499_s30 }
 0x9a7   : > { %3819 = vrot.lane.b32.xlu0 %v8844_v49, %s8498_s23  ;;  %v3367_v49 = vpop.permute.xlu0 %3366 }
 0x9aa   : > { %3967 = vrot.lane.b32.xlu1 %v8912_v4, %s8499_s30 }
 0x9ab   : > { %3821 = vrot.lane.b32.xlu0 %v8850_v57, %s8498_s23 }
 0x9ae   : > { %3969 = vrot.lane.b32.xlu1 %v11313_v37, %s8499_s30 }
 0x9af   : > { %3890 = vrot.lane.b32.xlu0 %v8856_v1, %s8498_s23 }
 0x9b1   : > { %v3223_v41 = vpop.xlane.xlu1 %3222 }
 0x9b2   : > { %3963 = vrot.lane.b32.xlu1 %v8875_v31, %s8498_s23 }
 0x9b3   : > { %3892 = vrot.lane.b32.xlu0 %v8862_v7, %s8498_s23 }
 0x9b5   : > { %v3217_v57 = vpop.xlane.xlu1 %3216 }
 0x9b6   : > { %4232 = vrot.lane.b32.xlu1 %v8884_v42, %s8498_s23 }
 0x9b7   : > { %3961 = vrot.lane.b32.xlu0 %v8868_v18, %s8498_s23 }
 0x9b9   : > { %v3226_v28 = vpop.xlane.xlu0 %3225 }
 0x9ba   : > { %4293 = vrot.lane.b32.xlu1 %v8894_v5, %s8498_s23  ;;  %8085 = vrcp.f32 %v3226_v28 }
 0x9bb   : > { %4234 = vrot.lane.b32.xlu0 %v8889_v56, %s8498_s23  ;;  %8087 = vrcp.f32 %v3217_v57 }
 0x9bc   : > { %8089 = vrcp.f32 %v3223_v41 }
 0x9bd   : > { %v3220_v1 = vpop.xlane.xlu0 %3219 }
 0x9be   : > { %8091 = vrcp.f32 %v3220_v1  ;;  %4354 = vrot.lane.b32.xlu1 %v8904_v13, %s8498_s23 }
 0x9bf   : > { %4295 = vrot.lane.b32.xlu0 %v8899_v21, %s8498_s23 }
 0x9c1   : > { %v3235_v7 = vpop.xlane.xlu1 %3234 }
 0x9c2   : > { %4356 = vrot.lane.b32.xlu1 %v8909_v53, %s8498_s23 }
 0x9c4   : > { %v8086_v18 = vpop.eup %8085 }
 0x9c5   : > { %v8088_v31 = vpop.eup %8087  ;;  %v3282_v5 = vmul.f32 %v8086_v18, %v9701_v27  ;;  %v3229_v29 = vpop.xlane.xlu1 %3228 }
 0x9c6   : > { %4415 = vrot.lane.b32.xlu1 %v8914_v9, %s8498_s23  ;;  %v8090_v42 = vpop.eup %8089  ;;  %v3279_v40 = vmul.f32 %v8088_v31, %v9695_v58 }
 0x9c7   : > { %v3281_v21 = vmul.f32 %v8090_v42, %v9690_v3 }
 0x9c8   : > { %v8092_v56 = vpop.eup %8091  ;;  %v3238_v62 = vpop.xlane.xlu0 %3237 }
 0x9c9   : > { %v3280_v10 = vmul.f32 %v8092_v56, %v9706_v34  ;;  %8093 = vrcp.f32 %v3238_v62  ;;  %v3296_v8 = vpack.c.bf16 %v3282_v5, %v3281_v21 }
 0x9ca   : > { %4417 = vrot.lane.b32.xlu1 %v8919_v30, %s8498_s23  ;;  %8095 = vrcp.f32 %v3229_v29 }
 0x9cb   : > { %v3295_v14 = vpack.c.bf16 %v3280_v10, %v3279_v40  ;;  %8097 = vrcp.f32 %v3235_v7 }
 0x9cc   : > { %v3232_v9 = vpop.xlane.xlu0 %3231 }
 0x9cd   : > { %8099 = vrcp.f32 %v3232_v9  ;;  %7310 = vmatprep.mubr.msk.bf16.mxu0 %vm1070_vm1, %v3295_v14 }
 0x9ce   : > { %7311 = vmatmul.mubr.msk.bf16.vlgmr.msra.gmra.mrb[120].mxu0 %vm1070_vm1, %v3296_v8 }
 0x9cf   : > { %7315 = vmatpush3.bf16.msra.mxu0 %v9750_v51 }
 0x9d0   : > { %7316 = vmatprep.subr.bf16.mxu0 %v3367_v49 }
 0x9d1   : > { %v3247_v58 = vpop.xlane.xlu1 %3246 }
 0x9d3   : > { %7317 = vmatpush3.bf16.msra.mxu0 %v3367_v49  ;;  %v8094_v3 = vpop.eup %8093 }
 0x9d4   : > { %7322 = vmatprep.subr.bf16.mxu0 %v9783_v16  ;;  %v8096_v27 = vpop.eup %8095  ;;  %v3286_v20 = vmul.f32 %v8094_v3, %v9720_v24 }
 0x9d5   : > { %v8098_v30 = vpop.eup %8097  ;;  %v3241_v22 = vpop.xlane.xlu1 %3240  ;;  %v3283_v11 = vmul.f32 %v8096_v27, %v9715_v45 }
 0x9d6   : > { %v3285_v41 = vmul.f32 %v8098_v30, %v9710_v6 }
 0x9d7   : > { %v8100_v34 = vpop.eup %8099 }
 0x9d8   : > { %v3250_v19 = vpop.xlane.xlu0 %3249  ;;  %v3284_v38 = vmul.f32 %v8100_v34, %v9725_v25  ;;  %v3298_v49 = vpack.c.bf16 %v3286_v20, %v3285_v41 }
 0x9d9   : > { %8101 = vrcp.f32 %v3250_v19 }
 0x9da   : > { %v3297_v51 = vpack.c.bf16 %v3284_v38, %v3283_v11  ;;  %8103 = vrcp.f32 %v3241_v22 }
 0x9db   : > { %8105 = vrcp.f32 %v3247_v58 }
 0x9dc   : > { %v3244_v57 = vpop.xlane.xlu0 %3243  ;;  %7318 = vmatprep.mubr.msk.bf16.mxu0 %vm1070_vm1, %v3297_v51 }
 0x9dd   : > { %8107 = vrcp.f32 %v3244_v57  ;;  %7319 = vmatmul.mubr.msk.bf16.vlgmr.msra.gmra.mrb[124].mxu0 %vm1070_vm1, %v3298_v49 }
 0x9de   : > { %7323 = vmatpush3.bf16.msra.mxu0 %v9783_v16 }
 0x9df   : > { %7324 = vmatprep.subr.bf16.mxu0 %v9791_v36 }
 0x9e2   : > { %7325 = vmatpush3.bf16.msra.mxu0 %v9791_v36 }
 0x9e3   : > { %7330 = vmatprep.subr.bf16.mxu0 %v9799_v35  ;;  %v8102_v6 = vpop.eup %8101 }
 0x9e4   : > { %v8104_v45 = vpop.eup %8103  ;;  %v3290_v28 = vmul.f32 %v8102_v6, %v9738_v47 }
 0x9e5   : > { %v8106_v24 = vpop.eup %8105  ;;  %v3287_v1 = vmul.f32 %v8104_v45, %v9734_v23 }
 0x9e6   : > { %v3289_v18 = vmul.f32 %v8106_v24, %v9730_v46 }
 0x9e7   : > { %v8108_v25 = vpop.eup %8107 }
 0x9e8   : > { %v3288_v7 = vmul.f32 %v8108_v25, %v9742_v54  ;;  %v3300_v16 = vpack.c.bf16 %v3290_v28, %v3289_v18 }
 0x9ea   : > { %v3299_v31 = vpack.c.bf16 %v3288_v7, %v3287_v1 }
 0x9ec   : > { %7326 = vmatprep.mubr.msk.bf16.mxu0 %vm1070_vm1, %v3299_v31 }
 0x9ed   : > { %7327 = vmatmul.mubr.msk.bf16.vlgmr.msra.gmra.mrb[128].mxu0 %vm1070_vm1, %v3300_v16 }
 0x9ee   : > { %7331 = vmatpush3.bf16.msra.mxu0 %v9799_v35 }
 0xa0a   : > { %v3259_v36 = vpop.xlane.xlu0 %3258 }
 0xa0e   : > { %v3262_v42 = vpop.xlane.xlu0 %3261  ;;  %v3253_v56 = vpop.xlane.xlu1 %3252 }
 0xa0f   : > { %8109 = vrcp.f32 %v3262_v42 }
 0xa10   : > { %8111 = vrcp.f32 %v3253_v56 }
 0xa11   : > { %8113 = vrcp.f32 %v3259_v36 }
 0xa12   : > { %v3256_v47 = vpop.xlane.xlu0 %3255  ;;  %v3489_v23 = vpop.permute.xlu1 %3488 }
 0xa13   : > { %8115 = vrcp.f32 %v3256_v47  ;;  %7332 = vmatprep.subr.bf16.mxu0 %v3489_v23 }
 0xa14   : > { %7333 = vmatpush3.bf16.msra.mxu0 %v3489_v23 }
 0xa16   : > { %v3755_v46 = vpop.permute.xlu0 %3754  ;;  %v3757_v3 = vpop.permute.xlu1 %3756 }
 0xa17   : > { %7718 = vmatprep.subr.msk.bf16.mxu0 %vm1070_vm1, %v3755_v46  ;;  %v3765_v58 = vsel %vm1070_vm1, %v3755_v46, 0 }
 0xa19   : > { %v8110_v54 = vpop.eup %8109 }
 0xa1a   : > { %v8112_v5 = vpop.eup %8111  ;;  %v3294_v35 = vmul.f32 %v8110_v54, %v9757_v0  ;;  %v3749_v8 = vpop.permute.xlu0 %3748  ;;  %v3768_v0 = vsel %vm1070_vm1, %v3757_v3, 0 }
 0xa1b   : > { %v8114_v29 = vpop.eup %8113  ;;  %v3291_v40 = vmul.f32 %v8112_v5, %v9759_v50  ;;  %v3826_v50 = vpop.permute.xlu1 %3825 }
 0xa1c   : > { %v3293_v21 = vmul.f32 %v8114_v29, %v9753_v32  ;;  %v3836_v27 = vsel %vm1070_vm1, %v3826_v50, 0 }
 0xa1d   : > { %v8116_v62 = vpop.eup %8115 }
 0xa1e   : > { %v3292_v10 = vmul.f32 %v8116_v62, %v9765_v59  ;;  %v3302_v9 = vpack.c.bf16 %v3294_v35, %v3293_v21  ;;  %v3751_v32 = vpop.permute.xlu0 %3750 }
 0xa1f   : > { %v3828_v30 = vpop.permute.xlu1 %3827 }
 0xa20   : > { %v3301_v14 = vpack.c.bf16 %v3292_v10, %v3291_v40  ;;  %v3839_v34 = vsel %vm1070_vm1, %v3828_v30, 0 }
 0xa22   : > { %7334 = vmatprep.mubr.msk.bf16.mxu0 %vm1070_vm1, %v3301_v14  ;;  %v3820_v59 = vpop.permute.xlu0 %3819 }
 0xa23   : > { %7335 = vmatmul.mubr.msk.bf16.vlgmr.msra.gmra.mrb[132].mxu0 %vm1070_vm1, %v3302_v9  ;;  %v3897_v20 = vpop.permute.xlu1 %3896 }
 0xa24   : > { %7339 = vmatpush3.bf16.xpose.msra.mxu0 %v3765_v58  ;;  %7342 = vmatprep.mubr.msk.bf16.mxu0 %vm1070_vm1, %v3749_v8  ;;  %v3907_v11 = vsel %vm1070_vm1, %v3897_v20, 0 }
 0xa25   : > { %7719 = vmatprep.subr.msk.bf16.mxu0 %vm1070_vm1, %v3757_v3 }
 0xa26   : > { %v3822_v22 = vpop.permute.xlu0 %3821 }
 0xa27   : > { %v3899_v38 = vpop.permute.xlu1 %3898 }
 0xa28   : > { %v3910_v51 = vsel %vm1070_vm1, %v3899_v38, 0 }
 0xa2a   : > { %v3891_v19 = vpop.permute.xlu0 %3890 }
 0xa2b   : > { %v3968_v41 = vpop.permute.xlu1 %3967 }
 0xa2c   : > { %7341 = vmatpush3.bf16.xpose.msra.mxu0 %v3768_v0  ;;  %v3978_v45 = vsel %vm1070_vm1, %v3968_v41, 0 }
 0xa2d   : > { %7720 = vmatprep.subr.msk.bf16.mxu0 %vm1070_vm1, %v3826_v50 }
 0xa2e   : > { %v3893_v49 = vpop.permute.xlu0 %3892 }
 0xa2f   : > { %v3970_v57 = vpop.permute.xlu1 %3969 }
 0xa30   : > { %v3981_v25 = vsel %vm1070_vm1, %v3970_v57, 0 }
 0xa32   : > { %v3962_v6 = vpop.permute.xlu0 %3961 }
 0xa33   : > { %7343 = vmatmul.mubr.msk.bf16.vlgmr.msra.gmra.mrb[136].mxu0 %vm1070_vm1, %v3751_v32  ;;  %v3964_v24 = vpop.permute.xlu1 %3963 }
 0xa34   : > { %7347 = vmatpush3.bf16.xpose.msra.mxu0 %v3836_v27  ;;  %7350 = vmatprep.mubr.msk.bf16.mxu0 %vm1070_vm1, %v3820_v59 }
 0xa35   : > { %7721 = vmatprep.subr.msk.bf16.mxu0 %vm1070_vm1, %v3828_v30 }
 0xa36   : > { %v4235_v1 = vpop.permute.xlu0 %4234 }
 0xa37   : > { %v4233_v28 = vpop.permute.xlu1 %4232 }
 0xa3b   : > { %v9880_v7 = vpop.permute.xlu1 %4293 }
 0xa3c   : > { %7349 = vmatpush3.bf16.xpose.msra.mxu0 %v3839_v34 }
 0xa3d   : > { %7722 = vmatprep.subr.msk.bf16.mxu0 %vm1070_vm1, %v3897_v20 }
 0xa43   : > { %7351 = vmatmul.mubr.msk.bf16.vlgmr.msra.gmra.mrb[140].mxu0 %vm1070_vm1, %v3822_v22 }
 0xa44   : > { %7355 = vmatpush3.bf16.xpose.msra.mxu0 %v3907_v11  ;;  %7358 = vmatprep.mubr.msk.bf16.mxu0 %vm1070_vm1, %v3891_v19 }
 0xa45   : > { %7723 = vmatprep.subr.msk.bf16.mxu0 %vm1070_vm1, %v3899_v38 }
 0xa4c   : > { %7357 = vmatpush3.bf16.xpose.msra.mxu0 %v3910_v51 }
 0xa4d   : > { %7724 = vmatprep.subr.msk.bf16.mxu0 %vm1070_vm1, %v3968_v41 }
 0xa53   : > { %7359 = vmatmul.mubr.msk.bf16.vlgmr.msra.gmra.mrb[144].mxu0 %vm1070_vm1, %v3893_v49 }
 0xa54   : > { %7363 = vmatpush3.bf16.xpose.msra.mxu0 %v3978_v45  ;;  %7366 = vmatprep.mubr.msk.bf16.mxu0 %vm1070_vm1, %v3962_v6 }
 0xa55   : > { %7725 = vmatprep.subr.msk.bf16.mxu0 %vm1070_vm1, %v3970_v57 }
 0xa5c   : > { %7365 = vmatpush3.bf16.xpose.msra.mxu0 %v3981_v25 }
 0xa5d   : > { %7370 = vmatprep.subr.bf16.mxu0 %v4233_v28 }
 0xa63   : > { %7367 = vmatmul.mubr.msk.bf16.vlgmr.msra.gmra.mrb[148].mxu0 %vm1070_vm1, %v3964_v24 }
 0xa64   : > { %7371 = vmatpush3.bf16.msra.mxu0 %v4233_v28 }
 0xa65   : > { %7372 = vmatprep.subr.bf16.mxu0 %v4235_v1 }
 0xa68   : > { %7373 = vmatpush3.bf16.msra.mxu0 %v4235_v1 }
 0xa69   : > { %7378 = vmatprep.subr.bf16.mxu0 %v9880_v7 }
 0xaa1   : > { %v9883_v18 = vpop.f32.mrb[120].mxu0 }
 0xaa2   : > { %v9885_v31 = vpop.f32.mrb[121].mxu0 }
 0xaa3   : > { %v9887_v16 = vpop.f32.mrb[122].mxu0 }
 0xaa4   : > { %v9891_v42 = vpop.f32.mrb[123].mxu0 }
 0xab0   : > { %v9895_v47 = vpop.f32.mrb[124].mxu0 }
 0xab1   : > { %11334 = vst [vmem:[#allocation64_spill] sm:$0xff] %v9895_v47  ;;  %v9897_v23 = vpop.f32.mrb[125].mxu0 }
 0xab2   : > { %v9899_v46 = vpop.f32.mrb[126].mxu0 }
 0xab3   : > { %v9903_v5 = vpop.f32.mrb[127].mxu0 }
 0xac0   : > { %v9907_v62 = vpop.f32.mrb[128].mxu0 }
 0xac1   : > { %11335 = vst [vmem:[#allocation65_spill] sm:$0xff] %v9907_v62  ;;  %v9909_v35 = vpop.f32.mrb[129].mxu0 }
 0xac2   : > { %11336 = vst [vmem:[#allocation66_spill] sm:$0xff] %v9909_v35  ;;  %v9911_v40 = vpop.f32.mrb[130].mxu0 }
 0xac3   : > { %11337 = vst [vmem:[#allocation67_spill] sm:$0xff] %v9911_v40  ;;  %v9915_v21 = vpop.f32.mrb[131].mxu0 }
 0xac4   : > { %11338 = vst [vmem:[#allocation68_spill] sm:$0xff] %v9915_v21 }
 0xaf6   : > { %v9919_v9 = vpop.f32.mrb[132].mxu0 }
 0xaf7   : > { %11339 = vst [vmem:[#allocation69_spill] sm:$0xff] %v9919_v9  ;;  %v9921_v8 = vpop.f32.mrb[133].mxu0 }
 0xaf8   : > { %11340 = vst [vmem:[#allocation70_spill] sm:$0xff] %v9921_v8  ;;  %v9923_v58 = vpop.f32.mrb[134].mxu0 }
 0xaf9   : > { %11341 = vst [vmem:[#allocation71_spill] sm:$0xff] %v9923_v58  ;;  %v9927_v0 = vpop.f32.mrb[135].mxu0 }
 0xafa   : > { %11342 = vst [vmem:[#allocation72_spill] sm:$0xff] %v9927_v0 }
 0xb06   : > { %v7344_v32 = vpop.f32.mrb[136].mxu0 }
 0xb07   : > { %v9933_v59 = vsel %vm8990_vm2, %v7344_v32, -1e+30  ;;  %v3804_v27 = vpop.f32.mrb[137].mxu0 }
 0xb08   : > { %v4054_v30 = vsel %vm1070_vm1, %v9933_v59, -inf  ;;  %v7345_v34 = vpop.f32.mrb[138].mxu0  ;;  %v9939_v20 = vsel %vm8995_vm3, %v3804_v27, -1e+30 }
 0xb09   : > { %4055 = vmax.xlane.f32.xlu0 %v4054_v30  ;;  %v3807_v22 = vpop.f32.mrb[139].mxu0  ;;  %v4048_v38 = vsel %vm1070_vm1, %v9939_v20, -inf  ;;  %v9951_v41 = vsel %vm9014_vm5, %v7345_v34, -1e+30 }
 0xb0a   : > { %v9943_v19 = vsel %vm9004_vm4, %v3807_v22, -1e+30  ;;  %v4057_v51 = vsel %vm1070_vm1, %v9951_v41, -inf }
 0xb0b   : > { %v4051_v11 = vsel %vm1070_vm1, %v9943_v19, -inf }
 0xb0c   : > { %4052 = vmax.xlane.f32.xlu1 %v4051_v11 }
 0xb0d   : > { %4049 = vmax.xlane.f32.xlu0 %v4048_v38 }
 0xb11   : > { %4058 = vmax.xlane.f32.xlu0 %v4057_v51 }
 0xb16   : > { %v7352_v49 = vpop.f32.mrb[140].mxu0 }
 0xb17   : > { %v9957_v57 = vsel %vm8990_vm2, %v7352_v49, -1e+30  ;;  %v3875_v6 = vpop.f32.mrb[141].mxu0 }
 0xb18   : > { %v4066_v45 = vsel %vm1070_vm1, %v9957_v57, -inf  ;;  %v7353_v24 = vpop.f32.mrb[142].mxu0  ;;  %v9963_v25 = vsel %vm8995_vm3, %v3875_v6, -1e+30 }
 0xb19   : > { %v9967_v28 = vsel %vm9014_vm5, %v7353_v24, -1e+30  ;;  %4067 = vmax.xlane.f32.xlu1 %v4066_v45  ;;  %v3878_v1 = vpop.f32.mrb[143].mxu0  ;;  %v4060_v30 = vsel %vm1070_vm1, %v9963_v25, -inf }
 0xb1a   : > { %v4069_v32 = vsel %vm1070_vm1, %v9967_v28, -inf  ;;  %v9973_v27 = vsel %vm9004_vm4, %v3878_v1, -1e+30 }
 0xb1b   : > { %4070 = vmax.xlane.f32.xlu0 %v4069_v32  ;;  %v4063_v34 = vsel %vm1070_vm1, %v9973_v27, -inf }
 0xb1d   : > { %4061 = vmax.xlane.f32.xlu1 %v4060_v30 }
 0xb1f   : > { %4064 = vmax.xlane.f32.xlu0 %v4063_v34 }
 0xb26   : > { %v7360_v22 = vpop.f32.mrb[144].mxu0 }
 0xb27   : > { %v9981_v11 = vsel %vm8990_vm2, %v7360_v22, -1e+30  ;;  %v3946_v38 = vpop.f32.mrb[145].mxu0 }
 0xb28   : > { %v4078_v51 = vsel %vm1070_vm1, %v9981_v11, -inf  ;;  %v7361_v49 = vpop.f32.mrb[146].mxu0  ;;  %v9987_v6 = vsel %vm8995_vm3, %v3946_v38, -1e+30 }
 0xb29   : > { %v9991_v45 = vsel %vm9014_vm5, %v7361_v49, -1e+30  ;;  %4079 = vmax.xlane.f32.xlu1 %v4078_v51  ;;  %v3949_v24 = vpop.f32.mrb[147].mxu0  ;;  %v4072_v30 = vsel %vm1070_vm1, %v9987_v6, -inf }
 0xb2a   : > { %v4081_v1 = vsel %vm1070_vm1, %v9991_v45, -inf  ;;  %v9997_v32 = vsel %vm9004_vm4, %v3949_v24, -1e+30 }
 0xb2b   : > { %4082 = vmax.xlane.f32.xlu0 %v4081_v1  ;;  %v4075_v34 = vsel %vm1070_vm1, %v9997_v32, -inf }
 0xb2d   : > { %4073 = vmax.xlane.f32.xlu1 %v4072_v30 }
 0xb2f   : > { %4076 = vmax.xlane.f32.xlu0 %v4075_v34 }
 0xb36   : > { %v7368_v22 = vpop.f32.mrb[148].mxu0 }
 0xb37   : > { %v10005_v38 = vsel %vm8990_vm2, %v7368_v22, -1e+30  ;;  %v4017_v51 = vpop.f32.mrb[149].mxu0 }
 0xb38   : > { %v4090_v49 = vsel %vm1070_vm1, %v10005_v38, -inf  ;;  %v7369_v24 = vpop.f32.mrb[150].mxu0  ;;  %v10011_v1 = vsel %vm8995_vm3, %v4017_v51, -1e+30 }
 0xb39   : > { %v10015_v30 = vsel %vm9014_vm5, %v7369_v24, -1e+30  ;;  %4091 = vmax.xlane.f32.xlu1 %v4090_v49  ;;  %v4020_v34 = vpop.f32.mrb[151].mxu0  ;;  %v4084_v50 = vsel %vm1070_vm1, %v10011_v1, -inf  ;;  %v10031_v49 = vpop.permute.xlu1 %4354 }
 0xb3a   : > { %v4093_v3 = vsel %vm1070_vm1, %v10015_v30, -inf  ;;  %v10021_v22 = vsel %vm9004_vm4, %v4020_v34, -1e+30 }
 0xb3b   : > { %4094 = vmax.xlane.f32.xlu0 %v4093_v3  ;;  %v4087_v51 = vsel %vm1070_vm1, %v10021_v22, -inf  ;;  %v10037_v3 = vpop.permute.xlu0 %4295 }
 0xb3d   : > { %4085 = vmax.xlane.f32.xlu1 %v4084_v50  ;;  %v10033_v24 = vpop.permute.xlu1 %4356 }
 0xb3f   : > { %4088 = vmax.xlane.f32.xlu0 %v4087_v51 }
 0xb41   : > { %v10035_v34 = vpop.permute.xlu1 %4415 }
 0xb45   : > { %v10039_v10 = vpop.permute.xlu1 %4417 }
 0xb4e   : > { %4687 = vrot.lane.b32.xlu1 %v8887_v52, %s8496_s21 }
 0xb55   : > { %4685 = vrot.lane.b32.xlu0 %v8880_v39, %s8496_s21 }
 0xb96   : > { %v4056_v50 = vpop.xlane.xlu0 %4055 }
 0xb97   : > { %v4098_v14 = vsub.f32 %v9933_v59, %v4056_v50 }
 0xb99   : > { %v4116_v51 = vmul.f32 1.442695, %v4098_v14  ;;  %v4053_v54 = vpop.xlane.xlu1 %4052 }
 0xb9a   : > { %v4050_v29 = vpop.xlane.xlu0 %4049  ;;  %v4097_v56 = vsub.f32 %v9943_v19, %v4053_v54 }
 0xb9b   : > { %8117 = vpow2.f32 %v4116_v51  ;;  %v4096_v36 = vsub.f32 %v9939_v20, %v4050_v29 }
 0xb9c   : > { %v4114_v0 = vmul.f32 1.442695, %v4097_v56 }
 0xb9d   : > { %v4112_v9 = vmul.f32 1.442695, %v4096_v36 }
 0xb9e   : > { %v4059_v58 = vpop.xlane.xlu0 %4058 }
 0xb9f   : > { %8119 = vpow2.f32 %v4112_v9  ;;  %v4099_v8 = vsub.f32 %v9951_v41, %v4059_v58 }
 0xba1   : > { %v4118_v62 = vmul.f32 1.442695, %v4099_v8 }
 0xba3   : > { %8121 = vpow2.f32 %v4118_v62 }
 0xba4   : > { %8123 = vpow2.f32 %v4114_v0 }
 0xba5   : > { %v10045_v40 = vpop.eup %8117 }
 0xba6   : > { %v4068_v59 = vpop.xlane.xlu1 %4067  ;;  %v4150_v14 = vsel %vm1070_vm1, %v10045_v40, 0.0 }
 0xba7   : > { %v4102_v50 = vsub.f32 %v9957_v57, %v4068_v59  ;;  %4151 = vadd.xlane.f32.xlu1 %v4150_v14 }
 0xba8   : > { %v4071_v29 = vpop.xlane.xlu0 %4070 }
 0xba9   : > { %v10050_v54 = vpop.eup %8119  ;;  %v4124_v36 = vmul.f32 1.442695, %v4102_v50  ;;  %v4103_v9 = vsub.f32 %v9967_v28, %v4071_v29 }
 0xbaa   : > { %v4062_v58 = vpop.xlane.xlu1 %4061  ;;  %v4144_v56 = vsel %vm1070_vm1, %v10050_v54, 0.0 }
 0xbab   : > { %8125 = vpow2.f32 %v4124_v36  ;;  %v4126_v62 = vmul.f32 1.442695, %v4103_v9  ;;  %v4100_v8 = vsub.f32 %v9963_v25, %v4062_v58  ;;  %4145 = vadd.xlane.f32.xlu1 %v4144_v56 }
 0xbac   : > { %v4065_v0 = vpop.xlane.xlu0 %4064 }
 0xbad   : > { %v10056_v20 = vpop.eup %8121  ;;  %8127 = vpow2.f32 %v4126_v62  ;;  %v4120_v19 = vmul.f32 1.442695, %v4100_v8  ;;  %v4101_v41 = vsub.f32 %v9973_v27, %v4065_v0 }
 0xbae   : > { %v4153_v57 = vsel %vm1070_vm1, %v10056_v20, 0.0  ;;  %v10061_v28 = vpop.eup %8123 }
 0xbaf   : > { %8129 = vpow2.f32 %v4120_v19  ;;  %v4122_v51 = vmul.f32 1.442695, %v4101_v41  ;;  %4154 = vadd.xlane.f32.xlu0 %v4153_v57  ;;  %v4147_v25 = vsel %vm1070_vm1, %v10061_v28, 0.0 }
 0xbb1   : > { %8131 = vpow2.f32 %v4122_v51 }
 0xbb3   : > { %4148 = vadd.xlane.f32.xlu0 %v4147_v25 }
 0xbb5   : > { %v10065_v59 = vpop.eup %8125 }
 0xbb6   : > { %v4080_v14 = vpop.xlane.xlu1 %4079  ;;  %v4162_v50 = vsel %vm1070_vm1, %v10065_v59, 0.0 }
 0xbb7   : > { %v10069_v27 = vpop.eup %8127  ;;  %v4106_v29 = vsub.f32 %v9981_v11, %v4080_v14  ;;  %4163 = vadd.xlane.f32.xlu1 %v4162_v50 }
 0xbb8   : > { %v4083_v36 = vpop.xlane.xlu0 %4082  ;;  %v4165_v9 = vsel %vm1070_vm1, %v10069_v27, 0.0 }
 0xbb9   : > { %v10074_v58 = vpop.eup %8129  ;;  %v4132_v56 = vmul.f32 1.442695, %v4106_v29  ;;  %v4107_v62 = vsub.f32 %v9991_v45, %v4083_v36  ;;  %4166 = vadd.xlane.f32.xlu0 %v4165_v9 }
 0xbba   : > { %v4074_v8 = vpop.xlane.xlu1 %4073  ;;  %v4156_v0 = vsel %vm1070_vm1, %v10074_v58, 0.0 }
 0xbbb   : > { %v10079_v19 = vpop.eup %8131  ;;  %8133 = vpow2.f32 %v4132_v56  ;;  %v4134_v41 = vmul.f32 1.442695, %v4107_v62  ;;  %v4104_v11 = vsub.f32 %v9987_v6, %v4074_v8  ;;  %4157 = vadd.xlane.f32.xlu1 %v4156_v0 }
 0xbbc   : > { %v4077_v57 = vpop.xlane.xlu0 %4076  ;;  %v4159_v51 = vsel %vm1070_vm1, %v10079_v19, 0.0 }
 0xbbd   : > { %8135 = vpow2.f32 %v4134_v41  ;;  %v4128_v25 = vmul.f32 1.442695, %v4104_v11  ;;  %v4105_v45 = vsub.f32 %v9997_v32, %v4077_v57  ;;  %4160 = vadd.xlane.f32.xlu0 %v4159_v51 }
 0xbbf   : > { %8137 = vpow2.f32 %v4128_v25  ;;  %v4130_v14 = vmul.f32 1.442695, %v4105_v45 }
 0xbc1   : > { %8139 = vpow2.f32 %v4130_v14 }
 0xbc5   : > { %v10085_v50 = vpop.eup %8133 }
 0xbc6   : > { %v4092_v29 = vpop.xlane.xlu1 %4091  ;;  %v4174_v36 = vsel %vm1070_vm1, %v10085_v50, 0.0 }
 0xbc7   : > { %v10089_v6 = vpop.eup %8135  ;;  %v4110_v9 = vsub.f32 %v10005_v38, %v4092_v29  ;;  %4175 = vadd.xlane.f32.xlu1 %v4174_v36 }
 0xbc8   : > { %v4095_v56 = vpop.xlane.xlu0 %4094  ;;  %v4177_v62 = vsel %vm1070_vm1, %v10089_v6, 0.0 }
 0xbc9   : > { %v10094_v32 = vpop.eup %8137  ;;  %v4140_v8 = vmul.f32 1.442695, %v4110_v9  ;;  %v4111_v0 = vsub.f32 %v10015_v30, %v4095_v56  ;;  %4178 = vadd.xlane.f32.xlu0 %v4177_v62 }
 0xbca   : > { %v4086_v41 = vpop.xlane.xlu1 %4085  ;;  %v4168_v11 = vsel %vm1070_vm1, %v10094_v32, 0.0 }
 0xbcb   : > { %v10099_v57 = vpop.eup %8139  ;;  %8141 = vpow2.f32 %v4140_v8  ;;  %v4142_v51 = vmul.f32 1.442695, %v4111_v0  ;;  %v4108_v38 = vsub.f32 %v10011_v1, %v4086_v41  ;;  %4169 = vadd.xlane.f32.xlu1 %v4168_v11  ;;  %v10128_v41 = vsel %vm9004_vm4, %v9456_v61, -1e+30 }
 0xbcc   : > { %v4089_v25 = vpop.xlane.xlu0 %4088  ;;  %v4171_v45 = vsel %vm1070_vm1, %v10099_v57, 0.0  ;;  %v2100_v11 = vsel %vm1070_vm1, %v10128_v41, -inf }
 0xbcd   : > { %8143 = vpow2.f32 %v4142_v51  ;;  %v4136_v14 = vmul.f32 1.442695, %v4108_v38  ;;  %v4109_v30 = vsub.f32 %v10021_v22, %v4089_v25  ;;  %4172 = vadd.xlane.f32.xlu0 %v4171_v45  ;;  %v10135_v51 = vsel %vm8995_vm3, %v9452_v60, -1e+30 }
 0xbce   : > { %v2097_v38 = vsel %vm1070_vm1, %v10135_v51, -inf  ;;  %v10142_v25 = vsel %vm8990_vm2, %v9450_v55, -1e+30  ;;  %v10149_v45 = vsel %vm9014_vm5, %v9454_v17, -1e+30  ;;  %v10159_v55 = vpop.permute.xlu1 %4687 }
 0xbcf   : > { %8145 = vpow2.f32 %v4136_v14  ;;  %v4138_v29 = vmul.f32 1.442695, %v4109_v30  ;;  %v2103_v61 = vsel %vm1070_vm1, %v10142_v25, -inf  ;;  %v2106_v60 = vsel %vm1070_vm1, %v10149_v45, -inf }
 0xbd0   : > { %v10163_v14 = vpop.permute.xlu0 %4685 }
 0xbd1   : > { %8147 = vpow2.f32 %v4138_v29 }
 0xbd5   : > { %v10105_v36 = vpop.eup %8141 }
 0xbd6   : > { %v4186_v9 = vsel %vm1070_vm1, %v10105_v36, 0.0 }
 0xbd7   : > { %v10109_v56 = vpop.eup %8143  ;;  %4187 = vadd.xlane.f32.xlu0 %v4186_v9 }
 0xbd8   : > { %v4189_v62 = vsel %vm1070_vm1, %v10109_v56, 0.0 }
 0xbd9   : > { %v10111_v1 = vpop.eup %8145 }
 0xbda   : > { %v4180_v22 = vsel %vm1070_vm1, %v10111_v1, 0.0 }
 0xbdb   : > { %v10117_v8 = vpop.eup %8147  ;;  %4190 = vadd.xlane.f32.xlu0 %v4189_v62  ;;  %4181 = vadd.xlane.f32.xlu1 %v4180_v22 }
 0xbdc   : > { %v4183_v0 = vsel %vm1070_vm1, %v10117_v8, 0.0 }
 0xbdf   : > { %4184 = vadd.xlane.f32.xlu0 %v4183_v0 }
 0xbec   : > { %4752 = vrot.lane.b32.xlu1 %v8897_v15, %s8496_s21 }
 0xbf5   : > { %4750 = vrot.lane.b32.xlu0 %v8892_v2, %s8496_s21 }
 0xc10   : > { %2101 = vmax.xlane.f32.xlu1 %v2100_v11 }
 0xc14   : > { %2098 = vmax.xlane.f32.xlu0 %v2097_v38 }
 0xc18   : > { %2104 = vmax.xlane.f32.xlu0 %v2103_v61 }
 0xc1c   : > { %2107 = vmax.xlane.f32.xlu0 %v2106_v60 }
 0xc21   : > { %4815 = vrot.lane.b32.xlu1 %v8902_v33, %s8496_s21 }
 0xc25   : > { %4880 = vrot.lane.b32.xlu1 %v8912_v4, %s8496_s21 }
 0xc29   : > { %4882 = vrot.lane.b32.xlu1 %v11313_v37, %s8496_s21 }
 0xc32   : > { %4817 = vrot.lane.b32.xlu0 %v8907_v48, %s8496_s21 }
 0xc34   : > { %v4152_v17 = vpop.xlane.xlu1 %4151 }
 0xc38   : > { %v4146_v30 = vpop.xlane.xlu1 %4145 }
 0xc3c   : > { %v4155_v29 = vpop.xlane.xlu0 %4154 }
 0xc3d   : > { %8149 = vrcp.f32 %v4155_v29 }
 0xc3e   : > { %8151 = vrcp.f32 %v4146_v30 }
 0xc3f   : > { %8153 = vrcp.f32 %v4152_v17 }
 0xc40   : > { %v4149_v9 = vpop.xlane.xlu0 %4148 }
 0xc41   : > { %8155 = vrcp.f32 %v4149_v9 }
 0xc44   : > { %v4164_v62 = vpop.xlane.xlu1 %4163 }
 0xc46   : > { %v4167_v22 = vpop.xlane.xlu0 %4166 }
 0xc47   : > { %v8150_v0 = vpop.eup %8149  ;;  %8157 = vrcp.f32 %v4167_v22 }
 0xc48   : > { %v4158_v11 = vpop.xlane.xlu1 %4157  ;;  %v8152_v38 = vpop.eup %8151  ;;  %v4211_v21 = vmul.f32 %v8150_v0, %v10056_v20 }
 0xc49   : > { %8159 = vrcp.f32 %v4158_v11  ;;  %v8154_v61 = vpop.eup %8153  ;;  %v4208_v29 = vmul.f32 %v8152_v38, %v10050_v54 }
 0xc4a   : > { %8161 = vrcp.f32 %v4164_v62  ;;  %v4161_v60 = vpop.xlane.xlu0 %4160  ;;  %v4210_v30 = vmul.f32 %v8154_v61, %v10045_v40 }
 0xc4b   : > { %v8156_v35 = vpop.eup %8155  ;;  %8163 = vrcp.f32 %v4161_v60 }
 0xc4c   : > { %v4209_v17 = vmul.f32 %v8156_v35, %v10061_v28  ;;  %v4225_v47 = vpack.c.bf16 %v4211_v21, %v4210_v30 }
 0xc4e   : > { %v4224_v9 = vpack.c.bf16 %v4209_v17, %v4208_v29 }
 0xc50   : > { %7374 = vmatprep.mubr.msk.bf16.mxu0 %vm1070_vm1, %v4224_v9 }
 0xc51   : > { %7375 = vmatmul.mubr.msk.bf16.vlgmr.msra.gmra.mrb[152].mxu0 %vm1070_vm1, %v4225_v47  ;;  %v8158_v22 = vpop.eup %8157 }
 0xc52   : > { %7379 = vmatpush3.bf16.msra.mxu0 %v9880_v7  ;;  %v4215_v54 = vmul.f32 %v8158_v22, %v10069_v27 }
 0xc53   : > { %v8160_v62 = vpop.eup %8159  ;;  %7380 = vmatprep.subr.bf16.mxu0 %v10037_v3 }
 0xc54   : > { %v8162_v20 = vpop.eup %8161  ;;  %v4176_v0 = vpop.xlane.xlu1 %4175  ;;  %v4212_v40 = vmul.f32 %v8160_v62, %v10074_v58 }
 0xc55   : > { %v8164_v11 = vpop.eup %8163  ;;  %v4214_v47 = vmul.f32 %v8162_v20, %v10065_v59 }
 0xc56   : > { %7381 = vmatpush3.bf16.msra.mxu0 %v10037_v3  ;;  %v4179_v35 = vpop.xlane.xlu0 %4178  ;;  %v4213_v21 = vmul.f32 %v8164_v11, %v10079_v19 }
 0xc57   : > { %7386 = vmatprep.subr.bf16.mxu0 %v10031_v49  ;;  %8165 = vrcp.f32 %v4179_v35  ;;  %v4227_v38 = vpack.c.bf16 %v4215_v54, %v4214_v47 }
 0xc58   : > { %v4170_v7 = vpop.xlane.xlu1 %4169  ;;  %v4226_v28 = vpack.c.bf16 %v4213_v21, %v4212_v40  ;;  %v11343_v40 = vld [vmem:[#allocation12_spill] sm:$0xff] }
 0xc59   : > { %8167 = vrcp.f32 %v4170_v7  ;;  %v11346_v7 = vld [vmem:[#allocation15_spill] sm:$0xff] }
 0xc5a   : > { %8169 = vrcp.f32 %v4176_v0  ;;  %v4173_v61 = vpop.xlane.xlu0 %4172  ;;  %7382 = vmatprep.mubr.msk.bf16.mxu0 %vm1070_vm1, %v4226_v28 }
 0xc5b   : > { %8171 = vrcp.f32 %v4173_v61  ;;  %7383 = vmatmul.mubr.msk.bf16.vlgmr.msra.gmra.mrb[156].mxu0 %vm1070_vm1, %v4227_v38 }
 0xc5c   : > { %7387 = vmatpush3.bf16.msra.mxu0 %v10031_v49 }
 0xc5d   : > { %7388 = vmatprep.subr.bf16.mxu0 %v10033_v24 }
 0xc60   : > { %7389 = vmatpush3.bf16.msra.mxu0 %v10033_v24 }
 0xc61   : > { %7394 = vmatprep.subr.bf16.mxu0 %v10035_v34  ;;  %v8166_v3 = vpop.eup %8165 }
 0xc62   : > { %v4219_v60 = vmul.f32 %v8166_v3, %v10089_v6 }
 0xc63   : > { %v8168_v59 = vpop.eup %8167 }
 0xc64   : > { %v8170_v27 = vpop.eup %8169  ;;  %v4188_v58 = vpop.xlane.xlu0 %4187  ;;  %v4216_v29 = vmul.f32 %v8168_v59, %v10094_v32 }
 0xc65   : > { %v8172_v19 = vpop.eup %8171  ;;  %v4218_v30 = vmul.f32 %v8170_v27, %v10085_v50 }
 0xc66   : > { %v4217_v17 = vmul.f32 %v8172_v19, %v10099_v57 }
 0xc67   : > { %v4229_v62 = vpack.c.bf16 %v4219_v60, %v4218_v30 }
 0xc68   : > { %v4191_v49 = vpop.xlane.xlu0 %4190  ;;  %v4182_v9 = vpop.xlane.xlu1 %4181  ;;  %v4228_v22 = vpack.c.bf16 %v4217_v17, %v4216_v29 }
 0xc69   : > { %8173 = vrcp.f32 %v4191_v49 }
 0xc6a   : > { %7390 = vmatprep.mubr.msk.bf16.mxu0 %vm1070_vm1, %v4228_v22  ;;  %8175 = vrcp.f32 %v4182_v9 }
 0xc6b   : > { %7391 = vmatmul.mubr.msk.bf16.vlgmr.msra.gmra.mrb[160].mxu0 %vm1070_vm1, %v4229_v62  ;;  %8177 = vrcp.f32 %v4188_v58 }
 0xc6c   : > { %7395 = vmatpush3.bf16.msra.mxu0 %v10035_v34  ;;  %v4185_v24 = vpop.xlane.xlu0 %4184 }
 0xc6d   : > { %8179 = vrcp.f32 %v4185_v24  ;;  %7396 = vmatprep.subr.bf16.mxu0 %v10039_v10 }
 0xc70   : > { %7397 = vmatpush3.bf16.msra.mxu0 %v10039_v10  ;;  %v4696_v10 = vsel %vm1070_vm1, %v10163_v14, 0 }
 0xc71   : > { %7726 = vmatprep.subr.msk.bf16.mxu0 %vm1070_vm1, %v10163_v14  ;;  %v11344_v14 = vld [vmem:[#allocation13_spill] sm:$0xff] }
 0xc73   : > { %v8174_v50 = vpop.eup %8173 }
 0xc74   : > { %v8176_v6 = vpop.eup %8175  ;;  %v4223_v20 = vmul.f32 %v8174_v50, %v10109_v56  ;;  %v4699_v56 = vsel %vm1070_vm1, %v10159_v55, 0 }
 0xc75   : > { %v8178_v32 = vpop.eup %8177  ;;  %v4220_v0 = vmul.f32 %v8176_v6, %v10111_v1 }
 0xc76   : > { %v4222_v34 = vmul.f32 %v8178_v32, %v10105_v36  ;;  %v4751_v36 = vpop.permute.xlu0 %4750  ;;  %v11347_v32 = vld [vmem:[#allocation16_spill] sm:$0xff] }
 0xc77   : > { %v8180_v57 = vpop.eup %8179  ;;  %v4761_v1 = vsel %vm1070_vm1, %v4751_v36, 0 }
 0xc78   : > { %v4221_v11 = vmul.f32 %v8180_v57, %v10117_v8  ;;  %v4231_v35 = vpack.c.bf16 %v4223_v20, %v4222_v34  ;;  %v4753_v8 = vpop.permute.xlu1 %4752  ;;  %v11348_v20 = vld [vmem:[#allocation17_spill] sm:$0xff] }
 0xc79   : > { %v4764_v21 = vsel %vm1070_vm1, %v4753_v8, 0 }
 0xc7a   : > { %v4230_v54 = vpack.c.bf16 %v4221_v11, %v4220_v0 }
 0xc7c   : > { %7398 = vmatprep.mubr.msk.bf16.mxu0 %vm1070_vm1, %v4230_v54  ;;  %v11349_v54 = vld [vmem:[#allocation23_spill] sm:$0xff] }
 0xc7d   : > { %7399 = vmatmul.mubr.msk.bf16.vlgmr.msra.gmra.mrb[164].mxu0 %vm1070_vm1, %v4231_v35  ;;  %v11350_v35 = vld [vmem:[#allocation18_spill] sm:$0xff] }
 0xc7e   : > { %7403 = vmatpush3.bf16.xpose.msra.mxu0 %v4696_v10  ;;  %7406 = vmatprep.mubr.msk.bf16.mxu0 %vm1070_vm1, %v11343_v40  ;;  %v11351_v10 = vld [vmem:[#allocation24_spill] sm:$0xff] }
 0xc7f   : > { %7727 = vmatprep.subr.msk.bf16.mxu0 %vm1070_vm1, %v10159_v55  ;;  %v11345_v55 = vld [vmem:[#allocation14_spill] sm:$0xff] }
 0xc86   : > { %7405 = vmatpush3.bf16.xpose.msra.mxu0 %v4699_v56  ;;  %v11352_v56 = vld [vmem:[#allocation27_spill] sm:$0xff] }
 0xc87   : > { %7728 = vmatprep.subr.msk.bf16.mxu0 %vm1070_vm1, %v4751_v36 }
 0xc8d   : > { %7407 = vmatmul.mubr.msk.bf16.vlgmr.msra.gmra.mrb[168].mxu0 %vm1070_vm1, %v8840_v43 }
 0xc8e   : > { %7411 = vmatpush3.bf16.xpose.msra.mxu0 %v4761_v1  ;;  %7414 = vmatprep.mubr.msk.bf16.mxu0 %vm1070_vm1, %v11344_v14 }
 0xc8f   : > { %7729 = vmatprep.subr.msk.bf16.mxu0 %vm1070_vm1, %v4753_v8 }
 0xc96   : > { %7413 = vmatpush3.bf16.xpose.msra.mxu0 %v4764_v21 }
 0xc9d   : > { %7415 = vmatmul.mubr.msk.bf16.vlgmr.msra.gmra.mrb[172].mxu0 %vm1070_vm1, %v11345_v55  ;;  %v2102_v47 = vpop.xlane.xlu1 %2101 }
 0xc9e   : > { %7422 = vmatprep.mubr.msk.bf16.mxu0 %vm1070_vm1, %v11346_v7  ;;  %v2130_v28 = vsub.f32 %v10128_v41, %v2102_v47 }
 0xca0   : > { %v2155_v38 = vmul.f32 1.442695, %v2130_v28 }
 0xca1   : > { %v2099_v61 = vpop.xlane.xlu0 %2098  ;;  %v4816_v3 = vpop.permute.xlu1 %4815 }
 0xca2   : > { %8181 = vpow2.f32 %v2155_v38  ;;  %v2129_v59 = vsub.f32 %v10135_v51, %v2099_v61  ;;  %7730 = vmatprep.subr.msk.bf16.mxu0 %vm1070_vm1, %v4816_v3  ;;  %v4826_v27 = vsel %vm1070_vm1, %v4816_v3, 0 }
 0xca3   : > { %7419 = vmatpush3.bf16.xpose.msra.mxu0 %v4826_v27 }
 0xca4   : > { %v2153_v58 = vmul.f32 1.442695, %v2129_v59 }
 0xca5   : > { %v2105_v19 = vpop.xlane.xlu0 %2104  ;;  %v4881_v62 = vpop.permute.xlu1 %4880 }
 0xca6   : > { %8183 = vpow2.f32 %v2153_v58  ;;  %v2131_v60 = vsub.f32 %v10142_v25, %v2105_v19  ;;  %v4891_v6 = vsel %vm1070_vm1, %v4881_v62, 0 }
 0xca8   : > { %v2157_v29 = vmul.f32 1.442695, %v2131_v60 }
 0xca9   : > { %v2108_v17 = vpop.xlane.xlu0 %2107  ;;  %v4883_v57 = vpop.permute.xlu1 %4882 }
 0xcaa   : > { %8185 = vpow2.f32 %v2157_v29  ;;  %v2132_v41 = vsub.f32 %v10149_v45, %v2108_v17  ;;  %v4894_v34 = vsel %vm1070_vm1, %v4883_v57, 0 }
 0xcac   : > { %v10228_v30 = vpop.eup %8181  ;;  %v2159_v49 = vmul.f32 1.442695, %v2132_v41 }
 0xcad   : > { %v4818_v9 = vpop.permute.xlu0 %4817  ;;  %v2196_v51 = vsel %vm1070_vm1, %v10228_v30, 0.0 }
 0xcae   : > { %8187 = vpow2.f32 %v2159_v49  ;;  %v4829_v22 = vsel %vm1070_vm1, %v4818_v9, 0  ;;  %2197 = vadd.xlane.f32.xlu1 %v2196_v51  ;;  %7731 = vmatprep.subr.msk.bf16.mxu0 %vm1070_vm1, %v4818_v9 }
 0xcaf   : > { %7421 = vmatpush3.bf16.xpose.msra.mxu0 %v4829_v22 }
 0xcb0   : > { %v8184_v25 = vpop.eup %8183  ;;  %7732 = vmatprep.subr.msk.bf16.mxu0 %vm1070_vm1, %v4881_v62 }
 0xcb1   : > { %v2193_v45 = vsel %vm1070_vm1, %v8184_v25, 0.0 }
 0xcb2   : > { %2194 = vadd.xlane.f32.xlu0 %v2193_v45 }
 0xcb4   : > { %v10236_v24 = vpop.eup %8185 }
 0xcb5   : > { %v2199_v50 = vsel %vm1070_vm1, %v10236_v24, 0.0 }
 0xcb6   : > { %2200 = vadd.xlane.f32.xlu0 %v2199_v50  ;;  %7423 = vmatmul.mubr.msk.bf16.vlgmr.msra.gmra.mrb[176].mxu0 %vm1070_vm1, %v11347_v32 }
 0xcb7   : > { %7427 = vmatpush3.bf16.xpose.msra.mxu0 %v4891_v6  ;;  %7430 = vmatprep.mubr.msk.bf16.mxu0 %vm1070_vm1, %v11348_v20 }
 0xcb8   : > { %v8188_v0 = vpop.eup %8187  ;;  %7733 = vmatprep.subr.msk.bf16.mxu0 %vm1070_vm1, %v4883_v57 }
 0xcb9   : > { %v2202_v11 = vsel %vm1070_vm1, %v8188_v0, 0.0 }
 0xcba   : > { %2203 = vadd.xlane.f32.xlu0 %v2202_v11  ;;  %v8325_v11 = vld [vmem:[#allocation7 + $0x24] ss:$8 sps:$4 sm:$0xff]  }
 0xcbf   : > { %2385 = vrot.lane.b32.xlu1 %v8904_v13, %s8499_s30  ;;  %7429 = vmatpush3.bf16.xpose.msra.mxu0 %v4894_v34 }
 0xcc0   : > { %7442 = vmatprep.subr.bf16.mxu0 %v11349_v54 }
 0xcc3   : > { %5570 = vrot.lane.b32.xlu1 %v8880_v39, %s8498_s23 }
 0xcc6   : > { %7431 = vmatmul.mubr.msk.bf16.vlgmr.msra.gmra.mrb[180].mxu0 %vm1070_vm1, %v11350_v35 }
 0xcc7   : > { %7443 = vmatpush3.bf16.msra.mxu0 %v11349_v54 }
 0xcc8   : > { %7444 = vmatprep.subr.bf16.mxu0 %v11351_v10 }
 0xccb   : > { %7445 = vmatpush3.bf16.msra.mxu0 %v11351_v10 }
 0xccc   : > { %7458 = vmatprep.subr.bf16.mxu0 %v11352_v56 }
 0xcd0   : > { %2387 = vrot.lane.b32.xlu0 %v8909_v53, %s8499_s30 }
 0xd24   : > { %v10261_v13 = vpop.f32.mrb[152].mxu0 }
 0xd25   : > { %v10263_v36 = vpop.f32.mrb[153].mxu0 }
 0xd26   : > { %v10265_v1 = vpop.f32.mrb[154].mxu0 }
 0xd27   : > { %v10269_v8 = vpop.f32.mrb[155].mxu0 }
 0xd2e   : > { %v10273_v47 = vpop.f32.mrb[156].mxu0 }
 0xd2f   : > { %v10275_v28 = vpop.f32.mrb[157].mxu0 }
 0xd30   : > { %v10277_v38 = vpop.f32.mrb[158].mxu0 }
 0xd31   : > { %v10281_v61 = vpop.f32.mrb[159].mxu0 }
 0xd3b   : > { %v2198_v59 = vpop.xlane.xlu1 %2197 }
 0xd3c   : > { %8189 = vrcp.f32 %v2198_v59 }
 0xd3e   : > { %v10285_v27 = vpop.f32.mrb[160].mxu0 }
 0xd3f   : > { %11353 = vst [vmem:[#allocation12_spill] sm:$0xff] %v10285_v27  ;;  %v2195_v58 = vpop.xlane.xlu0 %2194  ;;  %v10287_v19 = vpop.f32.mrb[161].mxu0 }
 0xd40   : > { %8191 = vrcp.f32 %v2195_v58  ;;  %v2386_v60 = vpop.permute.xlu1 %2385  ;;  %v10289_v29 = vpop.f32.mrb[162].mxu0 }
 0xd41   : > { %11354 = vst [vmem:[#allocation13_spill] sm:$0xff] %v10289_v29  ;;  %7258 = vmatprep.subr.bf16.mxu1 %v2386_v60  ;;  %v10293_v41 = vpop.f32.mrb[163].mxu0 }
 0xd42   : > { %7259 = vmatpush3.bf16.msra.mxu1 %v2386_v60 }
 0xd43   : > { %v2201_v9 = vpop.xlane.xlu0 %2200 }
 0xd44   : > { %8193 = vrcp.f32 %v2201_v9 }
 0xd46   : > { %v8190_v22 = vpop.eup %8189 }
 0xd47   : > { %v2204_v51 = vpop.xlane.xlu0 %2203  ;;  %v2242_v6 = vmul.f32 %v8190_v22, %v10228_v30 }
 0xd48   : > { %8195 = vrcp.f32 %v2204_v51 }
 0xd4a   : > { %v8192_v62 = vpop.eup %8191 }
 0xd4b   : > { %v2388_v45 = vpop.permute.xlu0 %2387  ;;  %v2241_v50 = vmul.f32 %v8192_v62, %v8184_v25 }
 0xd4c   : > { %7260 = vmatprep.subr.bf16.mxu1 %v2388_v45 }
 0xd4d   : > { %7261 = vmatpush3.bf16.msra.mxu1 %v2388_v45  ;;  %v2253_v57 = vpack.c.bf16 %v2242_v6, %v2241_v50  ;;  %v8326_v50 = vld [vmem:[#allocation7 + $0x20] ss:$8 sps:$4 sm:$0xff]   ;;  %v11359_v6 = vmov 0  }
 0xd4e   : > { %7530 = vmatprep.subr.bf16.mxu1 %v8325_v11  ;;  %v8194_v34 = vpop.eup %8193  ;;  %v8328_v11 = vld [vmem:[#allocation7 + $0x30] ss:$8 sps:$4 sm:$0xff]  }
 0xd4f   : > { %7262 = vmatprep.mubr.msk.bf16.mxu1 %vm1070_vm1, %v2253_v57  ;;  %v2243_v51 = vmul.f32 %v8194_v34, %v10236_v24  ;;  %v8327_v57 = vld [vmem:[#allocation7 + $0x34] ss:$8 sps:$4 sm:$0xff]  }
 0xd50   : > { %v10299_v59 = vpop.f32.mrb[164].mxu0 }
 0xd51   : > { %11355 = vst [vmem:[#allocation14_spill] sm:$0xff] %v10299_v59  ;;  %v10301_v58 = vpop.f32.mrb[165].mxu0 }
 0xd52   : > { %11356 = vst [vmem:[#allocation15_spill] sm:$0xff] %v10301_v58  ;;  %v8196_v60 = vpop.eup %8195  ;;  %v10303_v9 = vpop.f32.mrb[166].mxu0 }
 0xd53   : > { %11357 = vst [vmem:[#allocation16_spill] sm:$0xff] %v10303_v9  ;;  %v2244_v25 = vmul.f32 %v8196_v60, %v8188_v0  ;;  %v10308_v22 = vpop.f32.mrb[167].mxu0 }
 0xd54   : > { %11358 = vst [vmem:[#allocation17_spill] sm:$0xff] %v10308_v22  ;;  %v7911_v22 = vld [vmem:[#allocation7] ss:$8 sps:$4 sm:$0xff]  }
 0xd55   : > { %v2254_v45 = vpack.c.bf16 %v2244_v25, %v2243_v51 }
 0xd57   : > { %7263 = vmatmul.mubr.msk.bf16.vlgmr.msra.gmra.mrb[68].mxu1 %vm1070_vm1, %v2254_v45 }
 0xd58   : > { %7532 = vmatpush1.bf16.msra.mxu1 %v8326_v50  ;;  %2637 = vmatprep.mubr.bf16.mxu1 %v11359_v6 }
 0xd59   : > { %7531 = vmatprep.subr.bf16.mxu1 %v8327_v57 }
 0xd5c   : > { %7533 = vmatpush1.bf16.msra.mxu1 %v8328_v11 }
 0xd60   : > { %v7408_v24 = vpop.f32.mrb[168].mxu0 }
 0xd61   : > { %v4735_v0 = vpop.f32.mrb[169].mxu0 }
 0xd62   : > { %v7409_v34 = vpop.f32.mrb[170].mxu0  ;;  %v10330_v53 = vsel %vm8995_vm3, %v4735_v0, -1e+30 }
 0xd63   : > { %v4738_v60 = vpop.f32.mrb[171].mxu0 }
 0xd70   : > { %v7416_v30 = vpop.f32.mrb[172].mxu0 }
 0xd71   : > { %v4951_v17 = vsel %vm8990_vm2, %v7416_v30, -1e+30  ;;  %v4800_v62 = vpop.f32.mrb[173].mxu0 }
 0xd72   : > { %v4979_v51 = vsel %vm1070_vm1, %v4951_v17, -inf  ;;  %v7417_v25 = vpop.f32.mrb[174].mxu0  ;;  %v10319_v45 = vsel %vm8995_vm3, %v4800_v62, -1e+30 }
 0xd73   : > { %v4952_v50 = vsel %vm9014_vm5, %v7417_v25, -1e+30  ;;  %v4803_v57 = vpop.f32.mrb[175].mxu0  ;;  %4980 = vmax.xlane.f32.xlu1 %v4979_v51  ;;  %v4973_v30 = vsel %vm1070_vm1, %v10319_v45, -inf  ;;  %v4961_v51 = vsel %vm1070_vm1, %v10330_v53, -inf }
 0xd74   : > { %v4982_v11 = vsel %vm1070_vm1, %v4952_v50, -inf  ;;  %v4950_v49 = vsel %vm9004_vm4, %v4803_v57, -1e+30  ;;  %v10337_v25 = vsel %vm8990_vm2, %v7408_v24, -1e+30 }
 0xd75   : > { %4983 = vmax.xlane.f32.xlu0 %v4982_v11  ;;  %v4976_v62 = vsel %vm1070_vm1, %v4950_v49, -inf  ;;  %v4967_v57 = vsel %vm1070_vm1, %v10337_v25, -inf }
 0xd77   : > { %4974 = vmax.xlane.f32.xlu1 %v4973_v30 }
 0xd79   : > { %4977 = vmax.xlane.f32.xlu0 %v4976_v62 }
 0xd7b   : > { %4962 = vmax.xlane.f32.xlu1 %v4961_v51 }
 0xd7f   : > { %4968 = vmax.xlane.f32.xlu1 %v4967_v57 }
 0xd89   : > { %v10341_v11 = vpop.f32.mrb[176].mxu0 }
 0xd8a   : > { %v10343_v0 = vpop.f32.mrb[177].mxu0 }
 0xd8b   : > { %v10345_v30 = vpop.f32.mrb[178].mxu0 }
 0xd8c   : > { %v10347_v3 = vpop.f32.mrb[179].mxu0 }
 0xd8f   : > { %5572 = vrot.lane.b32.xlu0 %v8887_v52, %s8498_s23  ;;  %v10365_v52 = vsel %vm9004_vm4, %v4738_v60, -1e+30 }
 0xd99   : > { %v7432_v62 = vpop.f32.mrb[180].mxu0 }
 0xd9a   : > { %v10353_v24 = vsel %vm8990_vm2, %v7432_v62, -1e+30  ;;  %v4930_v51 = vpop.f32.mrb[181].mxu0  ;;  %v4964_v62 = vsel %vm1070_vm1, %v10365_v52, -inf }
 0xd9b   : > { %v5003_v57 = vsel %vm1070_vm1, %v10353_v24, -inf  ;;  %v7433_v39 = vpop.f32.mrb[182].mxu0  ;;  %v10359_v21 = vsel %vm8995_vm3, %v4930_v51, -1e+30 }
 0xd9c   : > { %5004 = vmax.xlane.f32.xlu1 %v5003_v57  ;;  %v4933_v10 = vpop.f32.mrb[183].mxu0  ;;  %v4997_v54 = vsel %vm1070_vm1, %v10359_v21, -inf  ;;  %v10371_v59 = vsel %vm9014_vm5, %v7433_v39, -1e+30  ;;  %v10387_v39 = vsel %vm9014_vm5, %v7409_v34, -1e+30 }
 0xd9d   : > { %v5006_v51 = vsel %vm1070_vm1, %v10371_v59, -inf  ;;  %v4970_v57 = vsel %vm1070_vm1, %v10387_v39, -inf }
 0xda0   : > { %4998 = vmax.xlane.f32.xlu1 %v4997_v54  ;;  %v10379_v54 = vsel %vm9004_vm4, %v4933_v10, -1e+30 }
 0xda1   : > { %v5000_v60 = vsel %vm1070_vm1, %v10379_v54, -inf }
 0xdae   : > { %4965 = vmax.xlane.f32.xlu0 %v4964_v62 }
 0xdb1   : > { %5566 = vrot.lane.b32.xlu1 %v11343_v40, %s8499_s30  ;;  %v7913_v40 = vld [vmem:[#allocation7 + $0x4] ss:$8 sps:$4 sm:$0xff]  }
 0xdb2   : > { %5007 = vmax.xlane.f32.xlu0 %v5006_v51  ;;  %2722 = vmatprep.subr.bf16.mxu1 %v7913_v40 }
 0xdb5   : > { %5639 = vrot.lane.b32.xlu1 %v8892_v2, %s8498_s23  ;;  %v10399_v2 = vpop.permute.xlu1 %5570 }
 0xdb6   : > { %5001 = vmax.xlane.f32.xlu0 %v5000_v60 }
 0xdb9   : > { %5641 = vrot.lane.b32.xlu1 %v8897_v15, %s8498_s23 }
 0xdba   : > { %4971 = vmax.xlane.f32.xlu0 %v4970_v57 }
 0xdbd   : > { %5637 = vrot.lane.b32.xlu1 %v11345_v55, %s8499_s30 }
 0xdd0   : > { %5568 = vrot.lane.b32.xlu0 %v8840_v43, %s8499_s30 }
 0xdd4   : > { %5635 = vrot.lane.b32.xlu0 %v11344_v14, %s8499_s30 }
 0xe00   : > { %v4981_v10 = vpop.xlane.xlu1 %4980 }
 0xe01   : > { %v5015_v34 = vsub.f32 %v4951_v17, %v4981_v10 }
 0xe02   : > { %v4984_v62 = vpop.xlane.xlu0 %4983 }
 0xe03   : > { %v5037_v51 = vmul.f32 1.442695, %v5015_v34  ;;  %v5016_v60 = vsub.f32 %v4952_v50, %v4984_v62 }
 0xe04   : > { %v4975_v15 = vpop.xlane.xlu1 %4974 }
 0xe05   : > { %8197 = vpow2.f32 %v5037_v51  ;;  %v5039_v57 = vmul.f32 1.442695, %v5016_v60  ;;  %v5013_v55 = vsub.f32 %v10319_v45, %v4975_v15 }
 0xe06   : > { %v4978_v9 = vpop.xlane.xlu0 %4977 }
 0xe07   : > { %8199 = vpow2.f32 %v5039_v57  ;;  %v5033_v40 = vmul.f32 1.442695, %v5013_v55  ;;  %v5014_v58 = vsub.f32 %v4950_v49, %v4978_v9 }
 0xe08   : > { %v10418_v45 = vpop.xlane.xlu1 %4962 }
 0xe09   : > { %8201 = vpow2.f32 %v5033_v40  ;;  %v5035_v43 = vmul.f32 1.442695, %v5014_v58 }
 0xe0b   : > { %8203 = vpow2.f32 %v5035_v43 }
 0xe0c   : > { %v10420_v62 = vpop.xlane.xlu1 %4968 }
 0xe0f   : > { %v10402_v14 = vpop.eup %8197 }
 0xe10   : > { %v5075_v17 = vsel %vm1070_vm1, %v10402_v14, 0.0 }
 0xe11   : > { %v10406_v10 = vpop.eup %8199  ;;  %5076 = vadd.xlane.f32.xlu1 %v5075_v17 }
 0xe12   : > { %v5078_v50 = vsel %vm1070_vm1, %v10406_v10, 0.0 }
 0xe13   : > { %v10410_v34 = vpop.eup %8201  ;;  %5079 = vadd.xlane.f32.xlu0 %v5078_v50 }
 0xe14   : > { %v5069_v49 = vsel %vm1070_vm1, %v10410_v34, 0.0 }
 0xe15   : > { %v10414_v9 = vpop.eup %8203  ;;  %5070 = vadd.xlane.f32.xlu1 %v5069_v49 }
 0xe16   : > { %v5072_v58 = vsel %vm1070_vm1, %v10414_v9, 0.0 }
 0xe17   : > { %5073 = vadd.xlane.f32.xlu0 %v5072_v58  ;;  %v7916_v58 = vld [vmem:[#allocation7 + $0x14] ss:$8 sps:$4 sm:$0xff]  }
 0xe29   : > { %v5005_v51 = vpop.xlane.xlu1 %5004 }
 0xe2a   : > { %v5023_v60 = vsub.f32 %v10353_v24, %v5005_v51  ;;  %v7264_v15 = vpop.f32.mrb[68].mxu1  ;;  %v7914_v24 = vld [vmem:[#allocation7 + $0x10] ss:$8 sps:$4 sm:$0xff]   ;;  %v7919_v51 = vld [vmem:[#allocation7 + $0x44] ss:$8 sps:$4 sm:$0xff]  }
 0xe2b   : > { %v2431_v57 = vpop.f32.mrb[69].mxu1 }
 0xe2c   : > { %v5053_v55 = vmul.f32 1.442695, %v5023_v60  ;;  %v7265_v40 = vpop.f32.mrb[70].mxu1  ;;  %v10426_v60 = vpop.permute.xlu0 %5572 }
 0xe2d   : > { %v2514_v43 = vpack.c.bf16 %v7265_v40, %v7264_v15  ;;  %v2434_v17 = vpop.f32.mrb[71].mxu1  ;;  %v4999_v50 = vpop.xlane.xlu1 %4998  ;;  %v11360_v40 = vld [vmem:[#allocation47_spill] sm:$0xff] }
 0xe2e   : > { %8205 = vpow2.f32 %v5053_v55  ;;  %v2513_v49 = vpack.c.bf16 %v2434_v17, %v2431_v57  ;;  %v5021_v27 = vsub.f32 %v10359_v21, %v4999_v50  ;;  %v11361_v17 = vld [vmem:[#allocation45_spill] sm:$0xff] }
 0xe30   : > { %v5049_v29 = vmul.f32 1.442695, %v5021_v27  ;;  %6816 = vmatmul.mubr.msk.bf16.vlgmr.msra.gmra.mrb[72].mxu1 %vm1070_vm1, %v2513_v49 }
 0xe31   : > { %2647 = vmatprep.mubr.bf16.mxu1 %v11359_v6  ;;  %2723 = vmatpush1.bf16.msra.mxu1 %v7911_v22 }
 0xe32   : > { %8207 = vpow2.f32 %v5049_v29  ;;  %2724 = vmatprep.subr.bf16.mxu1 %v7916_v58 }
 0xe35   : > { %2725 = vmatpush1.bf16.msra.mxu1 %v7914_v24 }
 0xe36   : > { %3603 = vmatprep.subr.bf16.mxu1 %v7919_v51  ;;  %v11363_v51 = vld [vmem:[#allocation46_spill] sm:$0xff] }
 0xe38   : > { %v10428_v15 = vpop.eup %8205  ;;  %6817 = vmatmul.mubr.msk.bf16.gmra.mrb[76].mxu1 %vm1070_vm1, %v2514_v43  ;;  %v11362_v43 = vpack.c.bf16 %v11360_v40, %v11361_v17  ;;  %v7922_v40 = vld [vmem:[#allocation7 + $0x54] ss:$8 sps:$4 sm:$0xff]  }
 0xe39   : > { %v5099_v21 = vsel %vm1070_vm1, %v10428_v15, 0.0  ;;  %2657 = vmatprep.mubr.bf16.mxu1 %v11359_v6  ;;  %v11367_v17 = vld [vmem:[#allocation30_spill] sm:$0xff] }
 0xe3a   : > { %5100 = vadd.xlane.f32.xlu1 %v5099_v21  ;;  %v11364_v21 = vld [vmem:[#allocation19_spill] sm:$0xff] }
 0xe3b   : > { %v10434_v27 = vpop.xlane.xlu0 %4965 }
 0xe3c   : > { %v10436_v22 = vpop.eup %8207 }
 0xe3d   : > { %v5093_v29 = vsel %vm1070_vm1, %v10436_v22, 0.0 }
 0xe3e   : > { %5094 = vadd.xlane.f32.xlu1 %v5093_v29  ;;  %v11365_v29 = vpack.c.bf16 %v11363_v51, %v11364_v21  ;;  %v11370_v51 = vld [vmem:[#allocation29_spill] sm:$0xff] }
 0xe3f   : > { %v5008_v57 = vpop.xlane.xlu0 %5007 }
 0xe40   : > { %v5024_v55 = vsub.f32 %v10371_v59, %v5008_v57  ;;  %6818 = vmatmul.mubr.msk.bf16.gmra.mrb[80].mxu1 %vm1070_vm1, %v11362_v43  ;;  %v7917_v59 = vld [vmem:[#allocation7 + $0x40] ss:$8 sps:$4 sm:$0xff]  }
 0xe41   : > { %2667 = vmatprep.mubr.bf16.mxu1 %v11359_v6 }
 0xe42   : > { %v5055_v50 = vmul.f32 1.442695, %v5024_v55 }
 0xe43   : > { %v5002_v49 = vpop.xlane.xlu0 %5001 }
 0xe44   : > { %8209 = vpow2.f32 %v5055_v50  ;;  %v5022_v58 = vsub.f32 %v10379_v54, %v5002_v49  ;;  %v11366_v54 = vld [vmem:[#allocation32_spill] sm:$0xff]  ;;  %v7920_v50 = vld [vmem:[#allocation7 + $0x50] ss:$8 sps:$4 sm:$0xff]  }
 0xe45   : > { %v11368_v43 = vpack.c.bf16 %v11366_v54, %v11367_v17  ;;  %v11376_v54 = vld [vmem:[#allocation33_spill] sm:$0xff] }
 0xe46   : > { %v5051_v24 = vmul.f32 1.442695, %v5022_v58  ;;  %v7925_v58 = vld [vmem:[#allocation7 + $0x64] ss:$8 sps:$4 sm:$0xff]  }
 0xe48   : > { %8211 = vpow2.f32 %v5051_v24  ;;  %6819 = vmatmul.mubr.msk.bf16.gmra.mrb[84].mxu1 %vm1070_vm1, %v11365_v29  ;;  %v11372_v29 = vld [vmem:[#allocation36_spill] sm:$0xff] }
 0xe49   : > { %2754 = vmatprep.mubr.bf16.mxu1 %v11359_v6 }
 0xe4e   : > { %v10452_v57 = vpop.eup %8209 }
 0xe4f   : > { %v5102_v55 = vsel %vm1070_vm1, %v10452_v57, 0.0  ;;  %5710 = vrot.lane.b32.xlu1 %v8907_v48, %s8498_s23  ;;  %v11369_v48 = vld [vmem:[#allocation31_spill] sm:$0xff] }
 0xe50   : > { %5103 = vadd.xlane.f32.xlu0 %v5102_v55  ;;  %6824 = vmatmul.mubr.msk.bf16.vlgmr.msra.gmra.mrb[88].mxu1 %vm1070_vm1, %v11368_v43  ;;  %v11371_v21 = vpack.c.bf16 %v11369_v48, %v11370_v51  ;;  %v10487_v43 = vsel %vm9004_vm4, %v10347_v3, -1e+30  ;;  %v11381_v51 = vld [vmem:[#allocation39_spill] sm:$0xff]  ;;  %v11385_v3 = vld [vmem:[#allocation42_spill] sm:$0xff] }
 0xe51   : > { %2764 = vmatprep.mubr.bf16.mxu1 %v11359_v6  ;;  %3604 = vmatpush1.bf16.msra.mxu1 %v7917_v59  ;;  %v11373_v59 = vld [vmem:[#allocation34_spill] sm:$0xff]  ;;  %v4988_v48 = vsel %vm1070_vm1, %v10487_v43, -inf }
 0xe52   : > { %v10463_v49 = vpop.eup %8211  ;;  %3605 = vmatprep.subr.bf16.mxu1 %v7922_v40  ;;  %v11374_v55 = vpack.c.bf16 %v11372_v29, %v11373_v59  ;;  %v11375_v40 = vld [vmem:[#allocation35_spill] sm:$0xff] }
 0xe53   : > { %v5096_v24 = vsel %vm1070_vm1, %v10463_v49, 0.0  ;;  %v11377_v17 = vpack.c.bf16 %v11375_v40, %v11376_v54  ;;  %v10515_v54 = vpop.permute.xlu1 %5566 }
 0xe54   : > { %5097 = vadd.xlane.f32.xlu0 %v5096_v24 }
 0xe55   : > { %3606 = vmatpush1.bf16.msra.mxu1 %v7920_v50  ;;  %v11378_v50 = vld [vmem:[#allocation40_spill] sm:$0xff] }
 0xe56   : > { %4532 = vmatprep.subr.bf16.mxu1 %v7925_v58  ;;  %v11379_v58 = vld [vmem:[#allocation38_spill] sm:$0xff] }
 0xe57   : > { %v11380_v24 = vpack.c.bf16 %v11378_v50, %v11379_v58  ;;  %v11388_v50 = vld [vmem:[#allocation41_spill] sm:$0xff] }
 0xe58   : > { %6825 = vmatmul.mubr.msk.bf16.gmra.mrb[92].mxu1 %vm1070_vm1, %v11371_v21  ;;  %v11382_v21 = vld [vmem:[#allocation37_spill] sm:$0xff] }
 0xe59   : > { %2774 = vmatprep.mubr.bf16.mxu1 %v11359_v6  ;;  %v11383_v29 = vpack.c.bf16 %v11381_v51, %v11382_v21  ;;  %v10542_v21 = vpop.xlane.xlu0 %4971 }
 0xe60   : > { %6826 = vmatmul.mubr.msk.bf16.gmra.mrb[96].mxu1 %vm1070_vm1, %v11374_v55  ;;  %v10511_v55 = vsel %vm8995_vm3, %v10343_v0, -1e+30 }
 0xe61   : > { %2784 = vmatprep.mubr.bf16.mxu1 %v11359_v6  ;;  %v4985_v40 = vsel %vm1070_vm1, %v10511_v55, -inf }
 0xe68   : > { %6827 = vmatmul.mubr.msk.bf16.gmra.mrb[100].mxu1 %vm1070_vm1, %v11377_v17  ;;  %v11387_v17 = vld [vmem:[#allocation43_spill] sm:$0xff] }
 0xe69   : > { %2794 = vmatprep.mubr.bf16.mxu1 %v11359_v6  ;;  %v11389_v58 = vpack.c.bf16 %v11387_v17, %v11388_v50  ;;  %v11393_v50 = vpack.c.bf16 %v9903_v5, %v9897_v23 }
 0xe6a   : > { %5708 = vrot.lane.b32.xlu0 %v8902_v33, %s8498_s23  ;;  %v11384_v33 = vld [vmem:[#allocation44_spill] sm:$0xff] }
 0xe6b   : > { %v11386_v59 = vpack.c.bf16 %v11384_v33, %v11385_v3  ;;  %v10553_v33 = vpop.permute.xlu0 %5568  ;;  %v11391_v3 = vld [vmem:[#allocation21_spill] sm:$0xff] }
 0xe70   : > { %6828 = vmatmul.mubr.msk.bf16.gmra.mrb[72].mxu1 %vm1070_vm1, %v11380_v24  ;;  %v7923_v24 = vld [vmem:[#allocation7 + $0x60] ss:$8 sps:$4 sm:$0xff]  }
 0xe71   : > { %2804 = vmatprep.mubr.bf16.mxu1 %v11359_v6 }
 0xe73   : > { %4989 = vmax.xlane.f32.xlu1 %v4988_v48  ;;  %v10538_v48 = vpop.permute.xlu1 %5639 }
 0xe78   : > { %6829 = vmatmul.mubr.msk.bf16.gmra.mrb[76].mxu1 %vm1070_vm1, %v11383_v29  ;;  %v10551_v29 = vpop.permute.xlu1 %5641 }
 0xe79   : > { %2814 = vmatprep.mubr.bf16.mxu1 %v11359_v6 }
 0xe80   : > { %6830 = vmatmul.mubr.msk.bf16.gmra.mrb[80].mxu1 %vm1070_vm1, %v11386_v59  ;;  %v5010_v59 = vsub.f32 %v10365_v52, %v10434_v27  ;;  %v11394_v52 = vld [vmem:[#allocation64_spill] sm:$0xff] }
 0xe81   : > { %2824 = vmatprep.mubr.bf16.mxu1 %v11359_v6  ;;  %v11395_v27 = vpack.c.bf16 %v9899_v46, %v11394_v52 }
 0xe84   : > { %5704 = vrot.lane.b32.xlu1 %v11346_v7, %s8499_s30  ;;  %v10526_v7 = vsel %vm8990_vm2, %v10341_v11, -1e+30  ;;  %v7928_v11 = vld [vmem:[#allocation7 + $0x74] ss:$8 sps:$4 sm:$0xff]  }
 0xe85   : > { %v4991_v0 = vsel %vm1070_vm1, %v10526_v7, -inf }
 0xe88   : > { %5777 = vrot.lane.b32.xlu1 %v8912_v4, %s8498_s23  ;;  %6831 = vmatmul.mubr.msk.bf16.gmra.mrb[84].mxu1 %vm1070_vm1, %v11389_v58  ;;  %v10536_v4 = vsel %vm9014_vm5, %v10345_v30, -1e+30  ;;  %v7926_v30 = vld [vmem:[#allocation7 + $0x70] ss:$8 sps:$4 sm:$0xff]  }
 0xe89   : > { %4986 = vmax.xlane.f32.xlu0 %v4985_v40  ;;  %3635 = vmatprep.mubr.bf16.mxu1 %v11359_v6  ;;  %v4994_v51 = vsel %vm1070_vm1, %v10536_v4, -inf }
 0xe8c   : > { %5779 = vrot.lane.b32.xlu1 %v11313_v37, %s8498_s23  ;;  %v11390_v37 = vpack.c.bf16 %v9891_v42, %v9885_v31  ;;  %v10561_v31 = vpop.permute.xlu1 %5637  ;;  %v10563_v42 = vpop.permute.xlu0 %5635 }
 0xe8d   : > { %4992 = vmax.xlane.f32.xlu0 %v4991_v0 }
 0xe90   : > { %5775 = vrot.lane.b32.xlu1 %v11350_v35, %s8499_s30  ;;  %6852 = vmatmul.mubr.msk.bf16.vlgmr.msra.gmra.mrb[88].mxu1 %vm1070_vm1, %v11390_v37  ;;  %v11392_v35 = vpack.c.bf16 %v9887_v16, %v9883_v18  ;;  %v5027_v18 = vmul.f32 1.442695, %v5010_v59  ;;  %v11396_v37 = vld [vmem:[#allocation68_spill] sm:$0xff] }
 0xe91   : > { %4995 = vmax.xlane.f32.xlu0 %v4994_v51  ;;  %4533 = vmatpush1.bf16.msra.mxu1 %v7923_v24 }
 0xe92   : > { %4534 = vmatprep.subr.bf16.mxu1 %v7928_v11  ;;  %3645 = vmatprep.mubr.bf16.mxu1 %v11359_v6 }
 0xe95   : > { %4535 = vmatpush1.bf16.msra.mxu1 %v7926_v30 }
 0xe96   : > { %7434 = vmatprep.subr.bf16.mxu1 %v11391_v3 }
 0xe98   : > { %6853 = vmatmul.mubr.msk.bf16.gmra.mrb[92].mxu1 %vm1070_vm1, %v11392_v35 }
 0xe99   : > { %3655 = vmatprep.mubr.bf16.mxu1 %v11359_v6 }
 0xe9e   : > { %v5077_v40 = vpop.xlane.xlu1 %5076 }
 0xea0   : > { %v5080_v17 = vpop.xlane.xlu0 %5079  ;;  %6854 = vmatmul.mubr.msk.bf16.gmra.mrb[96].mxu1 %vm1070_vm1, %v11393_v50  ;;  %v11400_v50 = vld [vmem:[#allocation67_spill] sm:$0xff] }
 0xea1   : > { %3665 = vmatprep.mubr.bf16.mxu1 %v11359_v6  ;;  %8213 = vrcp.f32 %v5080_v17  ;;  %v5009_v17 = vsub.f32 %v10330_v53, %v10418_v45  ;;  %v5012_v45 = vsub.f32 %v10387_v39, %v10542_v21 }
 0xea2   : > { %v5071_v16 = vpop.xlane.xlu1 %5070 }
 0xea3   : > { %8215 = vrcp.f32 %v5071_v16 }
 0xea4   : > { %8217 = vrcp.f32 %v5077_v40  ;;  %v5074_v58 = vpop.xlane.xlu0 %5073 }
 0xea5   : > { %8219 = vrcp.f32 %v5074_v58  ;;  %v5031_v58 = vmul.f32 1.442695, %v5012_v45 }
 0xea6   : > { %8221 = vpow2.f32 %v5027_v18  ;;  %v11401_v18 = vld [vmem:[#allocation65_spill] sm:$0xff] }
 0xea7   : > { %5706 = vrot.lane.b32.xlu0 %v11347_v32, %s8499_s30  ;;  %v11397_v32 = vld [vmem:[#allocation66_spill] sm:$0xff]  ;;  %v11402_v16 = vpack.c.bf16 %v11400_v50, %v11401_v18 }
 0xea8   : > { %6855 = vmatmul.mubr.msk.bf16.gmra.mrb[100].mxu1 %vm1070_vm1, %v11395_v27  ;;  %v11398_v30 = vpack.c.bf16 %v11396_v37, %v11397_v32  ;;  %v11409_v37 = vpack.c.bf16 %v10269_v8, %v10263_v36  ;;  %v11412_v36 = vpack.c.bf16 %v10265_v1, %v10261_v13  ;;  %v11414_v13 = vpack.c.bf16 %v10277_v38, %v10273_v47 }
 0xea9   : > { %3675 = vmatprep.mubr.bf16.mxu1 %v11359_v6  ;;  %v11415_v47 = vpack.c.bf16 %v10293_v41, %v10287_v19  ;;  %v11416_v19 = vld [vmem:[#allocation13_spill] sm:$0xff]  ;;  %v11417_v41 = vld [vmem:[#allocation12_spill] sm:$0xff] }
 0xeab   : > { %5773 = vrot.lane.b32.xlu0 %v11348_v20, %s8499_s30  ;;  %v8214_v23 = vpop.eup %8213 }
 0xeac   : > { %v5128_v11 = vmul.f32 %v8214_v23, %v10406_v10  ;;  %v11406_v23 = vld [vmem:[#allocation71_spill] sm:$0xff] }
 0xead   : > { %v8216_v5 = vpop.eup %8215 }
 0xeae   : > { %v8218_v0 = vpop.eup %8217  ;;  %v5125_v46 = vmul.f32 %v8216_v5, %v10410_v34  ;;  %v11399_v34 = vld [vmem:[#allocation28_spill] sm:$0xff]  ;;  %v11407_v5 = vld [vmem:[#allocation69_spill] sm:$0xff] }
 0xeaf   : > { %v8220_v24 = vpop.eup %8219  ;;  %v5127_v59 = vmul.f32 %v8218_v0, %v10402_v14  ;;  %v5025_v14 = vmul.f32 1.442695, %v5009_v17  ;;  %v11408_v0 = vpack.c.bf16 %v11406_v23, %v11407_v5 }
 0xeb0   : > { %v10582_v51 = vpop.eup %8221  ;;  %6856 = vmatmul.mubr.msk.bf16.gmra.mrb[72].mxu1 %vm1070_vm1, %v11398_v30  ;;  %v5126_v35 = vmul.f32 %v8220_v24, %v10414_v9  ;;  %v5011_v9 = vsub.f32 %v10337_v25, %v10420_v62  ;;  %v11403_v25 = vld [vmem:[#allocation72_spill] sm:$0xff]  ;;  %v11404_v62 = vld [vmem:[#allocation70_spill] sm:$0xff] }
 0xeb1   : > { %3685 = vmatprep.mubr.bf16.mxu1 %v11359_v6  ;;  %v5060_v40 = vsel %vm1070_vm1, %v10582_v51, 0.0  ;;  %v5140_v10 = vpack.c.bf16 %v5128_v11, %v5127_v59  ;;  %8223 = vpow2.f32 %v5025_v14  ;;  %v11405_v52 = vpack.c.bf16 %v11403_v25, %v11404_v62  ;;  %v11410_v30 = vld [vmem:[#allocation22_spill] sm:$0xff]  ;;  %v11422_v25 = vld [vmem:[#allocation16_spill] sm:$0xff] }
 0xeb2   : > { %v5139_v20 = vpack.c.bf16 %v5126_v35, %v5125_v46  ;;  %v5029_v53 = vmul.f32 1.442695, %v5011_v9  ;;  %v11411_v46 = vld [vmem:[#allocation25_spill] sm:$0xff]  ;;  %v11423_v62 = vld [vmem:[#allocation14_spill] sm:$0xff] }
 0xeb4   : > { %7446 = vmatprep.mubr.msk.bf16.mxu0 %vm1070_vm1, %v5139_v20  ;;  %5061 = vadd.xlane.f32.xlu1 %v5060_v40  ;;  %8225 = vpow2.f32 %v5029_v53  ;;  %v11413_v20 = vpack.c.bf16 %v10281_v61, %v10275_v28 }
 0xeb5   : > { %7447 = vmatmul.mubr.msk.bf16.vlgmr.msra.gmra.mrb[184].mxu0 %vm1070_vm1, %v5140_v10  ;;  %8227 = vpow2.f32 %v5031_v58  ;;  %v5650_v58 = vsel %vm1070_vm1, %v10538_v48, 0 }
 0xeb6   : > { %7459 = vmatpush3.bf16.msra.mxu0 %v11352_v56 }
 0xeb7   : > { %7460 = vmatprep.subr.bf16.mxu0 %v11399_v34 }
 0xeb8   : > { %6857 = vmatmul.mubr.msk.bf16.gmra.mrb[76].mxu1 %vm1070_vm1, %v11402_v16  ;;  %v11420_v16 = vld [vmem:[#allocation15_spill] sm:$0xff] }
 0xeb9   : > { %3695 = vmatprep.mubr.bf16.mxu1 %v11359_v6 }
 0xeba   : > { %7461 = vmatpush3.bf16.msra.mxu0 %v11399_v34 }
 0xebb   : > { %7734 = vmatprep.subr.msk.bf16.mxu0 %vm1070_vm1, %v10399_v2  ;;  %v10617_v27 = vpop.eup %8223 }
 0xebc   : > { %v5057_v39 = vsel %vm1070_vm1, %v10617_v27, 0.0 }
 0xebe   : > { %v10626_v21 = vpop.eup %8225 }
 0xebf   : > { %v5063_v24 = vsel %vm1070_vm1, %v10626_v21, 0.0  ;;  %v10630_v11 = vpop.eup %8227 }
 0xec0   : > { %6858 = vmatmul.mubr.msk.bf16.gmra.mrb[80].mxu1 %vm1070_vm1, %v11405_v52  ;;  %v5066_v32 = vsel %vm1070_vm1, %v10630_v11, 0.0 }
 0xec1   : > { %3705 = vmatprep.mubr.bf16.mxu1 %v11359_v6 }
 0xec7   : > { %v5101_v35 = vpop.xlane.xlu1 %5100 }
 0xec8   : > { %6859 = vmatmul.mubr.msk.bf16.gmra.mrb[84].mxu1 %vm1070_vm1, %v11408_v0 }
 0xec9   : > { %4564 = vmatprep.mubr.bf16.mxu1 %v11359_v6 }
 0xeca   : > { %5058 = vadd.xlane.f32.xlu0 %v5057_v39 }
 0xecb   : > { %v5095_v8 = vpop.xlane.xlu1 %5094 }
 0xece   : > { %5064 = vadd.xlane.f32.xlu0 %v5063_v24 }
 0xed0   : > { %6880 = vmatmul.mubr.msk.bf16.vlgmr.msra.gmra.mrb[88].mxu1 %vm1070_vm1, %v11409_v37 }
 0xed1   : > { %7435 = vmatpush3.bf16.msra.mxu1 %v11391_v3  ;;  %4574 = vmatprep.mubr.bf16.mxu1 %v11359_v6 }
 0xed2   : > { %5067 = vadd.xlane.f32.xlu0 %v5066_v32  ;;  %7436 = vmatprep.subr.bf16.mxu1 %v11410_v30 }
 0xed5   : > { %7437 = vmatpush3.bf16.msra.mxu1 %v11410_v30 }
 0xed6   : > { %7450 = vmatprep.subr.bf16.mxu1 %v11411_v46 }
 0xed8   : > { %6881 = vmatmul.mubr.msk.bf16.gmra.mrb[92].mxu1 %vm1070_vm1, %v11412_v36 }
 0xed9   : > { %4584 = vmatprep.mubr.bf16.mxu1 %v11359_v6 }
 0xedd   : > { %v5104_v59 = vpop.xlane.xlu0 %5103 }
 0xede   : > { %8229 = vrcp.f32 %v5104_v59 }
 0xedf   : > { %8231 = vrcp.f32 %v5095_v8 }
 0xee0   : > { %6882 = vmatmul.mubr.msk.bf16.gmra.mrb[96].mxu1 %vm1070_vm1, %v11413_v20  ;;  %8233 = vrcp.f32 %v5101_v35 }
 0xee1   : > { %v5098_v40 = vpop.xlane.xlu0 %5097  ;;  %4594 = vmatprep.mubr.bf16.mxu1 %v11359_v6 }
 0xee2   : > { %8235 = vrcp.f32 %v5098_v40 }
 0xee5   : > { %v5709_v52 = vpop.permute.xlu0 %5708 }
 0xee6   : > { %v5719_v23 = vsel %vm1070_vm1, %v5709_v52, 0 }
 0xee8   : > { %6883 = vmatmul.mubr.msk.bf16.gmra.mrb[100].mxu1 %vm1070_vm1, %v11414_v13  ;;  %v8230_v1 = vpop.eup %8229 }
 0xee9   : > { %4604 = vmatprep.mubr.bf16.mxu1 %v11359_v6  ;;  %v8232_v10 = vpop.eup %8231  ;;  %v5136_v28 = vmul.f32 %v8230_v1, %v10452_v57  ;;  %v5581_v57 = vsel %vm1070_vm1, %v10399_v2, 0  ;;  %v5711_v2 = vpop.permute.xlu1 %5710 }
 0xeea   : > { %v8234_v17 = vpop.eup %8233  ;;  %v5133_v61 = vmul.f32 %v8232_v10, %v10436_v22  ;;  %v5584_v22 = vsel %vm1070_vm1, %v10426_v60, 0  ;;  %v5722_v24 = vsel %vm1070_vm1, %v5711_v2, 0 }
 0xeeb   : > { %v5135_v50 = vmul.f32 %v8234_v17, %v10428_v15  ;;  %v11418_v15 = vpack.c.bf16 %v11416_v19, %v11417_v41 }
 0xeec   : > { %v8236_v14 = vpop.eup %8235 }
 0xeed   : > { %v5134_v9 = vmul.f32 %v8236_v14, %v10463_v49  ;;  %v5144_v38 = vpack.c.bf16 %v5136_v28, %v5135_v50 }
 0xeef   : > { %v5143_v18 = vpack.c.bf16 %v5134_v9, %v5133_v61 }
 0xef0   : > { %6884 = vmatmul.mubr.msk.bf16.gmra.mrb[72].mxu1 %vm1070_vm1, %v11415_v47 }
 0xef1   : > { %7462 = vmatprep.mubr.msk.bf16.mxu0 %vm1070_vm1, %v5143_v18  ;;  %4614 = vmatprep.mubr.bf16.mxu1 %v11359_v6 }
 0xef2   : > { %7463 = vmatmul.mubr.msk.bf16.vlgmr.msra.gmra.mrb[188].mxu0 %vm1070_vm1, %v5144_v38 }
 0xef3   : > { %7467 = vmatpush3.bf16.xpose.msra.mxu0 %v5581_v57  ;;  %7470 = vmatprep.mubr.msk.bf16.mxu0 %vm1070_vm1, %v10515_v54  ;;  %v11419_v54 = vld [vmem:[#allocation17_spill] sm:$0xff] }
 0xef4   : > { %7735 = vmatprep.subr.msk.bf16.mxu0 %vm1070_vm1, %v10426_v60  ;;  %v11421_v53 = vpack.c.bf16 %v11419_v54, %v11420_v16  ;;  %v11425_v16 = vld [vmem:[#allocation26_spill] sm:$0xff] }
 0xef8   : > { %6885 = vmatmul.mubr.msk.bf16.gmra.mrb[76].mxu1 %vm1070_vm1, %v11418_v15 }
 0xef9   : > { %4624 = vmatprep.mubr.bf16.mxu1 %v11359_v6 }
 0xefb   : > { %7469 = vmatpush3.bf16.xpose.msra.mxu0 %v5584_v22 }
 0xefc   : > { %7736 = vmatprep.subr.msk.bf16.mxu0 %vm1070_vm1, %v10538_v48  ;;  %v5653_v48 = vsel %vm1070_vm1, %v10551_v29, 0 }
 0xf00   : > { %v4990_v49 = vpop.xlane.xlu1 %4989  ;;  %6886 = vmatmul.mubr.msk.bf16.gmra.mrb[80].mxu1 %vm1070_vm1, %v11421_v53  ;;  %v7931_v53 = vld [vmem:[#allocation7 + $0x84] ss:$8 sps:$4 sm:$0xff]  }
 0xf01   : > { %v5018_v45 = vsub.f32 %v10487_v43, %v4990_v49  ;;  %4634 = vmatprep.mubr.bf16.mxu1 %v11359_v6  ;;  %v11424_v43 = vpack.c.bf16 %v11422_v25, %v11423_v62 }
 0xf02   : > { %7471 = vmatmul.mubr.msk.bf16.vlgmr.msra.gmra.mrb[192].mxu0 %vm1070_vm1, %v10553_v33 }
 0xf03   : > { %v5043_v60 = vmul.f32 1.442695, %v5018_v45  ;;  %7475 = vmatpush3.bf16.xpose.msra.mxu0 %v5650_v58  ;;  %7478 = vmatprep.mubr.msk.bf16.mxu0 %vm1070_vm1, %v10563_v42 }
 0xf04   : > { %7737 = vmatprep.subr.msk.bf16.mxu0 %vm1070_vm1, %v10551_v29  ;;  %v5705_v5 = vpop.permute.xlu1 %5704 }
 0xf05   : > { %8237 = vpow2.f32 %v5043_v60 }
 0xf08   : > { %6887 = vmatmul.mubr.msk.bf16.gmra.mrb[84].mxu1 %vm1070_vm1, %v11424_v43  ;;  %v5778_v32 = vpop.permute.xlu1 %5777 }
 0xf0b   : > { %7477 = vmatpush3.bf16.xpose.msra.mxu0 %v5653_v48 }
 0xf0c   : > { %7738 = vmatprep.subr.msk.bf16.mxu0 %vm1070_vm1, %v5709_v52  ;;  %v5780_v40 = vpop.permute.xlu1 %5779 }
 0xf0d   : > { %v5791_v17 = vsel %vm1070_vm1, %v5780_v40, 0 }
 0xf0f   : > { %v10705_v33 = vpop.eup %8237 }
 0xf10   : > { %v5084_v42 = vsel %vm1070_vm1, %v10705_v33, 0.0  ;;  %v5776_v61 = vpop.permute.xlu1 %5775 }
 0xf11   : > { %5085 = vadd.xlane.f32.xlu0 %v5084_v42 }
 0xf12   : > { %7479 = vmatmul.mubr.msk.bf16.vlgmr.msra.gmra.mrb[196].mxu0 %vm1070_vm1, %v10561_v31 }
 0xf13   : > { %7483 = vmatpush3.bf16.xpose.msra.mxu0 %v5719_v23  ;;  %7486 = vmatprep.mubr.msk.bf16.mxu0 %vm1070_vm1, %v5705_v5 }
 0xf14   : > { %7739 = vmatprep.subr.msk.bf16.mxu0 %vm1070_vm1, %v5711_v2 }
 0xf16   : > { %v4987_v29 = vpop.xlane.xlu0 %4986 }
 0xf17   : > { %v5017_v0 = vsub.f32 %v10511_v55, %v4987_v29  ;;  %v5788_v55 = vsel %vm1070_vm1, %v5778_v32, 0 }
 0xf19   : > { %v5041_v39 = vmul.f32 1.442695, %v5017_v0 }
 0xf1a   : > { %v4993_v37 = vpop.xlane.xlu0 %4992 }
 0xf1b   : > { %8239 = vpow2.f32 %v5041_v39  ;;  %v5019_v35 = vsub.f32 %v10526_v7, %v4993_v37  ;;  %7485 = vmatpush3.bf16.xpose.msra.mxu0 %v5722_v24 }
 0xf1c   : > { %7740 = vmatprep.subr.msk.bf16.mxu0 %vm1070_vm1, %v5778_v32 }
 0xf1d   : > { %v5045_v31 = vmul.f32 1.442695, %v5019_v35 }
 0xf1e   : > { %v4996_v36 = vpop.xlane.xlu0 %4995 }
 0xf1f   : > { %8241 = vpow2.f32 %v5045_v31  ;;  %v5020_v8 = vsub.f32 %v10536_v4, %v4996_v36 }
 0xf21   : > { %v5047_v59 = vmul.f32 1.442695, %v5020_v8  ;;  %v7929_v8 = vld [vmem:[#allocation7 + $0x80] ss:$8 sps:$4 sm:$0xff]  }
 0xf22   : > { %v5707_v20 = vpop.permute.xlu0 %5706 }
 0xf23   : > { %8243 = vpow2.f32 %v5047_v59  ;;  %7487 = vmatmul.mubr.msk.bf16.vlgmr.msra.gmra.mrb[200].mxu0 %vm1070_vm1, %v5707_v20  ;;  %v7934_v20 = vld [vmem:[#allocation7 + $0x94] ss:$8 sps:$4 sm:$0xff]  }
 0xf24   : > { %7491 = vmatpush3.bf16.xpose.msra.mxu0 %v5788_v55  ;;  %v7932_v55 = vld [vmem:[#allocation7 + $0x90] ss:$8 sps:$4 sm:$0xff]  }
 0xf25   : > { %v8240_v13 = vpop.eup %8239  ;;  %7741 = vmatprep.subr.msk.bf16.mxu0 %vm1070_vm1, %v5780_v40 }
 0xf26   : > { %v5774_v7 = vpop.permute.xlu0 %5773  ;;  %v5081_v1 = vsel %vm1070_vm1, %v8240_v13, 0.0 }
 0xf27   : > { %5082 = vadd.xlane.f32.xlu1 %v5081_v1  ;;  %7494 = vmatprep.mubr.msk.bf16.mxu0 %vm1070_vm1, %v5774_v7 }
 0xf29   : > { %v8242_v10 = vpop.eup %8241 }
 0xf2a   : > { %v5087_v4 = vsel %vm1070_vm1, %v8242_v10, 0.0 }
 0xf2b   : > { %5088 = vadd.xlane.f32.xlu1 %v5087_v4 }
 0xf2c   : > { %7493 = vmatpush3.bf16.xpose.msra.mxu0 %v5791_v17 }
 0xf2d   : > { %v8244_v14 = vpop.eup %8243 }
 0xf2e   : > { %v5090_v28 = vsel %vm1070_vm1, %v8244_v14, 0.0 }
 0xf2f   : > { %5091 = vadd.xlane.f32.xlu0 %v5090_v28 }
 0xf33   : > { %7495 = vmatmul.mubr.msk.bf16.vlgmr.msra.gmra.mrb[204].mxu0 %vm1070_vm1, %v5776_v61 }
 0xf3c   : > { %6044 = vrot.lane.b32.xlu1 %v11391_v3, %s8499_s30 }
 0xf41   : > { %v5062_v9 = vpop.xlane.xlu1 %5061 }
 0xf42   : > { %8245 = vrcp.f32 %v5062_v9 }
 0xf4c   : > { %v8246_v38 = vpop.eup %8245 }
 0xf4d   : > { %v5122_v41 = vmul.f32 %v8246_v38, %v10582_v51 }
 0xf57   : > { %v5059_v50 = vpop.xlane.xlu0 %5058 }
 0xf58   : > { %8247 = vrcp.f32 %v5059_v50 }
 0xf5b   : > { %v5065_v18 = vpop.xlane.xlu0 %5064 }
 0xf5c   : > { %8249 = vrcp.f32 %v5065_v18 }
 0xf5f   : > { %v5068_v47 = vpop.xlane.xlu0 %5067 }
 0xf60   : > { %8251 = vrcp.f32 %v5068_v47 }
 0xf62   : > { %v8248_v57 = vpop.eup %8247 }
 0xf63   : > { %v5121_v19 = vmul.f32 %v8248_v57, %v10617_v27 }
 0xf65   : > { %v5137_v15 = vpack.c.bf16 %v5122_v41, %v5121_v19 }
 0xf66   : > { %v8250_v22 = vpop.eup %8249 }
 0xf67   : > { %7438 = vmatprep.mubr.msk.bf16.mxu1 %vm1070_vm1, %v5137_v15  ;;  %v5123_v3 = vmul.f32 %v8250_v22, %v10626_v21 }
 0xf6a   : > { %v8252_v2 = vpop.eup %8251 }
 0xf6b   : > { %v5124_v49 = vmul.f32 %v8252_v2, %v10630_v11 }
 0xf6d   : > { %v5138_v54 = vpack.c.bf16 %v5124_v49, %v5123_v3 }
 0xf6f   : > { %7439 = vmatmul.mubr.msk.bf16.vlgmr.msra.gmra.mrb[104].mxu1 %vm1070_vm1, %v5138_v54 }
 0xf70   : > { %7451 = vmatpush3.bf16.msra.mxu1 %v11411_v46 }
 0xf71   : > { %7452 = vmatprep.subr.bf16.mxu1 %v11425_v16 }
 0xf74   : > { %7453 = vmatpush3.bf16.msra.mxu1 %v11425_v16 }
 0xf75   : > { %5421 = vmatprep.subr.bf16.mxu1 %v7931_v53 }
 0xf88   : > { %v10739_v51 = vpop.f32.mrb[184].mxu0 }
 0xf89   : > { %v10741_v27 = vpop.f32.mrb[185].mxu0 }
 0xf8a   : > { %v10743_v45 = vpop.f32.mrb[186].mxu0 }
 0xf8b   : > { %v5368_v21 = vpack.c.bf16 %v10743_v45, %v10739_v51  ;;  %v10747_v11 = vpop.f32.mrb[187].mxu0 }
 0xf8c   : > { %v5367_v58 = vpack.c.bf16 %v10747_v11, %v10741_v27 }
 0xf9e   : > { %v5086_v60 = vpop.xlane.xlu0 %5085 }
 0xf9f   : > { %8253 = vrcp.f32 %v5086_v60 }
 0xfa9   : > { %v8254_v48 = vpop.eup %8253 }
 0xfaa   : > { %v5130_v23 = vmul.f32 %v8254_v48, %v10705_v33 }
 0xfb4   : > { %v5083_v25 = vpop.xlane.xlu1 %5082 }
 0xfb5   : > { %8255 = vrcp.f32 %v5083_v25 }
 0xfb8   : > { %v5089_v62 = vpop.xlane.xlu1 %5088 }
 0xfb9   : > { %8257 = vrcp.f32 %v5089_v62 }
 0xfbc   : > { %v5092_v43 = vpop.xlane.xlu0 %5091  ;;  %v10767_v40 = vpop.permute.xlu1 %6044 }
 0xfbd   : > { %8259 = vrcp.f32 %v5092_v43 }
 0xfbf   : > { %v8256_v52 = vpop.eup %8255 }
 0xfc0   : > { %v5129_v42 = vmul.f32 %v8256_v52, %v8240_v13 }
 0xfc2   : > { %v5141_v5 = vpack.c.bf16 %v5130_v23, %v5129_v42 }
 0xfc3   : > { %v8258_v29 = vpop.eup %8257 }
 0xfc4   : > { %7454 = vmatprep.mubr.msk.bf16.mxu1 %vm1070_vm1, %v5141_v5  ;;  %v5131_v32 = vmul.f32 %v8258_v29, %v8242_v10 }
 0xfc5   : > { %v10753_v0 = vpop.f32.mrb[188].mxu0 }
 0xfc6   : > { %v10755_v39 = vpop.f32.mrb[189].mxu0 }
 0xfc7   : > { %v8260_v24 = vpop.eup %8259  ;;  %v10757_v37 = vpop.f32.mrb[190].mxu0 }
 0xfc8   : > { %v5132_v35 = vmul.f32 %v8260_v24, %v8244_v14  ;;  %v5372_v31 = vpack.c.bf16 %v10757_v37, %v10753_v0  ;;  %v10761_v36 = vpop.f32.mrb[191].mxu0 }
 0xfc9   : > { %v5371_v33 = vpack.c.bf16 %v10761_v36, %v10755_v39 }
 0xfca   : > { %v5142_v59 = vpack.c.bf16 %v5132_v35, %v5131_v32  ;;  %v11426_v35 = vld [vmem:[#allocation23_spill] sm:$0xff] }
 0xfcc   : > { %7455 = vmatmul.mubr.msk.bf16.vlgmr.msra.gmra.mrb[108].mxu1 %vm1070_vm1, %v5142_v59 }
 0xfcd   : > { %5422 = vmatpush1.bf16.msra.mxu1 %v7929_v8  ;;  %5453 = vmatprep.mubr.bf16.mxu1 %v11359_v6 }
 0xfce   : > { %5423 = vmatprep.subr.bf16.mxu1 %v7934_v20 }
 0xfd1   : > { %5424 = vmatpush1.bf16.msra.mxu1 %v7932_v55 }
 0xfd2   : > { %7498 = vmatprep.subr.bf16.mxu1 %v10767_v40 }
 0xfd5   : > { %v7472_v13 = vpop.f32.mrb[192].mxu0 }
 0xfd6   : > { %v10772_v7 = vsel %vm8990_vm2, %v7472_v13, -1e+30  ;;  %v5620_v1 = vpop.f32.mrb[193].mxu0 }
 0xfd7   : > { %v5864_v10 = vsel %vm1070_vm1, %v10772_v7, -inf  ;;  %v7473_v4 = vpop.f32.mrb[194].mxu0  ;;  %v10778_v17 = vsel %vm8995_vm3, %v5620_v1, -1e+30 }
 0xfd8   : > { %v10782_v14 = vsel %vm9014_vm5, %v7473_v4, -1e+30  ;;  %5865 = vmax.xlane.f32.xlu1 %v5864_v10  ;;  %v5623_v28 = vpop.f32.mrb[195].mxu0  ;;  %v5858_v50 = vsel %vm1070_vm1, %v10778_v17, -inf }
 0xfd9   : > { %v5867_v61 = vsel %vm1070_vm1, %v10782_v14, -inf  ;;  %v10788_v9 = vsel %vm9004_vm4, %v5623_v28, -1e+30 }
 0xfda   : > { %5868 = vmax.xlane.f32.xlu0 %v5867_v61  ;;  %v5861_v18 = vsel %vm1070_vm1, %v10788_v9, -inf }
 0xfdc   : > { %5859 = vmax.xlane.f32.xlu1 %v5858_v50 }
 0xfde   : > { %5862 = vmax.xlane.f32.xlu0 %v5861_v18 }
 0xfe5   : > { %v7480_v47 = vpop.f32.mrb[196].mxu0 }
 0xfe6   : > { %v10796_v38 = vsel %vm8990_vm2, %v7480_v47, -1e+30  ;;  %v5689_v57 = vpop.f32.mrb[197].mxu0 }
 0xfe7   : > { %v5876_v19 = vsel %vm1070_vm1, %v10796_v38, -inf  ;;  %v7481_v41 = vpop.f32.mrb[198].mxu0  ;;  %v10802_v15 = vsel %vm8995_vm3, %v5689_v57, -1e+30 }
 0xfe8   : > { %v10806_v22 = vsel %vm9014_vm5, %v7481_v41, -1e+30  ;;  %5877 = vmax.xlane.f32.xlu1 %v5876_v19  ;;  %v5692_v2 = vpop.f32.mrb[199].mxu0  ;;  %v5870_v54 = vsel %vm1070_vm1, %v10802_v15, -inf }
 0xfe9   : > { %v5879_v3 = vsel %vm1070_vm1, %v10806_v22, -inf  ;;  %v10812_v49 = vsel %vm9004_vm4, %v5692_v2, -1e+30 }
 0xfea   : > { %5880 = vmax.xlane.f32.xlu0 %v5879_v3  ;;  %v5873_v53 = vsel %vm1070_vm1, %v10812_v49, -inf }
 0xfec   : > { %5871 = vmax.xlane.f32.xlu1 %v5870_v54 }
 0xfee   : > { %5874 = vmax.xlane.f32.xlu0 %v5873_v53 }
 0xff6   : > { %v7488_v60 = vpop.f32.mrb[200].mxu0 }
 0xff7   : > { %v10820_v25 = vsel %vm8990_vm2, %v7488_v60, -1e+30  ;;  %v5758_v62 = vpop.f32.mrb[201].mxu0 }
 0xff8   : > { %v5888_v43 = vsel %vm1070_vm1, %v10820_v25, -inf  ;;  %v7489_v48 = vpop.f32.mrb[202].mxu0  ;;  %v10826_v52 = vsel %vm8995_vm3, %v5758_v62, -1e+30 }
 0xff9   : > { %5889 = vmax.xlane.f32.xlu1 %v5888_v43  ;;  %v5761_v42 = vpop.f32.mrb[203].mxu0  ;;  %v5882_v23 = vsel %vm1070_vm1, %v10826_v52, -inf  ;;  %v10836_v8 = vsel %vm9014_vm5, %v7489_v48, -1e+30 }
 0xffa   : > { %v5891_v59 = vsel %vm1070_vm1, %v10836_v8, -inf  ;;  %v10842_v20 = vsel %vm9004_vm4, %v5761_v42, -1e+30 }
 0xffd   : > { %5883 = vmax.xlane.f32.xlu1 %v5882_v23 }
0x1004   : > { %6046 = vrot.lane.b32.xlu0 %v11410_v30, %s8499_s30  ;;  %v5885_v30 = vsel %vm1070_vm1, %v10842_v20, -inf }
0x1006   : > { %v7496_v5 = vpop.f32.mrb[204].mxu0 }
0x1007   : > { %v5827_v29 = vpop.f32.mrb[205].mxu0  ;;  %v10858_v10 = vsel %vm8990_vm2, %v7496_v5, -1e+30 }
0x1008   : > { %v7497_v24 = vpop.f32.mrb[206].mxu0  ;;  %v5900_v44 = vsel %vm1070_vm1, %v10858_v10, -inf  ;;  %v10866_v28 = vsel %vm8995_vm3, %v5827_v29, -1e+30 }
0x1009   : > { %v5830_v32 = vpop.f32.mrb[207].mxu0  ;;  %v10848_v55 = vsel %vm9014_vm5, %v7497_v24, -1e+30  ;;  %v5894_v26 = vsel %vm1070_vm1, %v10866_v28, -inf }
0x100a   : > { %v5903_v13 = vsel %vm1070_vm1, %v10848_v55, -inf  ;;  %v10854_v1 = vsel %vm9004_vm4, %v5830_v32, -1e+30 }
0x100b   : > { %v5897_v4 = vsel %vm1070_vm1, %v10854_v1, -inf }
0x100e   : > { %6107 = vrot.lane.b32.xlu1 %v11426_v35, %s8499_s30 }
0x1023   : > { %5892 = vmax.xlane.f32.xlu0 %v5891_v59 }
0x1027   : > { %5886 = vmax.xlane.f32.xlu0 %v5885_v30 }
0x102b   : > { %5904 = vmax.xlane.f32.xlu0 %v5903_v13 }
0x102f   : > { %5898 = vmax.xlane.f32.xlu0 %v5897_v4 }
0x1032   : > { %5901 = vmax.xlane.f32.xlu1 %v5900_v44 }
0x1036   : > { %5895 = vmax.xlane.f32.xlu1 %v5894_v26  ;;  %v11427_v26 = vld [vmem:[#allocation24_spill] sm:$0xff] }
0x1042   : > { %v7440_v61 = vpop.f32.mrb[104].mxu1 }
0x1043   : > { %v5185_v63 = vpop.f32.mrb[105].mxu1 }
0x1044   : > { %v7441_v50 = vpop.f32.mrb[106].mxu1 }
0x1045   : > { %v5366_v18 = vpack.c.bf16 %v7441_v50, %v7440_v61  ;;  %v5188_v47 = vpop.f32.mrb[107].mxu1 }
0x1046   : > { %v5365_v57 = vpack.c.bf16 %v5188_v47, %v5185_v63 }
0x1048   : > { %6908 = vmatmul.mubr.msk.bf16.vlgmr.msra.gmra.mrb[88].mxu1 %vm1070_vm1, %v5365_v57 }
0x1049   : > { %7499 = vmatpush3.bf16.msra.mxu1 %v10767_v40  ;;  %5463 = vmatprep.mubr.bf16.mxu1 %v11359_v6 }
0x1050   : > { %6909 = vmatmul.mubr.msk.bf16.gmra.mrb[92].mxu1 %vm1070_vm1, %v5366_v18 }
0x1051   : > { %5473 = vmatprep.mubr.bf16.mxu1 %v11359_v6 }
0x1058   : > { %6910 = vmatmul.mubr.msk.bf16.gmra.mrb[96].mxu1 %vm1070_vm1, %v5367_v58 }
0x1059   : > { %5483 = vmatprep.mubr.bf16.mxu1 %v11359_v6 }
0x1060   : > { %6911 = vmatmul.mubr.msk.bf16.gmra.mrb[100].mxu1 %vm1070_vm1, %v5368_v21 }
0x1061   : > { %5493 = vmatprep.mubr.bf16.mxu1 %v11359_v6 }
0x1065   : > { %v5866_v12 = vpop.xlane.xlu1 %5865 }
0x1066   : > { %v5908_v40 = vsub.f32 %v10772_v7, %v5866_v12 }
0x1067   : > { %v5869_v19 = vpop.xlane.xlu0 %5868 }
0x1068   : > { %v5926_v41 = vmul.f32 1.442695, %v5908_v40  ;;  %v5909_v2 = vsub.f32 %v10782_v14, %v5869_v19 }
0x1069   : > { %v5860_v3 = vpop.xlane.xlu1 %5859 }
0x106a   : > { %8261 = vpow2.f32 %v5926_v41  ;;  %v5928_v27 = vmul.f32 1.442695, %v5909_v2  ;;  %v5906_v11 = vsub.f32 %v10778_v17, %v5860_v3 }
0x106b   : > { %v5863_v58 = vpop.xlane.xlu0 %5862 }
0x106c   : > { %8263 = vpow2.f32 %v5928_v27  ;;  %v5922_v54 = vmul.f32 1.442695, %v5906_v11  ;;  %v5907_v51 = vsub.f32 %v10788_v9, %v5863_v58 }
0x106e   : > { %8265 = vpow2.f32 %v5922_v54  ;;  %v5924_v45 = vmul.f32 1.442695, %v5907_v51 }
0x1070   : > { %8267 = vpow2.f32 %v5924_v45 }
0x1074   : > { %v10889_v21 = vpop.eup %8261 }
0x1075   : > { %v5878_v7 = vpop.xlane.xlu1 %5877  ;;  %v5960_v53 = vsel %vm1070_vm1, %v10889_v21, 0.0 }
0x1076   : > { %v10893_v14 = vpop.eup %8263  ;;  %v5912_v60 = vsub.f32 %v10796_v38, %v5878_v7  ;;  %5961 = vadd.xlane.f32.xlu1 %v5960_v53 }
0x1077   : > { %v5881_v17 = vpop.xlane.xlu0 %5880  ;;  %v5963_v62 = vsel %vm1070_vm1, %v10893_v14, 0.0 }
0x1078   : > { %v10898_v43 = vpop.eup %8265  ;;  %v5934_v9 = vmul.f32 1.442695, %v5912_v60  ;;  %5964 = vadd.xlane.f32.xlu0 %v5963_v62  ;;  %v5913_v61 = vsub.f32 %v10806_v22, %v5881_v17 }
0x1079   : > { %v5872_v48 = vpop.xlane.xlu1 %5871  ;;  %v5954_v42 = vsel %vm1070_vm1, %v10898_v43, 0.0 }
0x107a   : > { %v10902_v23 = vpop.eup %8267  ;;  %8269 = vpow2.f32 %v5934_v9  ;;  %v5910_v5 = vsub.f32 %v10802_v15, %v5872_v48  ;;  %5955 = vadd.xlane.f32.xlu1 %v5954_v42  ;;  %v5936_v63 = vmul.f32 1.442695, %v5913_v61 }
0x107b   : > { %v5875_v38 = vpop.xlane.xlu0 %5874  ;;  %v5957_v29 = vsel %vm1070_vm1, %v10902_v23, 0.0 }
0x107c   : > { %v5930_v24 = vmul.f32 1.442695, %v5910_v5  ;;  %5958 = vadd.xlane.f32.xlu0 %v5957_v29  ;;  %v5911_v50 = vsub.f32 %v10812_v49, %v5875_v38 }
0x107e   : > { %8271 = vpow2.f32 %v5930_v24  ;;  %v5932_v19 = vmul.f32 1.442695, %v5911_v50 }
0x107f   : > { %v6047_v32 = vpop.permute.xlu0 %6046  ;;  %8273 = vpow2.f32 %v5936_v63 }
0x1080   : > { %7500 = vmatprep.subr.bf16.mxu1 %v6047_v32  ;;  %8275 = vpow2.f32 %v5932_v19 }
0x1081   : > { %7501 = vmatpush3.bf16.msra.mxu1 %v6047_v32 }
0x1084   : > { %v10907_v35 = vpop.eup %8269 }
0x1085   : > { %v5972_v59 = vsel %vm1070_vm1, %v10907_v35, 0.0 }
0x1086   : > { %5973 = vadd.xlane.f32.xlu1 %v5972_v59  ;;  %v5890_v30 = vpop.xlane.xlu1 %5889 }
0x1087   : > { %v5916_v22 = vsub.f32 %v10820_v25, %v5890_v30 }
0x1088   : > { %v10911_v13 = vpop.eup %8271 }
0x1089   : > { %v5966_v15 = vsel %vm1070_vm1, %v10911_v13, 0.0  ;;  %v10925_v2 = vpop.eup %8273  ;;  %v5942_v49 = vmul.f32 1.442695, %v5916_v22 }
0x108a   : > { %5967 = vadd.xlane.f32.xlu1 %v5966_v15  ;;  %v5884_v4 = vpop.xlane.xlu1 %5883  ;;  %v5975_v11 = vsel %vm1070_vm1, %v10925_v2, 0.0  ;;  %v10931_v58 = vpop.eup %8275 }
0x108b   : > { %8277 = vpow2.f32 %v5942_v49  ;;  %v5969_v51 = vsel %vm1070_vm1, %v10931_v58, 0.0 }
0x108e   : > { %v6108_v44 = vpop.permute.xlu1 %6107 }
0x108f   : > { %7506 = vmatprep.subr.bf16.mxu0 %v6108_v44 }
0x1090   : > { %7507 = vmatpush3.bf16.msra.mxu0 %v6108_v44 }
0x1092   : > { %6109 = vrot.lane.b32.xlu0 %v11427_v26, %s8499_s30 }
0x1095   : > { %v10943_v60 = vpop.eup %8277 }
0x1096   : > { %v5984_v36 = vsel %vm1070_vm1, %v10943_v60, 0.0 }
0x109b   : > { %6170 = vrot.lane.b32.xlu1 %v11411_v46, %s8499_s30  ;;  %v5914_v46 = vsub.f32 %v10826_v52, %v5884_v4 }
0x109d   : > { %v5938_v3 = vmul.f32 1.442695, %v5914_v46 }
0x109f   : > { %v7456_v18 = vpop.f32.mrb[108].mxu1  ;;  %8279 = vpow2.f32 %v5938_v3 }
0x10a0   : > { %v5295_v47 = vpop.f32.mrb[109].mxu1 }
0x10a1   : > { %v7457_v57 = vpop.f32.mrb[110].mxu1 }
0x10a2   : > { %v5370_v12 = vpack.c.bf16 %v7457_v57, %v7456_v18  ;;  %v5298_v40 = vpop.f32.mrb[111].mxu1 }
0x10a3   : > { %v5369_v41 = vpack.c.bf16 %v5298_v40, %v5295_v47 }
0x10a5   : > { %6912 = vmatmul.mubr.msk.bf16.gmra.mrb[72].mxu1 %vm1070_vm1, %v5369_v41 }
0x10a6   : > { %5503 = vmatprep.mubr.bf16.mxu1 %v11359_v6 }
0x10a9   : > { %v10950_v39 = vpop.eup %8279 }
0x10aa   : > { %v5978_v37 = vsel %vm1070_vm1, %v10950_v39, 0.0 }
0x10ad   : > { %6913 = vmatmul.mubr.msk.bf16.gmra.mrb[76].mxu1 %vm1070_vm1, %v5370_v12 }
0x10ae   : > { %5513 = vmatprep.mubr.bf16.mxu1 %v11359_v6 }
0x10b0   : > { %v5893_v27 = vpop.xlane.xlu0 %5892 }
0x10b1   : > { %v5917_v54 = vsub.f32 %v10836_v8, %v5893_v27  ;;  %5976 = vadd.xlane.f32.xlu0 %v5975_v11 }
0x10b3   : > { %v5944_v25 = vmul.f32 1.442695, %v5917_v54 }
0x10b4   : > { %v5887_v52 = vpop.xlane.xlu0 %5886 }
0x10b5   : > { %8281 = vpow2.f32 %v5944_v25  ;;  %v5915_v45 = vsub.f32 %v10842_v20, %v5887_v52  ;;  %5970 = vadd.xlane.f32.xlu0 %v5969_v51  ;;  %6914 = vmatmul.mubr.msk.bf16.gmra.mrb[80].mxu1 %vm1070_vm1, %v5371_v33 }
0x10b6   : > { %5523 = vmatprep.mubr.bf16.mxu1 %v11359_v6 }
0x10b7   : > { %v5940_v7 = vmul.f32 1.442695, %v5915_v45 }
0x10b8   : > { %v5905_v8 = vpop.xlane.xlu0 %5904 }
0x10b9   : > { %8283 = vpow2.f32 %v5940_v7  ;;  %v5921_v53 = vsub.f32 %v10848_v55, %v5905_v8 }
0x10bb   : > { %v5952_v17 = vmul.f32 1.442695, %v5921_v53 }
0x10bc   : > { %v5899_v62 = vpop.xlane.xlu0 %5898 }
0x10bd   : > { %8285 = vpow2.f32 %v5952_v17  ;;  %v5919_v20 = vsub.f32 %v10854_v1, %v5899_v62  ;;  %6915 = vmatmul.mubr.msk.bf16.gmra.mrb[84].mxu1 %vm1070_vm1, %v5372_v31 }
0x10bf   : > { %v10954_v33 = vpop.eup %8281  ;;  %v5948_v55 = vmul.f32 1.442695, %v5919_v20  ;;  %5985 = vadd.xlane.f32.xlu1 %v5984_v36  ;;  %v5902_v9 = vpop.xlane.xlu1 %5901 }
0x10c0   : > { %v5920_v48 = vsub.f32 %v10858_v10, %v5902_v9  ;;  %v5987_v1 = vsel %vm1070_vm1, %v10954_v33, 0.0  ;;  %v7937_v9 = vld [vmem:[#allocation7 + $0xa4] ss:$8 sps:$4 sm:$0xff]  }
0x10c1   : > { %8287 = vpow2.f32 %v5948_v55  ;;  %5988 = vadd.xlane.f32.xlu0 %v5987_v1 }
0x10c2   : > { %v5950_v0 = vmul.f32 1.442695, %v5920_v48 }
0x10c3   : > { %v10961_v31 = vpop.eup %8283  ;;  %5979 = vadd.xlane.f32.xlu1 %v5978_v37  ;;  %v5896_v42 = vpop.xlane.xlu1 %5895 }
0x10c4   : > { %8289 = vpow2.f32 %v5950_v0  ;;  %v5918_v5 = vsub.f32 %v10866_v28, %v5896_v42  ;;  %v5981_v38 = vsel %vm1070_vm1, %v10961_v31, 0.0 }
0x10c5   : > { %5982 = vadd.xlane.f32.xlu0 %v5981_v38 }
0x10c6   : > { %v5946_v10 = vmul.f32 1.442695, %v5918_v5  ;;  %v7935_v5 = vld [vmem:[#allocation7 + $0xa0] ss:$8 sps:$4 sm:$0xff]  }
0x10c7   : > { %v10966_v29 = vpop.eup %8285 }
0x10c8   : > { %8291 = vpow2.f32 %v5946_v10  ;;  %v5999_v24 = vsel %vm1070_vm1, %v10966_v29, 0.0 }
0x10c9   : > { %6000 = vadd.xlane.f32.xlu0 %v5999_v24 }
0x10cb   : > { %v10970_v32 = vpop.eup %8287 }
0x10cc   : > { %v5993_v59 = vsel %vm1070_vm1, %v10970_v32, 0.0 }
0x10cd   : > { %5994 = vadd.xlane.f32.xlu0 %v5993_v59 }
0x10ce   : > { %v10974_v30 = vpop.eup %8289 }
0x10cf   : > { %v5996_v28 = vsel %vm1070_vm1, %v10974_v30, 0.0 }
0x10d0   : > { %5997 = vadd.xlane.f32.xlu1 %v5996_v28 }
0x10d2   : > { %v10978_v15 = vpop.eup %8291 }
0x10d3   : > { %v5990_v4 = vsel %vm1070_vm1, %v10978_v15, 0.0 }
0x10d4   : > { %5991 = vadd.xlane.f32.xlu1 %v5990_v4 }
0x10e3   : > { %6172 = vrot.lane.b32.xlu0 %v11425_v16, %s8499_s30 }
0x10e5   : > { %6233 = vrot.lane.b32.xlu1 %v11352_v56, %s8499_s30 }
0x10e9   : > { %6235 = vrot.lane.b32.xlu1 %v11399_v34, %s8499_s30 }
0x1103   : > { %v5962_v44 = vpop.xlane.xlu1 %5961 }
0x1105   : > { %v5965_v26 = vpop.xlane.xlu0 %5964 }
0x1106   : > { %8293 = vrcp.f32 %v5965_v26  ;;  %v7940_v26 = vld [vmem:[#allocation7 + $0xb4] ss:$8 sps:$4 sm:$0xff]  }
0x1107   : > { %v5956_v61 = vpop.xlane.xlu1 %5955 }
0x1108   : > { %8295 = vrcp.f32 %v5956_v61 }
0x1109   : > { %8297 = vrcp.f32 %v5962_v44  ;;  %v5959_v63 = vpop.xlane.xlu0 %5958 }
0x110a   : > { %8299 = vrcp.f32 %v5959_v63  ;;  %v7938_v63 = vld [vmem:[#allocation7 + $0xb0] ss:$8 sps:$4 sm:$0xff]  }
0x110d   : > { %v6110_v50 = vpop.permute.xlu0 %6109 }
0x110e   : > { %7508 = vmatprep.subr.bf16.mxu0 %v6110_v50 }
0x110f   : > { %7509 = vmatpush3.bf16.msra.mxu0 %v6110_v50 }
0x1110   : > { %v8294_v18 = vpop.eup %8293 }
0x1111   : > { %v6021_v56 = vmul.f32 %v8294_v18, %v10893_v14 }
0x1112   : > { %v8296_v47 = vpop.eup %8295 }
0x1113   : > { %v8298_v16 = vpop.eup %8297  ;;  %v5974_v57 = vpop.xlane.xlu1 %5973  ;;  %v6018_v34 = vmul.f32 %v8296_v47, %v10898_v43 }
0x1114   : > { %v8300_v12 = vpop.eup %8299  ;;  %v6020_v19 = vmul.f32 %v8298_v16, %v10889_v21 }
0x1115   : > { %v6019_v40 = vmul.f32 %v8300_v12, %v10902_v23 }
0x1116   : > { %v6035_v46 = vpack.c.bf16 %v6021_v56, %v6020_v19 }
0x1117   : > { %v5968_v41 = vpop.xlane.xlu1 %5967  ;;  %v6034_v22 = vpack.c.bf16 %v6019_v40, %v6018_v34 }
0x1119   : > { %7502 = vmatprep.mubr.msk.bf16.mxu1 %vm1070_vm1, %v6034_v22 }
0x111a   : > { %7503 = vmatmul.mubr.msk.bf16.vlgmr.msra.gmra.mrb[112].mxu1 %vm1070_vm1, %v6035_v46 }
0x111b   : > { %v6171_v49 = vpop.permute.xlu1 %6170 }
0x111c   : > { %7514 = vmatprep.subr.bf16.mxu1 %v6171_v49 }
0x111d   : > { %7515 = vmatpush3.bf16.msra.mxu1 %v6171_v49 }
0x113e   : > { %v5977_v3 = vpop.xlane.xlu0 %5976 }
0x113f   : > { %8301 = vrcp.f32 %v5977_v3 }
0x1140   : > { %8303 = vrcp.f32 %v5968_v41 }
0x1141   : > { %8305 = vrcp.f32 %v5974_v57 }
0x1142   : > { %v5971_v14 = vpop.xlane.xlu0 %5970 }
0x1143   : > { %8307 = vrcp.f32 %v5971_v14 }
0x1149   : > { %v8302_v43 = vpop.eup %8301 }
0x114a   : > { %v8304_v23 = vpop.eup %8303  ;;  %v6025_v54 = vmul.f32 %v8302_v43, %v10925_v2 }
0x114b   : > { %v8306_v27 = vpop.eup %8305  ;;  %v6022_v52 = vmul.f32 %v8304_v23, %v10911_v13 }
0x114c   : > { %v5986_v21 = vpop.xlane.xlu1 %5985  ;;  %v6024_v45 = vmul.f32 %v8306_v27, %v10907_v35 }
0x114d   : > { %v8308_v11 = vpop.eup %8307 }
0x114e   : > { %v5989_v25 = vpop.xlane.xlu0 %5988  ;;  %v6023_v51 = vmul.f32 %v8308_v11, %v10931_v58  ;;  %v6037_v53 = vpack.c.bf16 %v6025_v54, %v6024_v45 }
0x114f   : > { %8309 = vrcp.f32 %v5989_v25  ;;  %v11428_v25 = vld [vmem:[#allocation20_spill] sm:$0xff] }
0x1150   : > { %v5980_v7 = vpop.xlane.xlu1 %5979  ;;  %v6036_v8 = vpack.c.bf16 %v6023_v51, %v6022_v52  ;;  %v6499_v52 = vsub.s32 0, %v11428_v25  ;;  %v6495_v51 = vld [vmem:[%s11191_s3] sm:$0x3]  ;;  %v6503_v45 = vsub.s32 1, %v11428_v25 }
0x1151   : > { %8311 = vrcp.f32 %v5980_v7 }
0x1152   : > { %8313 = vrcp.f32 %v5986_v21  ;;  %v5983_v17 = vpop.xlane.xlu0 %5982  ;;  %7510 = vmatprep.mubr.msk.bf16.mxu0 %vm1070_vm1, %v6036_v8  ;;  %v11033_v7 = vrot.slane %v6495_v51, %v6499_v52 }
0x1153   : > { %8315 = vrcp.f32 %v5983_v17  ;;  %7511 = vmatmul.mubr.msk.bf16.vlgmr.msra.gmra.mrb[208].mxu0 %vm1070_vm1, %v6037_v53  ;;  %v11035_v53 = vrot.slane %v6495_v51, %v6503_v45  ;;  %v11429_v17 = vld [vmem:[#allocation48_spill] sm:$0xff]  ;;  %v11444_v51 = vld [vmem:[#allocation63_spill] sm:$0xff] }
0x1156   : > { %v6001_v2 = vpop.xlane.xlu0 %6000 }
0x1159   : > { %v8310_v62 = vpop.eup %8309 }
0x115a   : > { %v5995_v20 = vpop.xlane.xlu0 %5994  ;;  %v6029_v35 = vmul.f32 %v8310_v62, %v10954_v33 }
0x115b   : > { %v8312_v13 = vpop.eup %8311 }
0x115c   : > { %v8314_v36 = vpop.eup %8313  ;;  %v6026_v1 = vmul.f32 %v8312_v13, %v10950_v39 }
0x115d   : > { %v8316_v58 = vpop.eup %8315  ;;  %v5998_v55 = vpop.xlane.xlu1 %5997  ;;  %v6028_v37 = vmul.f32 %v8314_v36, %v10943_v60 }
0x115e   : > { %v6173_v48 = vpop.permute.xlu0 %6172  ;;  %v6027_v0 = vmul.f32 %v8316_v58, %v10961_v31  ;;  %8317 = vrcp.f32 %v5998_v55  ;;  %v11431_v58 = vld [vmem:[#allocation50_spill] sm:$0xff] }
0x115f   : > { %7516 = vmatprep.subr.bf16.mxu1 %v6173_v48  ;;  %8319 = vrcp.f32 %v5995_v20  ;;  %v6039_v10 = vpack.c.bf16 %v6029_v35, %v6028_v37 }
0x1160   : > { %7517 = vmatpush3.bf16.msra.mxu1 %v6173_v48  ;;  %v6038_v42 = vpack.c.bf16 %v6027_v0, %v6026_v1  ;;  %8321 = vrcp.f32 %v6001_v2  ;;  %v11432_v48 = vld [vmem:[#allocation51_spill] sm:$0xff] }
0x1161   : > { %v5992_v38 = vpop.xlane.xlu1 %5991  ;;  %6350 = vmatprep.subr.bf16.mxu1 %v7937_v9 }
0x1162   : > { %8323 = vrcp.f32 %v5992_v38  ;;  %7518 = vmatprep.mubr.msk.bf16.mxu1 %vm1070_vm1, %v6038_v42 }
0x1163   : > { %7519 = vmatmul.mubr.msk.bf16.vlgmr.msra.gmra.mrb[116].mxu1 %vm1070_vm1, %v6039_v10 }
0x1164   : > { %6351 = vmatpush1.bf16.msra.mxu1 %v7935_v5  ;;  %6382 = vmatprep.mubr.bf16.mxu1 %v11359_v6  ;;  %v11433_v5 = vld [vmem:[#allocation52_spill] sm:$0xff] }
0x1165   : > { %v6234_v39 = vpop.permute.xlu1 %6233  ;;  %6352 = vmatprep.subr.bf16.mxu1 %v7940_v26 }
0x1166   : > { %7522 = vmatprep.subr.bf16.mxu0 %v6234_v39 }
0x1167   : > { %7523 = vmatpush3.bf16.msra.mxu0 %v6234_v39  ;;  %v11434_v39 = vld [vmem:[#allocation53_spill] sm:$0xff] }
0x1168   : > { %v8318_v60 = vpop.eup %8317  ;;  %6353 = vmatpush1.bf16.msra.mxu1 %v7938_v63 }
0x1169   : > { %v6236_v33 = vpop.permute.xlu1 %6235  ;;  %v8320_v31 = vpop.eup %8319  ;;  %v6032_v28 = vmul.f32 %v8318_v60, %v10974_v30 }
0x116a   : > { %7524 = vmatprep.subr.bf16.mxu0 %v6236_v33  ;;  %v8322_v24 = vpop.eup %8321  ;;  %v6031_v44 = vmul.f32 %v8320_v31, %v10970_v32 }
0x116b   : > { %7525 = vmatpush3.bf16.msra.mxu0 %v6236_v33  ;;  %v6033_v61 = vmul.f32 %v8322_v24, %v10966_v29  ;;  %v11435_v24 = vld [vmem:[#allocation54_spill] sm:$0xff] }
0x116c   : > { %v8324_v59 = vpop.eup %8323 }
0x116d   : > { %v6030_v4 = vmul.f32 %v8324_v59, %v10978_v15  ;;  %v6041_v18 = vpack.c.bf16 %v6033_v61, %v6032_v28 }
0x116f   : > { %v6040_v50 = vpack.c.bf16 %v6031_v44, %v6030_v4  ;;  %v11436_v44 = vld [vmem:[#allocation55_spill] sm:$0xff] }
0x1171   : > { %7526 = vmatprep.mubr.msk.bf16.mxu0 %vm1070_vm1, %v6040_v50 }
0x1172   : > { %7527 = vmatmul.mubr.msk.bf16.vlgmr.msra.gmra.mrb[212].mxu0 %vm1070_vm1, %v6041_v18  ;;  %v11437_v18 = vld [vmem:[#allocation56_spill] sm:$0xff] }
0x11ed   : > { %v7504_v47 = vpop.f32.mrb[112].mxu1 }
0x11ee   : > { %v6090_v16 = vpop.f32.mrb[113].mxu1 }
0x11ef   : > { %v7505_v57 = vpop.f32.mrb[114].mxu1 }
0x11f0   : > { %v6295_v30 = vpack.c.bf16 %v7505_v57, %v7504_v47  ;;  %v6093_v12 = vpop.f32.mrb[115].mxu1  ;;  %v11438_v57 = vld [vmem:[#allocation57_spill] sm:$0xff] }
0x11f1   : > { %v6294_v15 = vpack.c.bf16 %v6093_v12, %v6090_v16 }
0x11f3   : > { %6936 = vmatmul.mubr.msk.bf16.vlgmr.msra.gmra.mrb[88].mxu1 %vm1070_vm1, %v6294_v15 }
0x11f4   : > { %6392 = vmatprep.mubr.bf16.mxu1 %v11359_v6 }
0x11fb   : > { %6937 = vmatmul.mubr.msk.bf16.gmra.mrb[92].mxu1 %vm1070_vm1, %v6295_v30 }
0x11fc   : > { %6402 = vmatprep.mubr.bf16.mxu1 %v11359_v6 }
0x1226   : > { %v7512_v29 = vpop.f32.mrb[208].mxu0 }
0x1227   : > { %v6153_v32 = vpop.f32.mrb[209].mxu0 }
0x1228   : > { %v7513_v56 = vpop.f32.mrb[210].mxu0 }
0x1229   : > { %v6297_v34 = vpack.c.bf16 %v7513_v56, %v7512_v29  ;;  %v6156_v40 = vpop.f32.mrb[211].mxu0  ;;  %v11439_v29 = vld [vmem:[#allocation58_spill] sm:$0xff] }
0x122a   : > { %v6296_v19 = vpack.c.bf16 %v6156_v40, %v6153_v32  ;;  %v11440_v40 = vld [vmem:[#allocation59_spill] sm:$0xff] }
0x122c   : > { %6938 = vmatmul.mubr.msk.bf16.gmra.mrb[96].mxu1 %vm1070_vm1, %v6296_v19 }
0x122d   : > { %6412 = vmatprep.mubr.bf16.mxu1 %v11359_v6 }
0x1234   : > { %6939 = vmatmul.mubr.msk.bf16.gmra.mrb[100].mxu1 %vm1070_vm1, %v6297_v34 }
0x1235   : > { %6422 = vmatprep.mubr.bf16.mxu1 %v11359_v6 }
0x1236   : > { %v7520_v41 = vpop.f32.mrb[116].mxu1 }
0x1237   : > { %v6216_v22 = vpop.f32.mrb[117].mxu1 }
0x1238   : > { %v7521_v46 = vpop.f32.mrb[118].mxu1 }
0x1239   : > { %v6299_v49 = vpack.c.bf16 %v7521_v46, %v7520_v41  ;;  %v6219_v3 = vpop.f32.mrb[119].mxu1 }
0x123a   : > { %v6298_v14 = vpack.c.bf16 %v6219_v3, %v6216_v22 }
0x123c   : > { %6940 = vmatmul.mubr.msk.bf16.gmra.mrb[72].mxu1 %vm1070_vm1, %v6298_v14 }
0x123d   : > { %6432 = vmatprep.mubr.bf16.mxu1 %v11359_v6 }
0x1244   : > { %6941 = vmatmul.mubr.msk.bf16.gmra.mrb[76].mxu1 %vm1070_vm1, %v6299_v49  ;;  %v11441_v49 = vld [vmem:[#allocation60_spill] sm:$0xff] }
0x1245   : > { %v7528_v43 = vpop.f32.mrb[212].mxu0  ;;  %6442 = vmatprep.mubr.bf16.mxu1 %v11359_v6 }
0x1246   : > { %v6279_v23 = vpop.f32.mrb[213].mxu0 }
0x1247   : > { %v7529_v27 = vpop.f32.mrb[214].mxu0 }
0x1248   : > { %v6301_v21 = vpack.c.bf16 %v7529_v27, %v7528_v43  ;;  %v6282_v11 = vpop.f32.mrb[215].mxu0  ;;  %v11442_v43 = vld [vmem:[#allocation61_spill] sm:$0xff] }
0x1249   : > { %v6300_v54 = vpack.c.bf16 %v6282_v11, %v6279_v23  ;;  %v11443_v11 = vld [vmem:[#allocation62_spill] sm:$0xff] }
0x124c   : > { %6942 = vmatmul.mubr.msk.bf16.gmra.mrb[80].mxu1 %vm1070_vm1, %v6300_v54 }
0x124d   : > { %6452 = vmatprep.mubr.bf16.mxu1 %v11359_v6  ;;  %v11430_v6 = vld [vmem:[#allocation49_spill] sm:$0xff] }
0x1254   : > { %6943 = vmatmul.mubr.msk.bf16.gmra.mrb[84].mxu1 %vm1070_vm1, %v6301_v21 }
0x12c6   : > { %v6384_v8 = vpop.f32.mrb[88].mxu1 }
0x12c7   : > { %v7534_v2 = vadd.f32 %v6384_v8, %v11429_v17  ;;  %v6386_v62 = vpop.f32.mrb[89].mxu1 }
0x12c8   : > { %v7535_v20 = vadd.f32 %v6386_v62, %v11430_v6  ;;  %v6388_v13 = vpop.f32.mrb[90].mxu1 }
0x12c9   : > { %v6507_v36 = vadd.f32 %v7534_v2, %v11033_v7  ;;  %v7536_v35 = vadd.f32 %v6388_v13, %v11431_v58  ;;  %v6390_v55 = vpop.f32.mrb[91].mxu1 }
0x12ca   : > { %v6508_v9 = vadd.f32 %v7535_v20, %v11035_v53  ;;  %v7537_v1 = vadd.f32 %v6390_v55, %v11432_v48 }
0x12cb   : > { %6539 = vst [vmem:[%s11045_s7] sm:$0xff] %v6507_v36  ;;  %v6509_v0 = vadd.f32 %v7536_v35, %v11033_v7 }
0x12cc   : > { %6540 = vst.msk [vmem:[%s11045_s7 + $0x8] sm:$0xff] %vm681_vm0, %v6508_v9  ;;  %v6510_v37 = vadd.f32 %v7537_v1, %v11035_v53 }
0x12cd   : > { %6541 = vst [vmem:[%s11045_s7 + $0x10] sm:$0xff] %v6509_v0 }
0x12ce   : > { %6542 = vst.msk [vmem:[%s11045_s7 + $0x18] sm:$0xff] %vm681_vm0, %v6510_v37  ;;  %v6394_v42 = vpop.f32.mrb[92].mxu1 }
0x12cf   : > { %v7538_v38 = vadd.f32 %v6394_v42, %v11433_v5  ;;  %v6396_v10 = vpop.f32.mrb[93].mxu1 }
0x12d0   : > { %v7539_v60 = vadd.f32 %v6396_v10, %v11434_v39  ;;  %v6398_v33 = vpop.f32.mrb[94].mxu1 }
0x12d1   : > { %v6511_v31 = vadd.f32 %v7538_v38, %v11033_v7  ;;  %v7540_v59 = vadd.f32 %v6398_v33, %v11435_v24  ;;  %v6400_v28 = vpop.f32.mrb[95].mxu1 }
0x12d2   : > { %v6512_v4 = vadd.f32 %v7539_v60, %v11035_v53  ;;  %v7541_v26 = vadd.f32 %v6400_v28, %v11436_v44 }
0x12d3   : > { %6543 = vst [vmem:[%s11045_s7 + $0x20] sm:$0xff] %v6511_v31  ;;  %v6513_v61 = vadd.f32 %v7540_v59, %v11033_v7 }
0x12d4   : > { %6544 = vst.msk [vmem:[%s11045_s7 + $0x28] sm:$0xff] %vm681_vm0, %v6512_v4  ;;  %v6514_v63 = vadd.f32 %v7541_v26, %v11035_v53 }
0x12d5   : > { %6545 = vst [vmem:[%s11045_s7 + $0x30] sm:$0xff] %v6513_v61 }
0x12d6   : > { %6546 = vst.msk [vmem:[%s11045_s7 + $0x38] sm:$0xff] %vm681_vm0, %v6514_v63 }
0x12ff   : > { %v6404_v50 = vpop.f32.mrb[96].mxu1 }
0x1300   : > { %v7542_v47 = vadd.f32 %v6404_v50, %v11437_v18  ;;  %v6406_v16 = vpop.f32.mrb[97].mxu1 }
0x1301   : > { %v7543_v30 = vadd.f32 %v6406_v16, %v11438_v57  ;;  %v6408_v12 = vpop.f32.mrb[98].mxu1 }
0x1302   : > { %v6515_v15 = vadd.f32 %v7542_v47, %v11033_v7  ;;  %v7544_v32 = vadd.f32 %v6408_v12, %v11439_v29  ;;  %v6410_v56 = vpop.f32.mrb[99].mxu1 }
0x1303   : > { %v6516_v34 = vadd.f32 %v7543_v30, %v11035_v53  ;;  %v7545_v19 = vadd.f32 %v6410_v56, %v11440_v40 }
0x1304   : > { %6547 = vst [vmem:[%s11045_s7 + $0x40] sm:$0xff] %v6515_v15  ;;  %v6517_v41 = vadd.f32 %v7544_v32, %v11033_v7 }
0x1305   : > { %6548 = vst.msk [vmem:[%s11045_s7 + $0x48] sm:$0xff] %vm681_vm0, %v6516_v34  ;;  %v6518_v22 = vadd.f32 %v7545_v19, %v11035_v53 }
0x1306   : > { %6549 = vst [vmem:[%s11045_s7 + $0x50] sm:$0xff] %v6517_v41 }
0x1307   : > { %6550 = vst.msk [vmem:[%s11045_s7 + $0x58] sm:$0xff] %vm681_vm0, %v6518_v22  ;;  %v6414_v46 = vpop.f32.mrb[100].mxu1 }
0x1308   : > { %v7546_v3 = vadd.f32 %v6414_v46, %v11441_v49  ;;  %v6416_v14 = vpop.f32.mrb[101].mxu1 }
0x1309   : > { %v7547_v23 = vadd.f32 %v6416_v14, %v11442_v43  ;;  %v6418_v27 = vpop.f32.mrb[102].mxu1 }
0x130a   : > { %v6519_v21 = vadd.f32 %v7546_v3, %v11033_v7  ;;  %v7548_v54 = vadd.f32 %v6418_v27, %v11443_v11  ;;  %v6420_v25 = vpop.f32.mrb[103].mxu1 }
0x130b   : > { %v6520_v52 = vadd.f32 %v7547_v23, %v11035_v53  ;;  %v7549_v45 = vadd.f32 %v6420_v25, %v11444_v51 }
0x130c   : > { %6551 = vst [vmem:[%s11045_s7 + $0x60] sm:$0xff] %v6519_v21  ;;  %v6521_v8 = vadd.f32 %v7548_v54, %v11033_v7 }
0x130d   : > { %6552 = vst.msk [vmem:[%s11045_s7 + $0x68] sm:$0xff] %vm681_vm0, %v6520_v52  ;;  %v6522_v17 = vadd.f32 %v7549_v45, %v11035_v53 }
0x130e   : > { %6553 = vst [vmem:[%s11045_s7 + $0x70] sm:$0xff] %v6521_v8 }
0x130f   : > { %6554 = vst.msk [vmem:[%s11045_s7 + $0x78] sm:$0xff] %vm681_vm0, %v6522_v17  ;;  %v6424_v2 = vpop.f32.mrb[72].mxu1 }
0x1310   : > { %v6523_v62 = vadd.f32 %v11033_v7, %v6424_v2  ;;  %v6426_v6 = vpop.f32.mrb[73].mxu1 }
0x1311   : > { %v6524_v20 = vadd.f32 %v11035_v53, %v6426_v6  ;;  %v6428_v13 = vpop.f32.mrb[74].mxu1 }
0x1312   : > { %6555 = vst [vmem:[%s11045_s7 + $0x80] sm:$0xff] %v6523_v62  ;;  %v6525_v36 = vadd.f32 %v11033_v7, %v6428_v13  ;;  %v6430_v58 = vpop.f32.mrb[75].mxu1 }
0x1313   : > { %6556 = vst.msk [vmem:[%s11045_s7 + $0x88] sm:$0xff] %vm681_vm0, %v6524_v20  ;;  %v6526_v35 = vadd.f32 %v11035_v53, %v6430_v58 }
0x1314   : > { %6557 = vst [vmem:[%s11045_s7 + $0x90] sm:$0xff] %v6525_v36 }
0x1315   : > { %6558 = vst.msk [vmem:[%s11045_s7 + $0x98] sm:$0xff] %vm681_vm0, %v6526_v35 }
0x1317   : > { %v6434_v55 = vpop.f32.mrb[76].mxu1 }
0x1318   : > { %v6527_v9 = vadd.f32 %v11033_v7, %v6434_v55  ;;  %v6436_v48 = vpop.f32.mrb[77].mxu1 }
0x1319   : > { %v6528_v1 = vadd.f32 %v11035_v53, %v6436_v48  ;;  %v6438_v0 = vpop.f32.mrb[78].mxu1 }
0x131a   : > { %6559 = vst [vmem:[%s11045_s7 + $0xa0] sm:$0xff] %v6527_v9  ;;  %v6529_v37 = vadd.f32 %v11033_v7, %v6438_v0  ;;  %v6440_v42 = vpop.f32.mrb[79].mxu1 }
0x131b   : > { %6560 = vst.msk [vmem:[%s11045_s7 + $0xa8] sm:$0xff] %vm681_vm0, %v6528_v1  ;;  %v6530_v5 = vadd.f32 %v11035_v53, %v6440_v42 }
0x131c   : > { %6561 = vst [vmem:[%s11045_s7 + $0xb0] sm:$0xff] %v6529_v37 }
0x131d   : > { %6562 = vst.msk [vmem:[%s11045_s7 + $0xb8] sm:$0xff] %vm681_vm0, %v6530_v5 }
0x131f   : > { %v6444_v38 = vpop.f32.mrb[80].mxu1 }
0x1320   : > { %v6531_v10 = vadd.f32 %v11033_v7, %v6444_v38  ;;  %v6446_v39 = vpop.f32.mrb[81].mxu1 }
0x1321   : > { %v6532_v60 = vadd.f32 %v11035_v53, %v6446_v39  ;;  %v6448_v33 = vpop.f32.mrb[82].mxu1 }
0x1322   : > { %6563 = vst [vmem:[%s11045_s7 + $0xc0] sm:$0xff] %v6531_v10  ;;  %v6533_v31 = vadd.f32 %v11033_v7, %v6448_v33  ;;  %v6450_v24 = vpop.f32.mrb[83].mxu1 }
0x1323   : > { %6564 = vst.msk [vmem:[%s11045_s7 + $0xc8] sm:$0xff] %vm681_vm0, %v6532_v60  ;;  %v6534_v59 = vadd.f32 %v11035_v53, %v6450_v24 }
0x1324   : > { %6565 = vst [vmem:[%s11045_s7 + $0xd0] sm:$0xff] %v6533_v31 }
0x1325   : > { %6566 = vst.msk [vmem:[%s11045_s7 + $0xd8] sm:$0xff] %vm681_vm0, %v6534_v59 }
0x1327   : > { %v6454_v28 = vpop.f32.mrb[84].mxu1 }
0x1328   : > { %v6535_v4 = vadd.f32 %v11033_v7, %v6454_v28  ;;  %v6456_v44 = vpop.f32.mrb[85].mxu1 }
0x1329   : > { %v6536_v26 = vadd.f32 %v11035_v53, %v6456_v44  ;;  %v6458_v61 = vpop.f32.mrb[86].mxu1 }
0x132a   : > { %6567 = vst [vmem:[%s11045_s7 + $0xe0] sm:$0xff] %v6535_v4  ;;  %v6537_v63 = vadd.f32 %v11033_v7, %v6458_v61  ;;  %v6460_v50 = vpop.f32.mrb[87].mxu1 }
0x132b   : > { %6568 = vst.msk [vmem:[%s11045_s7 + $0xe8] sm:$0xff] %vm681_vm0, %v6536_v26  ;;  %v6538_v18 = vadd.f32 %v11035_v53, %v6460_v50 }
0x132c   : > { %6569 = vst [vmem:[%s11045_s7 + $0xf0] sm:$0xff] %v6537_v63 }
0x132d   : > { %6570 = vst.msk [vmem:[%s11045_s7 + $0xf8] sm:$0xff] %vm681_vm0, %v6538_v18 }
0x132e   : > { %8428 = shalt.err (!%p8425_p2)
}
0x132f   : > { %s8429_s13 = scalar_lea.hbm %s11136_s29, 4096  ;;  %s8433_s30 = scalar_lea.hbm %s11192_s4, 8192 }
0x1330   : > { %p8430_p13 = scmp.ne.s32.totalorder %s11136_s29, %s8429_s13  ;;  %p8434_p4 = scmp.lt.u32.totalorder %s11136_s29, %s11192_s4 }
0x1331   : > { %p8435_p7 = scmp.lt.u32.totalorder %s8433_s30, %s8429_s13  ;;  %p8437_p11 = scmp.lt.u32.totalorder %s8429_s13, %s11136_s29 }
0x1332   : > { %p8431_p6 = pnand %p8430_p13, %p11445_p0 }
0x1333   : > { %p8436_p8 = por %p8435_p7, %p8434_p4 }
0x1334   : > { %p8432_p10 = pneg %p8431_p6 }
0x1335   : > { %p8438_p1 = por %p8437_p11, %p8436_p8 }
0x1337   : > { %p8439_p3 = pnand %p8438_p1, %p8432_p10 }
0x1339   : > { %8442 = shalt.err (!%p8439_p3)
}
0x133a   : > { %s8501_s7 = smov 256   ;;  %s8502_s24 = smov 16  }
0x133b   : > { %7752 = dma.vmem_to_hbm [thread:$0]  (%p11445_p0), %s11138_s26, 4096, %s11136_s29, %s6572_s19, %s8501_s7, %s8501_s7, %s8502_s24  }
0x133c PF: > { %s6601_s28 = sand.u32 1, %s8473_s15   ;;  %p11446_p5 = scmp.ne.s32.totalorder %s11262_s22, 0 }
0x133d   : > { %p11447_p9 = scmp.ge.s32.totalorder %s8485_s18, 2  ;;  %s6602_s27 = scalar_lea.sflag [#allocation4], %s6601_s28 }
0x133f   : > { %p7766_p12 = pnand %p11447_p9, %p11446_p5 }
0x1341   : > { %8468 = dma.done.wait (!%p7766_p12), %s6602_s27, 4096  }
0x1342   : > { %8470 = vsyncadd (!%p7766_p12), %s6602_s27, 4294963200  ;;  %p18_p2 = scmp.ge.s32.totalorder %s8638_s11, 4   ;;  %s11448_s15 = smov %s8477_s16 }
0x1343   : > { %s11449_s16 = smov %s8481_s17  ;;  %s11450_s17 = smov %s8647_s14 }
0x1344   : > { %s11451_s18 = smov %s8638_s11  ;;  %20 = sbr.rel (!%p18_p2) target bundleno = 6 (0x6), region = 89 }
0x134b   :  { %6607 = vsyncpa [#allocation3], 1 }
0x134c   :  { %6609 = vsyncpa [#allocation3 + $0x1], 1 }
0x134d   :  { %6610 = vsyncpa [#allocation6], 1 }
0x134e   :  { %6611 = vsyncpa [#allocation4], 1 }
0x134f   :  { %6613 = vsyncpa [#allocation4 + $0x1], 1 }

</bundles_post_ra>
